<compile_context>
chip_gen: v7x
topology: tpu7x:2x2x1
jax: 0.10.0
libtpu: 0.0.40
codegen_flags: <defaults>
</compile_context>

<pallas_src>
import jax
import jax.numpy as jnp
import numpy as np
from jax.experimental import pallas as pl
from jax.experimental.pallas import tpu as pltpu


def bottleneck_kernel(x_ref, x_hbm_ref, w1_ref, s1_ref, b1_ref,
                      wdw_ref, wpw_ref, s2_ref, b2_ref,
                      w3_ref, s3_ref, b3_ref, out_ref,
                      halo_buf, halo_sem):
    _, TH, W, Cin = x_ref.shape           # one (batch, row-block) tile per step
    H = x_hbm_ref.shape[1]
    width = w1_ref.shape[1]
    Cout = w3_ref.shape[1]
    M = TH * W
    M2 = (TH + 2) * W
    f32 = jnp.float32
    mm = w1_ref.dtype                     # matmul operand dtype

    n = pl.program_id(0)
    i = pl.program_id(1)
    nb = pl.num_programs(1)

    # ---- fetch the 2 halo rows straight from HBM (no host-side gather) ------
    top = jnp.maximum(i * TH - 1, 0)
    bot = jnp.minimum(i * TH + TH, H - 1)
    cp_top = pltpu.make_async_copy(x_hbm_ref.at[n, top], halo_buf.at[0], halo_sem.at[0])
    cp_bot = pltpu.make_async_copy(x_hbm_ref.at[n, bot], halo_buf.at[1], halo_sem.at[1])
    cp_top.start()
    cp_bot.start()

    # ---- conv1 (1x1) on owned rows: overlaps the tiny halo DMAs -------------
    y_own = jnp.dot(x_ref[0].reshape(M, Cin).astype(mm), w1_ref[...],
                    preferred_element_type=f32)                       # (M, width)

    cp_top.wait()
    cp_bot.wait()
    y_halo = jnp.dot(halo_buf[...].reshape(2 * W, Cin).astype(mm), w1_ref[...],
                     preferred_element_type=f32)                      # (2W, width)

    # Concatenate in width-space (cheaper than concatenating Cin-wide inputs).
    y_ext = jnp.concatenate([y_halo[:W], y_own, y_halo[W:]], axis=0)  # (M2, width)
    y_ext = jnp.maximum(y_ext * s1_ref[...] + b1_ref[...], 0.0)

    # ---- boundary masks: (M2, 1), broadcast over the channel lanes ----------
    idx = jax.lax.broadcasted_iota(jnp.int32, (M2, 1), 0)
    w_idx = jax.lax.rem(idx, W)
    # Halo rows outside the image must be exactly zero (dw zero padding applies
    # to conv1's output, not relu(bn1(conv1(0)))).
    row_ok = jnp.logical_and(jnp.logical_or(idx >= W, i > 0),
                             jnp.logical_or(idx < (TH + 1) * W, i < nb - 1))
    y_ext = jnp.where(row_ok, y_ext, 0.0)

    # ---- depthwise 3x3 (pad=1, stride=1): all shifts via pltpu.roll (XLU) ---
    # left/right W-taps with the row-wrap masked away (also the W zero padding)
    left = jnp.where(w_idx >= 1, pltpu.roll(y_ext, shift=1, axis=0), 0.0)       # w-1
    right = jnp.where(w_idx <= W - 2, pltpu.roll(y_ext, shift=M2 - 1, axis=0), 0.0)  # w+1
    cols = (left, y_ext, right)                                                  # dx = 0,1,2

    acc_ext = jnp.zeros((M2, width), f32)
    for dy in range(3):
        s = ((1 - dy) * W) % M2            # whole-row shift for the H tap
        for dx in range(3):
            tap = cols[dx] if s == 0 else pltpu.roll(cols[dx], shift=s, axis=0)
            acc_ext = acc_ext + tap * wdw_ref[3 * dy + dx]
    acc = acc_ext[W:W + M]                 # single slice back to the owned rows

    # ---- pointwise 1x1 + bn2 + relu ------------------------------------------
    z = jnp.dot(acc.astype(mm), wpw_ref[...], preferred_element_type=f32)
    z = jnp.maximum(z * s2_ref[...] + b2_ref[...], 0.0)

    # ---- conv3 (1x1) + bn3 + residual + relu ----------------------------------
    o = jnp.dot(z.astype(mm), w3_ref[...], preferred_element_type=f32)
    o = o * s3_ref[...] + b3_ref[...]
    o = o + x_ref[0].reshape(M, Cin).astype(f32)      # identity: Cin == Cout
    o = jnp.maximum(o, 0.0)
    out_ref[0] = o.reshape(TH, W, Cout).astype(out_ref.dtype)


def _vmem_capacity_bytes():
    try:
        info = pltpu.get_tpu_info()
        for attr in ("vmem_capacity_bytes", "vmem_size_bytes", "vmem_bytes"):
            v = getattr(info, attr, None)
            if v:
                return int(v)
    except Exception:
        pass
    return 64 << 20                       # conservative default (v7x-sized)


def _pick_block_h(H, W, c_max, budget_bytes, min_blocks=1):
    """Largest divisor of H (prefer multiples of 8) whose working set fits."""
    divs = [d for d in range(1, H + 1) if H % d == 0]

    def fits(th):
        return 10 * (th + 2) * W * c_max * 4 <= budget_bytes

    cands = [d for d in divs if fits(d) and (H // d) >= min_blocks]
    if not cands:
        cands = [d for d in divs if fits(d)] or [divs[0]]
    best8 = [d for d in cands if d % 8 == 0]
    return max(best8) if best8 else max(cands)


def bottleneck_pallas_nhwc(x, params, *, block_h=None, matmul_dtype=jnp.bfloat16):
    """NHWC in / NHWC out (preferred entry point: no per-layer transposes)."""
    N, H, W, C = x.shape
    width = params["w1"].shape[1]
    Cout = params["w3"].shape[1]
    assert C == Cout, "residual add requires inplanes == planes * expansion"

    # Generation-aware budgets: v7x has only 64 MiB VMEM, v5e/v6e have 128 MiB.
    cap = _vmem_capacity_bytes()
    small_vmem = cap <= (64 << 20)
    tile_budget = (10 << 20) if small_vmem else (20 << 20)
    vmem_cap = (40 << 20) if small_vmem else (100 << 20)

    if block_h is None:
        block_h = _pick_block_h(H, W, max(C, width, Cout), tile_budget,
                                min_blocks=2 if N == 1 else 1)
    assert H % block_h == 0, f"block_h={block_h} must divide H={H}"
    nb = H // block_h

    mmd = jnp.dtype(matmul_dtype) if matmul_dtype is not None else x.dtype
    w1 = params["w1"].astype(mmd)
    wpw = params["wpw"].astype(mmd)
    w3 = params["w3"].astype(mmd)
    wdw = params["wdw"].reshape(9, 1, width).astype(jnp.float32)
    s1, b1 = params["s1"].astype(jnp.float32), params["b1"].astype(jnp.float32)
    s2, b2 = params["s2"].astype(jnp.float32), params["b2"].astype(jnp.float32)
    s3, b3 = params["s3"].astype(jnp.float32), params["b3"].astype(jnp.float32)

    itm = x.dtype.itemsize
    c_max = max(C, width, Cout)
    weight_bytes = (w1.size * w1.dtype.itemsize + wpw.size * wpw.dtype.itemsize
                    + w3.size * w3.dtype.itemsize + wdw.size * 4
                    + 4 * (4 * width + 2 * Cout))
    est = (2 * block_h * W * (C + Cout) * itm          # double-buffered in/out blocks
           + 2 * W * C * itm                            # halo scratch
           + 10 * (block_h + 2) * W * c_max * 4         # f32 intermediates
           + 2 * weight_bytes)
    vmem_limit = int(min(max(2 * est, 32 << 20), vmem_cap))

    flops = 2 * N * W * ((H + 2 * nb) * C * width        # conv1 (incl. halo rows)
                         + (H + 2 * nb) * 9 * width      # depthwise
                         + H * width * width             # pointwise
                         + H * width * Cout)             # conv3
    bytes_accessed = int((N * H * W * C + N * nb * 2 * W * C + N * H * W * Cout) * itm
                         + weight_bytes)

    def call(buffered_weights):
        def rep(shape):
            nd = len(shape)
            imap = lambda n_, i_, _nd=nd: (0,) * _nd
            if buffered_weights:
                # grid-invariant operands: no need to double-buffer them
                return pl.BlockSpec(shape, imap, pipeline_mode=pl.Buffered(1))
            return pl.BlockSpec(shape, imap)

        in_specs = [
            pl.BlockSpec((1, block_h, W, C), lambda n_, i_: (n_, i_, 0, 0)),
            pl.BlockSpec(memory_space=pl.ANY),            # raw HBM x (halo rows)
            rep(w1.shape), rep(s1.shape), rep(b1.shape),
            rep(wdw.shape), rep(wpw.shape), rep(s2.shape), rep(b2.shape),
            rep(w3.shape), rep(s3.shape), rep(b3.shape),
        ]
        out_specs = pl.BlockSpec((1, block_h, W, Cout), lambda n_, i_: (n_, i_, 0, 0))

        return pl.pallas_call(
            bottleneck_kernel,
            out_shape=jax.ShapeDtypeStruct((N, H, W, Cout), x.dtype),
            grid_spec=pltpu.PrefetchScalarGridSpec(
                num_scalar_prefetch=0,
                grid=(N, nb),
                in_specs=in_specs,
                out_specs=out_specs,
                scratch_shapes=[pltpu.VMEM((2, W, C), x.dtype),
                                pltpu.SemaphoreType.DMA((2,))]),
            compiler_params=pltpu.CompilerParams(
                dimension_semantics=("parallel", "parallel"),
                vmem_limit_bytes=vmem_limit),
            cost_estimate=pl.CostEstimate(flops=int(flops), transcendentals=0,
                                          bytes_accessed=bytes_accessed),
        )(x, x, w1, s1, b1, wdw, wpw, s2, b2, w3, s3, b3)

    try:
        return call(True)
    except Exception:
        # pl.Buffered(1) not supported on this jax/libtpu -> default buffering.
        return call(False)


def bottleneck_pallas(x_nchw, params, **kwargs):
    """NCHW adapter matching the PyTorch module's layout (demo/parity only;
    chain layers through bottleneck_pallas_nhwc to avoid per-layer transposes)."""
    x = jnp.transpose(x_nchw, (0, 2, 3, 1))        # NCHW -> NHWC
    out = bottleneck_pallas_nhwc(x, params, **kwargs)
    return jnp.transpose(out, (0, 3, 1, 2))        # NHWC -> NCHW


def bottleneck_ref(x_nchw, p):
    """Pure-JAX f32 reference (same math, no Pallas)."""
    x = jnp.transpose(x_nchw, (0, 2, 3, 1))
    H, W = x.shape[1], x.shape[2]
    y = jnp.einsum("nhwc,cd->nhwd", x, p["w1"]) * p["s1"][0] + p["b1"][0]
    y = jnp.maximum(y, 0.0)
    yp = jnp.pad(y, ((0, 0), (1, 1), (1, 1), (0, 0)))
    acc = jnp.zeros_like(y)
    for dy in range(3):
        for dx in range(3):
            acc = acc + yp[:, dy:dy + H, dx:dx + W, :] * p["wdw"][dy, dx]
    z = jnp.einsum("nhwc,cd->nhwd", acc, p["wpw"]) * p["s2"][0] + p["b2"][0]
    z = jnp.maximum(z, 0.0)
    o = jnp.einsum("nhwc,cd->nhwd", z, p["w3"]) * p["s3"][0] + p["b3"][0]
    o = jnp.maximum(o + x, 0.0)
    return jnp.transpose(o, (0, 3, 1, 2))


def make_params(key, inplanes, planes, base_width=64, groups=1):
    width = int(planes * (base_width / 64.0)) * groups
    cout = planes * 4  # expansion = 4
    ks = jax.random.split(key, 7)

    w1 = 0.1 * jax.random.normal(ks[0], (inplanes, width), jnp.float32)
    wdw = 0.1 * jax.random.normal(ks[1], (3, 3, width), jnp.float32)
    wpw = 0.1 * jax.random.normal(ks[2], (width, width), jnp.float32)
    w3 = 0.1 * jax.random.normal(ks[3], (width, cout), jnp.float32)

    def bn(k, c):
        k1, k2 = jax.random.split(k)
        gamma = 1.0 + 0.1 * jax.random.normal(k1, (c,), jnp.float32)
        beta = 0.1 * jax.random.normal(k2, (c,), jnp.float32)
        mean = jnp.zeros((c,), jnp.float32)
        var = jnp.ones((c,), jnp.float32)
        eps = 1e-5
        scale = gamma / jnp.sqrt(var + eps)
        bias = beta - mean * scale
        return scale.reshape(1, c), bias.reshape(1, c)

    s1, b1 = bn(ks[4], width)
    s2, b2 = bn(ks[5], width)
    s3, b3 = bn(ks[6], cout)
    return dict(w1=w1, wdw=wdw, wpw=wpw, w3=w3,
                s1=s1, b1=b1, s2=s2, b2=b2, s3=s3, b3=b3)


if __name__ == "__main__":
    key = jax.random.PRNGKey(0)
    kx, kp = jax.random.split(key)

    inplanes, planes = 16, 4        # width = 4, out channels = planes*4 = 16
    N, H, W = 2, 16, 16
    x = jax.random.normal(kx, (N, inplanes, H, W), jnp.float32)   # NCHW
    params = make_params(kp, inplanes, planes)

    ref = jax.block_until_ready(bottleneck_ref(x, params))

    # block_h=8 -> 2 row blocks, so the halo DMA / boundary-mask path is
    # exercised.  First: pure-f32 matmul path at a tight tolerance so the loose
    # bf16 tolerance below cannot hide a real regression.
    out_f32 = jax.block_until_ready(
        bottleneck_pallas(x, params, block_h=8, matmul_dtype=None))
    np.testing.assert_allclose(np.asarray(out_f32), np.asarray(ref),
                               rtol=2e-3, atol=2e-3)

    # Default path: bf16 MXU operands, f32 accumulate (perf configuration).
    out = jax.block_until_ready(bottleneck_pallas(x, params, block_h=8))
    np.testing.assert_allclose(np.asarray(out), np.asarray(ref),
                               rtol=2e-2, atol=2e-2)

    print("KERNEL_OK")
</pallas_src>

<mosaic_0001>
module attributes {stable_mosaic.version = 11 : i64} {
  func.func @bottleneck_kernel(%arg0: i32, %arg1: i32, %arg2: memref<1x8x16x16xf32, #tpu.memory_space<vmem>>, %arg3: memref<2x16x16x16xf32, #tpu.memory_space<any>>, %arg4: memref<16x4xf32, #tpu.memory_space<vmem>>, %arg5: memref<1x4xf32, #tpu.memory_space<vmem>>, %arg6: memref<1x4xf32, #tpu.memory_space<vmem>>, %arg7: memref<9x1x4xf32, #tpu.memory_space<vmem>>, %arg8: memref<4x4xf32, #tpu.memory_space<vmem>>, %arg9: memref<1x4xf32, #tpu.memory_space<vmem>>, %arg10: memref<1x4xf32, #tpu.memory_space<vmem>>, %arg11: memref<4x16xf32, #tpu.memory_space<vmem>>, %arg12: memref<1x16xf32, #tpu.memory_space<vmem>>, %arg13: memref<1x16xf32, #tpu.memory_space<vmem>>, %arg14: memref<1x8x16x16xf32, #tpu.memory_space<vmem>>, %arg15: memref<2x16x16xf32, #tpu.memory_space<vmem>>, %arg16: memref<2x!tpu.dma_semaphore, #tpu.memory_space<semaphore_mem>>) attributes {dimension_semantics = [#tpu.dimension_semantics<parallel>, #tpu.dimension_semantics<parallel>], iteration_bounds = array<i64: 2, 2>, scalar_prefetch = 0 : i64, scratch_operands = 2 : i64, tpu.core_type = #tpu.core_type<tc>, window_params = [{transform_indices = @transform_0, window_bounds = array<i64: 1, 8, 16, 16>}, {}, {pipeline_mode = #tpu.pipeline_mode<synchronous>, transform_indices = @transform_2, window_bounds = array<i64: 16, 4>}, {pipeline_mode = #tpu.pipeline_mode<synchronous>, transform_indices = @transform_3, window_bounds = array<i64: 1, 4>}, {pipeline_mode = #tpu.pipeline_mode<synchronous>, transform_indices = @transform_4, window_bounds = array<i64: 1, 4>}, {pipeline_mode = #tpu.pipeline_mode<synchronous>, transform_indices = @transform_5, window_bounds = array<i64: 9, 1, 4>}, {pipeline_mode = #tpu.pipeline_mode<synchronous>, transform_indices = @transform_6, window_bounds = array<i64: 4, 4>}, {pipeline_mode = #tpu.pipeline_mode<synchronous>, transform_indices = @transform_7, window_bounds = array<i64: 1, 4>}, {pipeline_mode = #tpu.pipeline_mode<synchronous>, transform_indices = @transform_8, window_bounds = array<i64: 1, 4>}, {pipeline_mode = #tpu.pipeline_mode<synchronous>, transform_indices = @transform_9, window_bounds = array<i64: 4, 16>}, {pipeline_mode = #tpu.pipeline_mode<synchronous>, transform_indices = @transform_10, window_bounds = array<i64: 1, 16>}, {pipeline_mode = #tpu.pipeline_mode<synchronous>, transform_indices = @transform_11, window_bounds = array<i64: 1, 16>}, {transform_indices = @transform_12, window_bounds = array<i64: 1, 8, 16, 16>}]} {
    %c8_i32 = arith.constant 8 : i32
    %0 = arith.muli %arg1, %c8_i32 : i32
    %c1_i32 = arith.constant 1 : i32
    %1 = arith.subi %0, %c1_i32 : i32
    %c0_i32 = arith.constant 0 : i32
    %2 = arith.maxsi %1, %c0_i32 : i32
    %c8_i32_0 = arith.constant 8 : i32
    %3 = arith.muli %arg1, %c8_i32_0 : i32
    %c8_i32_1 = arith.constant 8 : i32
    %4 = arith.addi %3, %c8_i32_1 : i32
    %c15_i32 = arith.constant 15 : i32
    %5 = arith.minsi %4, %c15_i32 : i32
    %c0_i32_2 = arith.constant 0 : i32
    %c0_i32_3 = arith.constant 0 : i32
    %c0_i32_4 = arith.constant 0 : i32
    %c0_i32_5 = arith.constant 0 : i32
    %6 = tpu.memref_slice %arg3[%arg0, %2, %c0_i32_4, %c0_i32_5] : memref<2x16x16x16xf32, #tpu.memory_space<any>> -> memref<1x1x16x16xf32, #tpu.memory_space<any>>
    %7 = tpu.memref_squeeze %6 : memref<1x1x16x16xf32, #tpu.memory_space<any>> -> memref<16x16xf32, #tpu.memory_space<any>>
    %c0_i32_6 = arith.constant 0 : i32
    %c0_i32_7 = arith.constant 0 : i32
    %8 = tpu.memref_slice %arg15[%c0_i32_2, %c0_i32_6, %c0_i32_7] : memref<2x16x16xf32, #tpu.memory_space<vmem>> -> memref<1x16x16xf32, #tpu.memory_space<vmem>>
    %9 = tpu.memref_squeeze %8 : memref<1x16x16xf32, #tpu.memory_space<vmem>> -> memref<16x16xf32, #tpu.memory_space<vmem>>
    %10 = tpu.memref_slice %arg16[%c0_i32_3] : memref<2x!tpu.dma_semaphore, #tpu.memory_space<semaphore_mem>> -> memref<1x!tpu.dma_semaphore, #tpu.memory_space<semaphore_mem>>
    %11 = tpu.memref_squeeze %10 : memref<1x!tpu.dma_semaphore, #tpu.memory_space<semaphore_mem>> -> memref<!tpu.dma_semaphore, #tpu.memory_space<semaphore_mem>>
    tpu.enqueue_dma source(%7 : memref<16x16xf32, #tpu.memory_space<any>>) target(%9 : memref<16x16xf32, #tpu.memory_space<vmem>>) target_semaphore(%11 : memref<!tpu.dma_semaphore, #tpu.memory_space<semaphore_mem>>)
    %c1_i32_8 = arith.constant 1 : i32
    %c1_i32_9 = arith.constant 1 : i32
    %c0_i32_10 = arith.constant 0 : i32
    %c0_i32_11 = arith.constant 0 : i32
    %12 = tpu.memref_slice %arg3[%arg0, %5, %c0_i32_10, %c0_i32_11] : memref<2x16x16x16xf32, #tpu.memory_space<any>> -> memref<1x1x16x16xf32, #tpu.memory_space<any>>
    %13 = tpu.memref_squeeze %12 : memref<1x1x16x16xf32, #tpu.memory_space<any>> -> memref<16x16xf32, #tpu.memory_space<any>>
    %c0_i32_12 = arith.constant 0 : i32
    %c0_i32_13 = arith.constant 0 : i32
    %14 = tpu.memref_slice %arg15[%c1_i32_8, %c0_i32_12, %c0_i32_13] : memref<2x16x16xf32, #tpu.memory_space<vmem>> -> memref<1x16x16xf32, #tpu.memory_space<vmem>>
    %15 = tpu.memref_squeeze %14 : memref<1x16x16xf32, #tpu.memory_space<vmem>> -> memref<16x16xf32, #tpu.memory_space<vmem>>
    %16 = tpu.memref_slice %arg16[%c1_i32_9] : memref<2x!tpu.dma_semaphore, #tpu.memory_space<semaphore_mem>> -> memref<1x!tpu.dma_semaphore, #tpu.memory_space<semaphore_mem>>
    %17 = tpu.memref_squeeze %16 : memref<1x!tpu.dma_semaphore, #tpu.memory_space<semaphore_mem>> -> memref<!tpu.dma_semaphore, #tpu.memory_space<semaphore_mem>>
    tpu.enqueue_dma source(%13 : memref<16x16xf32, #tpu.memory_space<any>>) target(%15 : memref<16x16xf32, #tpu.memory_space<vmem>>) target_semaphore(%17 : memref<!tpu.dma_semaphore, #tpu.memory_space<semaphore_mem>>)
    %c0 = arith.constant 0 : index
    %c0_14 = arith.constant 0 : index
    %c0_15 = arith.constant 0 : index
    %c0_16 = arith.constant 0 : index
    %18 = vector.load %arg2[%c0, %c0_14, %c0_15, %c0_16] : memref<1x8x16x16xf32, #tpu.memory_space<vmem>>, vector<1x8x16x16xf32>
    %19 = vector.shape_cast %18 : vector<1x8x16x16xf32> to vector<8x16x16xf32>
    %20 = vector.shape_cast %19 : vector<8x16x16xf32> to vector<128x16xf32>
    %c0_17 = arith.constant 0 : index
    %c0_18 = arith.constant 0 : index
    %21 = vector.load %arg4[%c0_17, %c0_18] : memref<16x4xf32, #tpu.memory_space<vmem>>, vector<16x4xf32>
    %cst = arith.constant dense<0.000000e+00> : vector<128x4xf32>
    %22 = tpu.matmul %20, %21, %cst {dimension_numbers = #tpu.dot_dimension_numbers<[1], [0], [0], [1], [0, 0, 1, 1], [], []>} : vector<128x16xf32>, vector<16x4xf32>, vector<128x4xf32> -> vector<128x4xf32>
    %c0_i32_19 = arith.constant 0 : i32
    %c0_i32_20 = arith.constant 0 : i32
    %c0_i32_21 = arith.constant 0 : i32
    %c0_i32_22 = arith.constant 0 : i32
    %23 = tpu.memref_slice %arg3[%arg0, %2, %c0_i32_21, %c0_i32_22] : memref<2x16x16x16xf32, #tpu.memory_space<any>> -> memref<1x1x16x16xf32, #tpu.memory_space<any>>
    %24 = tpu.memref_squeeze %23 : memref<1x1x16x16xf32, #tpu.memory_space<any>> -> memref<16x16xf32, #tpu.memory_space<any>>
    %c0_i32_23 = arith.constant 0 : i32
    %c0_i32_24 = arith.constant 0 : i32
    %25 = tpu.memref_slice %arg15[%c0_i32_19, %c0_i32_23, %c0_i32_24] : memref<2x16x16xf32, #tpu.memory_space<vmem>> -> memref<1x16x16xf32, #tpu.memory_space<vmem>>
    %26 = tpu.memref_squeeze %25 : memref<1x16x16xf32, #tpu.memory_space<vmem>> -> memref<16x16xf32, #tpu.memory_space<vmem>>
    %27 = tpu.memref_slice %arg16[%c0_i32_20] : memref<2x!tpu.dma_semaphore, #tpu.memory_space<semaphore_mem>> -> memref<1x!tpu.dma_semaphore, #tpu.memory_space<semaphore_mem>>
    %28 = tpu.memref_squeeze %27 : memref<1x!tpu.dma_semaphore, #tpu.memory_space<semaphore_mem>> -> memref<!tpu.dma_semaphore, #tpu.memory_space<semaphore_mem>>
    tpu.wait_dma2 semaphore(%28 : memref<!tpu.dma_semaphore, #tpu.memory_space<semaphore_mem>>) src(%24 : memref<16x16xf32, #tpu.memory_space<any>>) dst(%26 : memref<16x16xf32, #tpu.memory_space<vmem>>)
    %c1_i32_25 = arith.constant 1 : i32
    %c1_i32_26 = arith.constant 1 : i32
    %c0_i32_27 = arith.constant 0 : i32
    %c0_i32_28 = arith.constant 0 : i32
    %29 = tpu.memref_slice %arg3[%arg0, %5, %c0_i32_27, %c0_i32_28] : memref<2x16x16x16xf32, #tpu.memory_space<any>> -> memref<1x1x16x16xf32, #tpu.memory_space<any>>
    %30 = tpu.memref_squeeze %29 : memref<1x1x16x16xf32, #tpu.memory_space<any>> -> memref<16x16xf32, #tpu.memory_space<any>>
    %c0_i32_29 = arith.constant 0 : i32
    %c0_i32_30 = arith.constant 0 : i32
    %31 = tpu.memref_slice %arg15[%c1_i32_25, %c0_i32_29, %c0_i32_30] : memref<2x16x16xf32, #tpu.memory_space<vmem>> -> memref<1x16x16xf32, #tpu.memory_space<vmem>>
    %32 = tpu.memref_squeeze %31 : memref<1x16x16xf32, #tpu.memory_space<vmem>> -> memref<16x16xf32, #tpu.memory_space<vmem>>
    %33 = tpu.memref_slice %arg16[%c1_i32_26] : memref<2x!tpu.dma_semaphore, #tpu.memory_space<semaphore_mem>> -> memref<1x!tpu.dma_semaphore, #tpu.memory_space<semaphore_mem>>
    %34 = tpu.memref_squeeze %33 : memref<1x!tpu.dma_semaphore, #tpu.memory_space<semaphore_mem>> -> memref<!tpu.dma_semaphore, #tpu.memory_space<semaphore_mem>>
    tpu.wait_dma2 semaphore(%34 : memref<!tpu.dma_semaphore, #tpu.memory_space<semaphore_mem>>) src(%30 : memref<16x16xf32, #tpu.memory_space<any>>) dst(%32 : memref<16x16xf32, #tpu.memory_space<vmem>>)
    %c0_31 = arith.constant 0 : index
    %c0_32 = arith.constant 0 : index
    %c0_33 = arith.constant 0 : index
    %35 = vector.load %arg15[%c0_31, %c0_32, %c0_33] : memref<2x16x16xf32, #tpu.memory_space<vmem>>, vector<2x16x16xf32>
    %36 = vector.shape_cast %35 : vector<2x16x16xf32> to vector<32x16xf32>
    %c0_34 = arith.constant 0 : index
    %c0_35 = arith.constant 0 : index
    %37 = vector.load %arg4[%c0_34, %c0_35] : memref<16x4xf32, #tpu.memory_space<vmem>>, vector<16x4xf32>
    %cst_36 = arith.constant dense<0.000000e+00> : vector<32x4xf32>
    %38 = tpu.matmul %36, %37, %cst_36 {dimension_numbers = #tpu.dot_dimension_numbers<[1], [0], [0], [1], [0, 0, 1, 1], [], []>} : vector<32x16xf32>, vector<16x4xf32>, vector<32x4xf32> -> vector<32x4xf32>
    %39 = vector.extract_strided_slice %38 {offsets = [0, 0], sizes = [16, 4], strides = [1, 1]} : vector<32x4xf32> to vector<16x4xf32>
    %40 = vector.extract_strided_slice %38 {offsets = [16, 0], sizes = [16, 4], strides = [1, 1]} : vector<32x4xf32> to vector<16x4xf32>
    %41 = tpu.concatenate %39, %22, %40 in 0 : vector<16x4xf32>, vector<128x4xf32>, vector<16x4xf32> -> vector<160x4xf32>
    %c0_37 = arith.constant 0 : index
    %c0_38 = arith.constant 0 : index
    %42 = vector.load %arg5[%c0_37, %c0_38] : memref<1x4xf32, #tpu.memory_space<vmem>>, vector<1x4xf32>
    %43 = vector.broadcast %42 : vector<1x4xf32> to vector<160x4xf32>
    %44 = arith.mulf %41, %43 : vector<160x4xf32>
    %c0_39 = arith.constant 0 : index
    %c0_40 = arith.constant 0 : index
    %45 = vector.load %arg6[%c0_39, %c0_40] : memref<1x4xf32, #tpu.memory_space<vmem>>, vector<1x4xf32>
    %46 = vector.broadcast %45 : vector<1x4xf32> to vector<160x4xf32>
    %47 = arith.addf %44, %46 : vector<160x4xf32>
    %cst_41 = arith.constant 0.000000e+00 : f32
    %48 = vector.broadcast %cst_41 : f32 to vector<160x4xf32>
    %49 = arith.maximumf %47, %48 : vector<160x4xf32>
    %50 = tpu.iota {dimensions = array<i32: 0>} : vector<160x1xi32>
    %c16_i32 = arith.constant 16 : i32
    %51 = vector.broadcast %c16_i32 : i32 to vector<160x1xi32>
    %52 = arith.remsi %50, %51 : vector<160x1xi32>
    %c16_i32_42 = arith.constant 16 : i32
    %53 = vector.broadcast %c16_i32_42 : i32 to vector<160x1xi32>
    %54 = arith.cmpi sge, %50, %53 : vector<160x1xi32>
    %c0_i32_43 = arith.constant 0 : i32
    %55 = arith.cmpi sgt, %arg1, %c0_i32_43 : i32
    %56 = vector.broadcast %55 : i1 to vector<160x1xi1>
    %57 = arith.ori %54, %56 : vector<160x1xi1>
    %c144_i32 = arith.constant 144 : i32
    %58 = vector.broadcast %c144_i32 : i32 to vector<160x1xi32>
    %59 = arith.cmpi slt, %50, %58 : vector<160x1xi32>
    %c1_i32_44 = arith.constant 1 : i32
    %60 = arith.cmpi slt, %arg1, %c1_i32_44 : i32
    %61 = vector.broadcast %60 : i1 to vector<160x1xi1>
    %62 = arith.ori %59, %61 : vector<160x1xi1>
    %63 = arith.andi %57, %62 : vector<160x1xi1>
    %cst_45 = arith.constant 0.000000e+00 : f32
    %64 = vector.shape_cast %63 : vector<160x1xi1> to vector<160x1xi1>
    %65 = vector.broadcast %64 : vector<160x1xi1> to vector<160x4xi1>
    %66 = vector.broadcast %cst_45 : f32 to vector<160x4xf32>
    %67 = arith.select %65, %49, %66 : vector<160x4xi1>, vector<160x4xf32>
    %c1_i32_46 = arith.constant 1 : i32
    %68 = vector.broadcast %c1_i32_46 : i32 to vector<160x1xi32>
    %69 = arith.cmpi sge, %52, %68 : vector<160x1xi32>
    %c1_i32_47 = arith.constant 1 : i32
    %70 = tpu.dynamic_rotate %67 by %c1_i32_47 dim 0 : vector<160x4xf32>, i32 -> vector<160x4xf32>
    %cst_48 = arith.constant 0.000000e+00 : f32
    %71 = vector.shape_cast %69 : vector<160x1xi1> to vector<160x1xi1>
    %72 = vector.broadcast %71 : vector<160x1xi1> to vector<160x4xi1>
    %73 = vector.broadcast %cst_48 : f32 to vector<160x4xf32>
    %74 = arith.select %72, %70, %73 : vector<160x4xi1>, vector<160x4xf32>
    %c14_i32 = arith.constant 14 : i32
    %75 = vector.broadcast %c14_i32 : i32 to vector<160x1xi32>
    %76 = arith.cmpi sle, %52, %75 : vector<160x1xi32>
    %c159_i32 = arith.constant 159 : i32
    %77 = tpu.dynamic_rotate %67 by %c159_i32 dim 0 : vector<160x4xf32>, i32 -> vector<160x4xf32>
    %cst_49 = arith.constant 0.000000e+00 : f32
    %78 = vector.shape_cast %76 : vector<160x1xi1> to vector<160x1xi1>
    %79 = vector.broadcast %78 : vector<160x1xi1> to vector<160x4xi1>
    %80 = vector.broadcast %cst_49 : f32 to vector<160x4xf32>
    %81 = arith.select %79, %77, %80 : vector<160x4xi1>, vector<160x4xf32>
    %cst_50 = arith.constant 0.000000e+00 : f32
    %82 = vector.broadcast %cst_50 : f32 to vector<160x4xf32>
    %c16_i32_51 = arith.constant 16 : i32
    %83 = tpu.dynamic_rotate %74 by %c16_i32_51 dim 0 : vector<160x4xf32>, i32 -> vector<160x4xf32>
    %c0_52 = arith.constant 0 : index
    %c0_53 = arith.constant 0 : index
    %c0_54 = arith.constant 0 : index
    %84 = vector.load %arg7[%c0_52, %c0_53, %c0_54] : memref<9x1x4xf32, #tpu.memory_space<vmem>>, vector<1x1x4xf32>
    %85 = vector.shape_cast %84 : vector<1x1x4xf32> to vector<1x4xf32>
    %86 = vector.broadcast %85 : vector<1x4xf32> to vector<160x4xf32>
    %87 = arith.mulf %83, %86 : vector<160x4xf32>
    %88 = arith.addf %82, %87 : vector<160x4xf32>
    %c16_i32_55 = arith.constant 16 : i32
    %89 = tpu.dynamic_rotate %67 by %c16_i32_55 dim 0 : vector<160x4xf32>, i32 -> vector<160x4xf32>
    %c1 = arith.constant 1 : index
    %c0_56 = arith.constant 0 : index
    %c0_57 = arith.constant 0 : index
    %90 = vector.load %arg7[%c1, %c0_56, %c0_57] : memref<9x1x4xf32, #tpu.memory_space<vmem>>, vector<1x1x4xf32>
    %91 = vector.shape_cast %90 : vector<1x1x4xf32> to vector<1x4xf32>
    %92 = vector.broadcast %91 : vector<1x4xf32> to vector<160x4xf32>
    %93 = arith.mulf %89, %92 : vector<160x4xf32>
    %94 = arith.addf %88, %93 : vector<160x4xf32>
    %c16_i32_58 = arith.constant 16 : i32
    %95 = tpu.dynamic_rotate %81 by %c16_i32_58 dim 0 : vector<160x4xf32>, i32 -> vector<160x4xf32>
    %c2 = arith.constant 2 : index
    %c0_59 = arith.constant 0 : index
    %c0_60 = arith.constant 0 : index
    %96 = vector.load %arg7[%c2, %c0_59, %c0_60] : memref<9x1x4xf32, #tpu.memory_space<vmem>>, vector<1x1x4xf32>
    %97 = vector.shape_cast %96 : vector<1x1x4xf32> to vector<1x4xf32>
    %98 = vector.broadcast %97 : vector<1x4xf32> to vector<160x4xf32>
    %99 = arith.mulf %95, %98 : vector<160x4xf32>
    %100 = arith.addf %94, %99 : vector<160x4xf32>
    %c3 = arith.constant 3 : index
    %c0_61 = arith.constant 0 : index
    %c0_62 = arith.constant 0 : index
    %101 = vector.load %arg7[%c3, %c0_61, %c0_62] : memref<9x1x4xf32, #tpu.memory_space<vmem>>, vector<1x1x4xf32>
    %102 = vector.shape_cast %101 : vector<1x1x4xf32> to vector<1x4xf32>
    %103 = vector.broadcast %102 : vector<1x4xf32> to vector<160x4xf32>
    %104 = arith.mulf %74, %103 : vector<160x4xf32>
    %105 = arith.addf %100, %104 : vector<160x4xf32>
    %c4 = arith.constant 4 : index
    %c0_63 = arith.constant 0 : index
    %c0_64 = arith.constant 0 : index
    %106 = vector.load %arg7[%c4, %c0_63, %c0_64] : memref<9x1x4xf32, #tpu.memory_space<vmem>>, vector<1x1x4xf32>
    %107 = vector.shape_cast %106 : vector<1x1x4xf32> to vector<1x4xf32>
    %108 = vector.broadcast %107 : vector<1x4xf32> to vector<160x4xf32>
    %109 = arith.mulf %67, %108 : vector<160x4xf32>
    %110 = arith.addf %105, %109 : vector<160x4xf32>
    %c5 = arith.constant 5 : index
    %c0_65 = arith.constant 0 : index
    %c0_66 = arith.constant 0 : index
    %111 = vector.load %arg7[%c5, %c0_65, %c0_66] : memref<9x1x4xf32, #tpu.memory_space<vmem>>, vector<1x1x4xf32>
    %112 = vector.shape_cast %111 : vector<1x1x4xf32> to vector<1x4xf32>
    %113 = vector.broadcast %112 : vector<1x4xf32> to vector<160x4xf32>
    %114 = arith.mulf %81, %113 : vector<160x4xf32>
    %115 = arith.addf %110, %114 : vector<160x4xf32>
    %c144_i32_67 = arith.constant 144 : i32
    %116 = tpu.dynamic_rotate %74 by %c144_i32_67 dim 0 : vector<160x4xf32>, i32 -> vector<160x4xf32>
    %c6 = arith.constant 6 : index
    %c0_68 = arith.constant 0 : index
    %c0_69 = arith.constant 0 : index
    %117 = vector.load %arg7[%c6, %c0_68, %c0_69] : memref<9x1x4xf32, #tpu.memory_space<vmem>>, vector<1x1x4xf32>
    %118 = vector.shape_cast %117 : vector<1x1x4xf32> to vector<1x4xf32>
    %119 = vector.broadcast %118 : vector<1x4xf32> to vector<160x4xf32>
    %120 = arith.mulf %116, %119 : vector<160x4xf32>
    %121 = arith.addf %115, %120 : vector<160x4xf32>
    %c144_i32_70 = arith.constant 144 : i32
    %122 = tpu.dynamic_rotate %67 by %c144_i32_70 dim 0 : vector<160x4xf32>, i32 -> vector<160x4xf32>
    %c7 = arith.constant 7 : index
    %c0_71 = arith.constant 0 : index
    %c0_72 = arith.constant 0 : index
    %123 = vector.load %arg7[%c7, %c0_71, %c0_72] : memref<9x1x4xf32, #tpu.memory_space<vmem>>, vector<1x1x4xf32>
    %124 = vector.shape_cast %123 : vector<1x1x4xf32> to vector<1x4xf32>
    %125 = vector.broadcast %124 : vector<1x4xf32> to vector<160x4xf32>
    %126 = arith.mulf %122, %125 : vector<160x4xf32>
    %127 = arith.addf %121, %126 : vector<160x4xf32>
    %c144_i32_73 = arith.constant 144 : i32
    %128 = tpu.dynamic_rotate %81 by %c144_i32_73 dim 0 : vector<160x4xf32>, i32 -> vector<160x4xf32>
    %c8 = arith.constant 8 : index
    %c0_74 = arith.constant 0 : index
    %c0_75 = arith.constant 0 : index
    %129 = vector.load %arg7[%c8, %c0_74, %c0_75] : memref<9x1x4xf32, #tpu.memory_space<vmem>>, vector<1x1x4xf32>
    %130 = vector.shape_cast %129 : vector<1x1x4xf32> to vector<1x4xf32>
    %131 = vector.broadcast %130 : vector<1x4xf32> to vector<160x4xf32>
    %132 = arith.mulf %128, %131 : vector<160x4xf32>
    %133 = arith.addf %127, %132 : vector<160x4xf32>
    %134 = vector.extract_strided_slice %133 {offsets = [16, 0], sizes = [128, 4], strides = [1, 1]} : vector<160x4xf32> to vector<128x4xf32>
    %c0_76 = arith.constant 0 : index
    %c0_77 = arith.constant 0 : index
    %135 = vector.load %arg8[%c0_76, %c0_77] : memref<4x4xf32, #tpu.memory_space<vmem>>, vector<4x4xf32>
    %cst_78 = arith.constant dense<0.000000e+00> : vector<128x4xf32>
    %136 = tpu.matmul %134, %135, %cst_78 {dimension_numbers = #tpu.dot_dimension_numbers<[1], [0], [0], [1], [0, 0, 1, 1], [], []>} : vector<128x4xf32>, vector<4x4xf32>, vector<128x4xf32> -> vector<128x4xf32>
    %c0_79 = arith.constant 0 : index
    %c0_80 = arith.constant 0 : index
    %137 = vector.load %arg9[%c0_79, %c0_80] : memref<1x4xf32, #tpu.memory_space<vmem>>, vector<1x4xf32>
    %138 = vector.broadcast %137 : vector<1x4xf32> to vector<128x4xf32>
    %139 = arith.mulf %136, %138 : vector<128x4xf32>
    %c0_81 = arith.constant 0 : index
    %c0_82 = arith.constant 0 : index
    %140 = vector.load %arg10[%c0_81, %c0_82] : memref<1x4xf32, #tpu.memory_space<vmem>>, vector<1x4xf32>
    %141 = vector.broadcast %140 : vector<1x4xf32> to vector<128x4xf32>
    %142 = arith.addf %139, %141 : vector<128x4xf32>
    %cst_83 = arith.constant 0.000000e+00 : f32
    %143 = vector.broadcast %cst_83 : f32 to vector<128x4xf32>
    %144 = arith.maximumf %142, %143 : vector<128x4xf32>
    %c0_84 = arith.constant 0 : index
    %c0_85 = arith.constant 0 : index
    %145 = vector.load %arg11[%c0_84, %c0_85] : memref<4x16xf32, #tpu.memory_space<vmem>>, vector<4x16xf32>
    %cst_86 = arith.constant dense<0.000000e+00> : vector<128x16xf32>
    %146 = tpu.matmul %144, %145, %cst_86 {dimension_numbers = #tpu.dot_dimension_numbers<[1], [0], [0], [1], [0, 0, 1, 1], [], []>} : vector<128x4xf32>, vector<4x16xf32>, vector<128x16xf32> -> vector<128x16xf32>
    %c0_87 = arith.constant 0 : index
    %c0_88 = arith.constant 0 : index
    %147 = vector.load %arg12[%c0_87, %c0_88] : memref<1x16xf32, #tpu.memory_space<vmem>>, vector<1x16xf32>
    %148 = vector.broadcast %147 : vector<1x16xf32> to vector<128x16xf32>
    %149 = arith.mulf %146, %148 : vector<128x16xf32>
    %c0_89 = arith.constant 0 : index
    %c0_90 = arith.constant 0 : index
    %150 = vector.load %arg13[%c0_89, %c0_90] : memref<1x16xf32, #tpu.memory_space<vmem>>, vector<1x16xf32>
    %151 = vector.broadcast %150 : vector<1x16xf32> to vector<128x16xf32>
    %152 = arith.addf %149, %151 : vector<128x16xf32>
    %c0_91 = arith.constant 0 : index
    %c0_92 = arith.constant 0 : index
    %c0_93 = arith.constant 0 : index
    %c0_94 = arith.constant 0 : index
    %153 = vector.load %arg2[%c0_91, %c0_92, %c0_93, %c0_94] : memref<1x8x16x16xf32, #tpu.memory_space<vmem>>, vector<1x8x16x16xf32>
    %154 = vector.shape_cast %153 : vector<1x8x16x16xf32> to vector<8x16x16xf32>
    %155 = vector.shape_cast %154 : vector<8x16x16xf32> to vector<128x16xf32>
    %156 = arith.addf %152, %155 : vector<128x16xf32>
    %cst_95 = arith.constant 0.000000e+00 : f32
    %157 = vector.broadcast %cst_95 : f32 to vector<128x16xf32>
    %158 = arith.maximumf %156, %157 : vector<128x16xf32>
    %159 = vector.shape_cast %158 : vector<128x16xf32> to vector<8x16x16xf32>
    %c0_96 = arith.constant 0 : index
    %c0_97 = arith.constant 0 : index
    %c0_98 = arith.constant 0 : index
    %c0_99 = arith.constant 0 : index
    %160 = vector.load %arg14[%c0_96, %c0_97, %c0_98, %c0_99] : memref<1x8x16x16xf32, #tpu.memory_space<vmem>>, vector<1x8x16x16xf32>
    %161 = vector.shape_cast %160 : vector<1x8x16x16xf32> to vector<8x16x16xf32>
    %162 = vector.shape_cast %159 : vector<8x16x16xf32> to vector<1x8x16x16xf32>
    tpu.vector_store %arg14[%c0_96, %c0_97, %c0_98, %c0_99], %162 {strides = array<i32>} : memref<1x8x16x16xf32, #tpu.memory_space<vmem>>, vector<1x8x16x16xf32>,
    return
  }
  func.func @transform_0(%arg0: i32, %arg1: i32) -> (i32, i32, i32, i32) {
    %c0_i32 = arith.constant 0 : i32
    %c0_i32_0 = arith.constant 0 : i32
    %c0_i32_1 = arith.constant 0 : i32
    return %arg0, %arg1, %c0_i32, %c0_i32_0 : i32, i32, i32, i32
  }
  func.func @transform_2(%arg0: i32, %arg1: i32) -> (i32, i32) {
    %c0_i32 = arith.constant 0 : i32
    %c0_i32_0 = arith.constant 0 : i32
    %c0_i32_1 = arith.constant 0 : i32
    return %c0_i32, %c0_i32_0 : i32, i32
  }
  func.func @transform_3(%arg0: i32, %arg1: i32) -> (i32, i32) {
    %c0_i32 = arith.constant 0 : i32
    %c0_i32_0 = arith.constant 0 : i32
    %c0_i32_1 = arith.constant 0 : i32
    return %c0_i32, %c0_i32_0 : i32, i32
  }
  func.func @transform_4(%arg0: i32, %arg1: i32) -> (i32, i32) {
    %c0_i32 = arith.constant 0 : i32
    %c0_i32_0 = arith.constant 0 : i32
    %c0_i32_1 = arith.constant 0 : i32
    return %c0_i32, %c0_i32_0 : i32, i32
  }
  func.func @transform_5(%arg0: i32, %arg1: i32) -> (i32, i32, i32) {
    %c0_i32 = arith.constant 0 : i32
    %c0_i32_0 = arith.constant 0 : i32
    %c0_i32_1 = arith.constant 0 : i32
    %c0_i32_2 = arith.constant 0 : i32
    return %c0_i32, %c0_i32_0, %c0_i32_1 : i32, i32, i32
  }
  func.func @transform_6(%arg0: i32, %arg1: i32) -> (i32, i32) {
    %c0_i32 = arith.constant 0 : i32
    %c0_i32_0 = arith.constant 0 : i32
    %c0_i32_1 = arith.constant 0 : i32
    return %c0_i32, %c0_i32_0 : i32, i32
  }
  func.func @transform_7(%arg0: i32, %arg1: i32) -> (i32, i32) {
    %c0_i32 = arith.constant 0 : i32
    %c0_i32_0 = arith.constant 0 : i32
    %c0_i32_1 = arith.constant 0 : i32
    return %c0_i32, %c0_i32_0 : i32, i32
  }
  func.func @transform_8(%arg0: i32, %arg1: i32) -> (i32, i32) {
    %c0_i32 = arith.constant 0 : i32
    %c0_i32_0 = arith.constant 0 : i32
    %c0_i32_1 = arith.constant 0 : i32
    return %c0_i32, %c0_i32_0 : i32, i32
  }
  func.func @transform_9(%arg0: i32, %arg1: i32) -> (i32, i32) {
    %c0_i32 = arith.constant 0 : i32
    %c0_i32_0 = arith.constant 0 : i32
    %c0_i32_1 = arith.constant 0 : i32
    return %c0_i32, %c0_i32_0 : i32, i32
  }
  func.func @transform_10(%arg0: i32, %arg1: i32) -> (i32, i32) {
    %c0_i32 = arith.constant 0 : i32
    %c0_i32_0 = arith.constant 0 : i32
    %c0_i32_1 = arith.constant 0 : i32
    return %c0_i32, %c0_i32_0 : i32, i32
  }
  func.func @transform_11(%arg0: i32, %arg1: i32) -> (i32, i32) {
    %c0_i32 = arith.constant 0 : i32
    %c0_i32_0 = arith.constant 0 : i32
    %c0_i32_1 = arith.constant 0 : i32
    return %c0_i32, %c0_i32_0 : i32, i32
  }
  func.func @transform_12(%arg0: i32, %arg1: i32) -> (i32, i32, i32, i32) {
    %c0_i32 = arith.constant 0 : i32
    %c0_i32_0 = arith.constant 0 : i32
    %c0_i32_1 = arith.constant 0 : i32
    return %arg0, %arg1, %c0_i32, %c0_i32_0 : i32, i32, i32, i32
  }
}

module attributes {stable_mosaic.version = 11 : i64} {
  func.func @bottleneck_kernel(%arg0: i32, %arg1: i32, %arg2: memref<1x8x16x16xf32, #tpu.memory_space<vmem>>, %arg3: memref<2x16x16x16xf32, #tpu.memory_space<any>>, %arg4: memref<16x4xf32, #tpu.memory_space<vmem>>, %arg5: memref<1x4xf32, #tpu.memory_space<vmem>>, %arg6: memref<1x4xf32, #tpu.memory_space<vmem>>, %arg7: memref<9x1x4xf32, #tpu.memory_space<vmem>>, %arg8: memref<4x4xf32, #tpu.memory_space<vmem>>, %arg9: memref<1x4xf32, #tpu.memory_space<vmem>>, %arg10: memref<1x4xf32, #tpu.memory_space<vmem>>, %arg11: memref<4x16xf32, #tpu.memory_space<vmem>>, %arg12: memref<1x16xf32, #tpu.memory_space<vmem>>, %arg13: memref<1x16xf32, #tpu.memory_space<vmem>>, %arg14: memref<1x8x16x16xf32, #tpu.memory_space<vmem>>, %arg15: memref<2x16x16xf32, #tpu.memory_space<vmem>>, %arg16: memref<2x!tpu.dma_semaphore, #tpu.memory_space<semaphore_mem>>) attributes {dimension_semantics = [#tpu.dimension_semantics<parallel>, #tpu.dimension_semantics<parallel>], iteration_bounds = array<i64: 2, 2>, scalar_prefetch = 0 : i64, scratch_operands = 2 : i64, tpu.core_type = #tpu.core_type<tc>, window_params = [{transform_indices = @transform_0, window_bounds = array<i64: 1, 8, 16, 16>}, {}, {pipeline_mode = #tpu.pipeline_mode<synchronous>, transform_indices = @transform_2, window_bounds = array<i64: 16, 4>}, {pipeline_mode = #tpu.pipeline_mode<synchronous>, transform_indices = @transform_3, window_bounds = array<i64: 1, 4>}, {pipeline_mode = #tpu.pipeline_mode<synchronous>, transform_indices = @transform_4, window_bounds = array<i64: 1, 4>}, {pipeline_mode = #tpu.pipeline_mode<synchronous>, transform_indices = @transform_5, window_bounds = array<i64: 9, 1, 4>}, {pipeline_mode = #tpu.pipeline_mode<synchronous>, transform_indices = @transform_6, window_bounds = array<i64: 4, 4>}, {pipeline_mode = #tpu.pipeline_mode<synchronous>, transform_indices = @transform_7, window_bounds = array<i64: 1, 4>}, {pipeline_mode = #tpu.pipeline_mode<synchronous>, transform_indices = @transform_8, window_bounds = array<i64: 1, 4>}, {pipeline_mode = #tpu.pipeline_mode<synchronous>, transform_indices = @transform_9, window_bounds = array<i64: 4, 16>}, {pipeline_mode = #tpu.pipeline_mode<synchronous>, transform_indices = @transform_10, window_bounds = array<i64: 1, 16>}, {pipeline_mode = #tpu.pipeline_mode<synchronous>, transform_indices = @transform_11, window_bounds = array<i64: 1, 16>}, {transform_indices = @transform_12, window_bounds = array<i64: 1, 8, 16, 16>}]} {
    %c8_i32 = arith.constant 8 : i32
    %0 = arith.muli %arg1, %c8_i32 : i32
    %c1_i32 = arith.constant 1 : i32
    %1 = arith.subi %0, %c1_i32 : i32
    %c0_i32 = arith.constant 0 : i32
    %2 = arith.maxsi %1, %c0_i32 : i32
    %c8_i32_0 = arith.constant 8 : i32
    %3 = arith.muli %arg1, %c8_i32_0 : i32
    %c8_i32_1 = arith.constant 8 : i32
    %4 = arith.addi %3, %c8_i32_1 : i32
    %c15_i32 = arith.constant 15 : i32
    %5 = arith.minsi %4, %c15_i32 : i32
    %c0_i32_2 = arith.constant 0 : i32
    %c0_i32_3 = arith.constant 0 : i32
    %c0_i32_4 = arith.constant 0 : i32
    %c0_i32_5 = arith.constant 0 : i32
    %6 = tpu.memref_slice %arg3[%arg0, %2, %c0_i32_4, %c0_i32_5] : memref<2x16x16x16xf32, #tpu.memory_space<any>> -> memref<1x1x16x16xf32, #tpu.memory_space<any>>
    %7 = tpu.memref_squeeze %6 : memref<1x1x16x16xf32, #tpu.memory_space<any>> -> memref<16x16xf32, #tpu.memory_space<any>>
    %c0_i32_6 = arith.constant 0 : i32
    %c0_i32_7 = arith.constant 0 : i32
    %8 = tpu.memref_slice %arg15[%c0_i32_2, %c0_i32_6, %c0_i32_7] : memref<2x16x16xf32, #tpu.memory_space<vmem>> -> memref<1x16x16xf32, #tpu.memory_space<vmem>>
    %9 = tpu.memref_squeeze %8 : memref<1x16x16xf32, #tpu.memory_space<vmem>> -> memref<16x16xf32, #tpu.memory_space<vmem>>
    %10 = tpu.memref_slice %arg16[%c0_i32_3] : memref<2x!tpu.dma_semaphore, #tpu.memory_space<semaphore_mem>> -> memref<1x!tpu.dma_semaphore, #tpu.memory_space<semaphore_mem>>
    %11 = tpu.memref_squeeze %10 : memref<1x!tpu.dma_semaphore, #tpu.memory_space<semaphore_mem>> -> memref<!tpu.dma_semaphore, #tpu.memory_space<semaphore_mem>>
    tpu.enqueue_dma source(%7 : memref<16x16xf32, #tpu.memory_space<any>>) target(%9 : memref<16x16xf32, #tpu.memory_space<vmem>>) target_semaphore(%11 : memref<!tpu.dma_semaphore, #tpu.memory_space<semaphore_mem>>)
    %c1_i32_8 = arith.constant 1 : i32
    %c1_i32_9 = arith.constant 1 : i32
    %c0_i32_10 = arith.constant 0 : i32
    %c0_i32_11 = arith.constant 0 : i32
    %12 = tpu.memref_slice %arg3[%arg0, %5, %c0_i32_10, %c0_i32_11] : memref<2x16x16x16xf32, #tpu.memory_space<any>> -> memref<1x1x16x16xf32, #tpu.memory_space<any>>
    %13 = tpu.memref_squeeze %12 : memref<1x1x16x16xf32, #tpu.memory_space<any>> -> memref<16x16xf32, #tpu.memory_space<any>>
    %c0_i32_12 = arith.constant 0 : i32
    %c0_i32_13 = arith.constant 0 : i32
    %14 = tpu.memref_slice %arg15[%c1_i32_8, %c0_i32_12, %c0_i32_13] : memref<2x16x16xf32, #tpu.memory_space<vmem>> -> memref<1x16x16xf32, #tpu.memory_space<vmem>>
    %15 = tpu.memref_squeeze %14 : memref<1x16x16xf32, #tpu.memory_space<vmem>> -> memref<16x16xf32, #tpu.memory_space<vmem>>
    %16 = tpu.memref_slice %arg16[%c1_i32_9] : memref<2x!tpu.dma_semaphore, #tpu.memory_space<semaphore_mem>> -> memref<1x!tpu.dma_semaphore, #tpu.memory_space<semaphore_mem>>
    %17 = tpu.memref_squeeze %16 : memref<1x!tpu.dma_semaphore, #tpu.memory_space<semaphore_mem>> -> memref<!tpu.dma_semaphore, #tpu.memory_space<semaphore_mem>>
    tpu.enqueue_dma source(%13 : memref<16x16xf32, #tpu.memory_space<any>>) target(%15 : memref<16x16xf32, #tpu.memory_space<vmem>>) target_semaphore(%17 : memref<!tpu.dma_semaphore, #tpu.memory_space<semaphore_mem>>)
    %c0 = arith.constant 0 : index
    %c0_14 = arith.constant 0 : index
    %c0_15 = arith.constant 0 : index
    %c0_16 = arith.constant 0 : index
    %18 = vector.load %arg2[%c0, %c0_14, %c0_15, %c0_16] : memref<1x8x16x16xf32, #tpu.memory_space<vmem>>, vector<1x8x16x16xf32>
    %19 = vector.shape_cast %18 : vector<1x8x16x16xf32> to vector<8x16x16xf32>
    %20 = vector.shape_cast %19 : vector<8x16x16xf32> to vector<128x16xf32>
    %c0_17 = arith.constant 0 : index
    %c0_18 = arith.constant 0 : index
    %21 = vector.load %arg4[%c0_17, %c0_18] : memref<16x4xf32, #tpu.memory_space<vmem>>, vector<16x4xf32>
    %cst = arith.constant dense<0.000000e+00> : vector<128x4xf32>
    %22 = tpu.matmul %20, %21, %cst {dimension_numbers = #tpu.dot_dimension_numbers<[1], [0], [0], [1], [0, 0, 1, 1], [], []>} : vector<128x16xf32>, vector<16x4xf32>, vector<128x4xf32> -> vector<128x4xf32>
    %c0_i32_19 = arith.constant 0 : i32
    %c0_i32_20 = arith.constant 0 : i32
    %c0_i32_21 = arith.constant 0 : i32
    %c0_i32_22 = arith.constant 0 : i32
    %23 = tpu.memref_slice %arg3[%arg0, %2, %c0_i32_21, %c0_i32_22] : memref<2x16x16x16xf32, #tpu.memory_space<any>> -> memref<1x1x16x16xf32, #tpu.memory_space<any>>
    %24 = tpu.memref_squeeze %23 : memref<1x1x16x16xf32, #tpu.memory_space<any>> -> memref<16x16xf32, #tpu.memory_space<any>>
    %c0_i32_23 = arith.constant 0 : i32
    %c0_i32_24 = arith.constant 0 : i32
    %25 = tpu.memref_slice %arg15[%c0_i32_19, %c0_i32_23, %c0_i32_24] : memref<2x16x16xf32, #tpu.memory_space<vmem>> -> memref<1x16x16xf32, #tpu.memory_space<vmem>>
    %26 = tpu.memref_squeeze %25 : memref<1x16x16xf32, #tpu.memory_space<vmem>> -> memref<16x16xf32, #tpu.memory_space<vmem>>
    %27 = tpu.memref_slice %arg16[%c0_i32_20] : memref<2x!tpu.dma_semaphore, #tpu.memory_space<semaphore_mem>> -> memref<1x!tpu.dma_semaphore, #tpu.memory_space<semaphore_mem>>
    %28 = tpu.memref_squeeze %27 : memref<1x!tpu.dma_semaphore, #tpu.memory_space<semaphore_mem>> -> memref<!tpu.dma_semaphore, #tpu.memory_space<semaphore_mem>>
    tpu.wait_dma2 semaphore(%28 : memref<!tpu.dma_semaphore, #tpu.memory_space<semaphore_mem>>) src(%24 : memref<16x16xf32, #tpu.memory_space<any>>) dst(%26 : memref<16x16xf32, #tpu.memory_space<vmem>>)
    %c1_i32_25 = arith.constant 1 : i32
    %c1_i32_26 = arith.constant 1 : i32
    %c0_i32_27 = arith.constant 0 : i32
    %c0_i32_28 = arith.constant 0 : i32
    %29 = tpu.memref_slice %arg3[%arg0, %5, %c0_i32_27, %c0_i32_28] : memref<2x16x16x16xf32, #tpu.memory_space<any>> -> memref<1x1x16x16xf32, #tpu.memory_space<any>>
    %30 = tpu.memref_squeeze %29 : memref<1x1x16x16xf32, #tpu.memory_space<any>> -> memref<16x16xf32, #tpu.memory_space<any>>
    %c0_i32_29 = arith.constant 0 : i32
    %c0_i32_30 = arith.constant 0 : i32
    %31 = tpu.memref_slice %arg15[%c1_i32_25, %c0_i32_29, %c0_i32_30] : memref<2x16x16xf32, #tpu.memory_space<vmem>> -> memref<1x16x16xf32, #tpu.memory_space<vmem>>
    %32 = tpu.memref_squeeze %31 : memref<1x16x16xf32, #tpu.memory_space<vmem>> -> memref<16x16xf32, #tpu.memory_space<vmem>>
    %33 = tpu.memref_slice %arg16[%c1_i32_26] : memref<2x!tpu.dma_semaphore, #tpu.memory_space<semaphore_mem>> -> memref<1x!tpu.dma_semaphore, #tpu.memory_space<semaphore_mem>>
    %34 = tpu.memref_squeeze %33 : memref<1x!tpu.dma_semaphore, #tpu.memory_space<semaphore_mem>> -> memref<!tpu.dma_semaphore, #tpu.memory_space<semaphore_mem>>
    tpu.wait_dma2 semaphore(%34 : memref<!tpu.dma_semaphore, #tpu.memory_space<semaphore_mem>>) src(%30 : memref<16x16xf32, #tpu.memory_space<any>>) dst(%32 : memref<16x16xf32, #tpu.memory_space<vmem>>)
    %c0_31 = arith.constant 0 : index
    %c0_32 = arith.constant 0 : index
    %c0_33 = arith.constant 0 : index
    %35 = vector.load %arg15[%c0_31, %c0_32, %c0_33] : memref<2x16x16xf32, #tpu.memory_space<vmem>>, vector<2x16x16xf32>
    %36 = vector.shape_cast %35 : vector<2x16x16xf32> to vector<32x16xf32>
    %c0_34 = arith.constant 0 : index
    %c0_35 = arith.constant 0 : index
    %37 = vector.load %arg4[%c0_34, %c0_35] : memref<16x4xf32, #tpu.memory_space<vmem>>, vector<16x4xf32>
    %cst_36 = arith.constant dense<0.000000e+00> : vector<32x4xf32>
    %38 = tpu.matmul %36, %37, %cst_36 {dimension_numbers = #tpu.dot_dimension_numbers<[1], [0], [0], [1], [0, 0, 1, 1], [], []>} : vector<32x16xf32>, vector<16x4xf32>, vector<32x4xf32> -> vector<32x4xf32>
    %39 = vector.extract_strided_slice %38 {offsets = [0, 0], sizes = [16, 4], strides = [1, 1]} : vector<32x4xf32> to vector<16x4xf32>
    %40 = vector.extract_strided_slice %38 {offsets = [16, 0], sizes = [16, 4], strides = [1, 1]} : vector<32x4xf32> to vector<16x4xf32>
    %41 = tpu.concatenate %39, %22, %40 in 0 : vector<16x4xf32>, vector<128x4xf32>, vector<16x4xf32> -> vector<160x4xf32>
    %c0_37 = arith.constant 0 : index
    %c0_38 = arith.constant 0 : index
    %42 = vector.load %arg5[%c0_37, %c0_38] : memref<1x4xf32, #tpu.memory_space<vmem>>, vector<1x4xf32>
    %43 = vector.broadcast %42 : vector<1x4xf32> to vector<160x4xf32>
    %44 = arith.mulf %41, %43 : vector<160x4xf32>
    %c0_39 = arith.constant 0 : index
    %c0_40 = arith.constant 0 : index
    %45 = vector.load %arg6[%c0_39, %c0_40] : memref<1x4xf32, #tpu.memory_space<vmem>>, vector<1x4xf32>
    %46 = vector.broadcast %45 : vector<1x4xf32> to vector<160x4xf32>
    %47 = arith.addf %44, %46 : vector<160x4xf32>
    %cst_41 = arith.constant 0.000000e+00 : f32
    %48 = vector.broadcast %cst_41 : f32 to vector<160x4xf32>
    %49 = arith.maximumf %47, %48 : vector<160x4xf32>
    %50 = tpu.iota {dimensions = array<i32: 0>} : vector<160x1xi32>
    %c16_i32 = arith.constant 16 : i32
    %51 = vector.broadcast %c16_i32 : i32 to vector<160x1xi32>
    %52 = arith.remsi %50, %51 : vector<160x1xi32>
    %c16_i32_42 = arith.constant 16 : i32
    %53 = vector.broadcast %c16_i32_42 : i32 to vector<160x1xi32>
    %54 = arith.cmpi sge, %50, %53 : vector<160x1xi32>
    %c0_i32_43 = arith.constant 0 : i32
    %55 = arith.cmpi sgt, %arg1, %c0_i32_43 : i32
    %56 = vector.broadcast %55 : i1 to vector<160x1xi1>
    %57 = arith.ori %54, %56 : vector<160x1xi1>
    %c144_i32 = arith.constant 144 : i32
    %58 = vector.broadcast %c144_i32 : i32 to vector<160x1xi32>
    %59 = arith.cmpi slt, %50, %58 : vector<160x1xi32>
    %c1_i32_44 = arith.constant 1 : i32
    %60 = arith.cmpi slt, %arg1, %c1_i32_44 : i32
    %61 = vector.broadcast %60 : i1 to vector<160x1xi1>
    %62 = arith.ori %59, %61 : vector<160x1xi1>
    %63 = arith.andi %57, %62 : vector<160x1xi1>
    %cst_45 = arith.constant 0.000000e+00 : f32
    %64 = vector.shape_cast %63 : vector<160x1xi1> to vector<160x1xi1>
    %65 = vector.broadcast %64 : vector<160x1xi1> to vector<160x4xi1>
    %66 = vector.broadcast %cst_45 : f32 to vector<160x4xf32>
    %67 = arith.select %65, %49, %66 : vector<160x4xi1>, vector<160x4xf32>
    %c1_i32_46 = arith.constant 1 : i32
    %68 = vector.broadcast %c1_i32_46 : i32 to vector<160x1xi32>
    %69 = arith.cmpi sge, %52, %68 : vector<160x1xi32>
    %c1_i32_47 = arith.constant 1 : i32
    %70 = tpu.dynamic_rotate %67 by %c1_i32_47 dim 0 : vector<160x4xf32>, i32 -> vector<160x4xf32>
    %cst_48 = arith.constant 0.000000e+00 : f32
    %71 = vector.shape_cast %69 : vector<160x1xi1> to vector<160x1xi1>
    %72 = vector.broadcast %71 : vector<160x1xi1> to vector<160x4xi1>
    %73 = vector.broadcast %cst_48 : f32 to vector<160x4xf32>
    %74 = arith.select %72, %70, %73 : vector<160x4xi1>, vector<160x4xf32>
    %c14_i32 = arith.constant 14 : i32
    %75 = vector.broadcast %c14_i32 : i32 to vector<160x1xi32>
    %76 = arith.cmpi sle, %52, %75 : vector<160x1xi32>
    %c159_i32 = arith.constant 159 : i32
    %77 = tpu.dynamic_rotate %67 by %c159_i32 dim 0 : vector<160x4xf32>, i32 -> vector<160x4xf32>
    %cst_49 = arith.constant 0.000000e+00 : f32
    %78 = vector.shape_cast %76 : vector<160x1xi1> to vector<160x1xi1>
    %79 = vector.broadcast %78 : vector<160x1xi1> to vector<160x4xi1>
    %80 = vector.broadcast %cst_49 : f32 to vector<160x4xf32>
    %81 = arith.select %79, %77, %80 : vector<160x4xi1>, vector<160x4xf32>
    %cst_50 = arith.constant 0.000000e+00 : f32
    %82 = vector.broadcast %cst_50 : f32 to vector<160x4xf32>
    %c16_i32_51 = arith.constant 16 : i32
    %83 = tpu.dynamic_rotate %74 by %c16_i32_51 dim 0 : vector<160x4xf32>, i32 -> vector<160x4xf32>
    %c0_52 = arith.constant 0 : index
    %c0_53 = arith.constant 0 : index
    %c0_54 = arith.constant 0 : index
    %84 = vector.load %arg7[%c0_52, %c0_53, %c0_54] : memref<9x1x4xf32, #tpu.memory_space<vmem>>, vector<1x1x4xf32>
    %85 = vector.shape_cast %84 : vector<1x1x4xf32> to vector<1x4xf32>
    %86 = vector.broadcast %85 : vector<1x4xf32> to vector<160x4xf32>
    %87 = arith.mulf %83, %86 : vector<160x4xf32>
    %88 = arith.addf %82, %87 : vector<160x4xf32>
    %c16_i32_55 = arith.constant 16 : i32
    %89 = tpu.dynamic_rotate %67 by %c16_i32_55 dim 0 : vector<160x4xf32>, i32 -> vector<160x4xf32>
    %c1 = arith.constant 1 : index
    %c0_56 = arith.constant 0 : index
    %c0_57 = arith.constant 0 : index
    %90 = vector.load %arg7[%c1, %c0_56, %c0_57] : memref<9x1x4xf32, #tpu.memory_space<vmem>>, vector<1x1x4xf32>
    %91 = vector.shape_cast %90 : vector<1x1x4xf32> to vector<1x4xf32>
    %92 = vector.broadcast %91 : vector<1x4xf32> to vector<160x4xf32>
    %93 = arith.mulf %89, %92 : vector<160x4xf32>
    %94 = arith.addf %88, %93 : vector<160x4xf32>
    %c16_i32_58 = arith.constant 16 : i32
    %95 = tpu.dynamic_rotate %81 by %c16_i32_58 dim 0 : vector<160x4xf32>, i32 -> vector<160x4xf32>
    %c2 = arith.constant 2 : index
    %c0_59 = arith.constant 0 : index
    %c0_60 = arith.constant 0 : index
    %96 = vector.load %arg7[%c2, %c0_59, %c0_60] : memref<9x1x4xf32, #tpu.memory_space<vmem>>, vector<1x1x4xf32>
    %97 = vector.shape_cast %96 : vector<1x1x4xf32> to vector<1x4xf32>
    %98 = vector.broadcast %97 : vector<1x4xf32> to vector<160x4xf32>
    %99 = arith.mulf %95, %98 : vector<160x4xf32>
    %100 = arith.addf %94, %99 : vector<160x4xf32>
    %c3 = arith.constant 3 : index
    %c0_61 = arith.constant 0 : index
    %c0_62 = arith.constant 0 : index
    %101 = vector.load %arg7[%c3, %c0_61, %c0_62] : memref<9x1x4xf32, #tpu.memory_space<vmem>>, vector<1x1x4xf32>
    %102 = vector.shape_cast %101 : vector<1x1x4xf32> to vector<1x4xf32>
    %103 = vector.broadcast %102 : vector<1x4xf32> to vector<160x4xf32>
    %104 = arith.mulf %74, %103 : vector<160x4xf32>
    %105 = arith.addf %100, %104 : vector<160x4xf32>
    %c4 = arith.constant 4 : index
    %c0_63 = arith.constant 0 : index
    %c0_64 = arith.constant 0 : index
    %106 = vector.load %arg7[%c4, %c0_63, %c0_64] : memref<9x1x4xf32, #tpu.memory_space<vmem>>, vector<1x1x4xf32>
    %107 = vector.shape_cast %106 : vector<1x1x4xf32> to vector<1x4xf32>
    %108 = vector.broadcast %107 : vector<1x4xf32> to vector<160x4xf32>
    %109 = arith.mulf %67, %108 : vector<160x4xf32>
    %110 = arith.addf %105, %109 : vector<160x4xf32>
    %c5 = arith.constant 5 : index
    %c0_65 = arith.constant 0 : index
    %c0_66 = arith.constant 0 : index
    %111 = vector.load %arg7[%c5, %c0_65, %c0_66] : memref<9x1x4xf32, #tpu.memory_space<vmem>>, vector<1x1x4xf32>
    %112 = vector.shape_cast %111 : vector<1x1x4xf32> to vector<1x4xf32>
    %113 = vector.broadcast %112 : vector<1x4xf32> to vector<160x4xf32>
    %114 = arith.mulf %81, %113 : vector<160x4xf32>
    %115 = arith.addf %110, %114 : vector<160x4xf32>
    %c144_i32_67 = arith.constant 144 : i32
    %116 = tpu.dynamic_rotate %74 by %c144_i32_67 dim 0 : vector<160x4xf32>, i32 -> vector<160x4xf32>
    %c6 = arith.constant 6 : index
    %c0_68 = arith.constant 0 : index
    %c0_69 = arith.constant 0 : index
    %117 = vector.load %arg7[%c6, %c0_68, %c0_69] : memref<9x1x4xf32, #tpu.memory_space<vmem>>, vector<1x1x4xf32>
    %118 = vector.shape_cast %117 : vector<1x1x4xf32> to vector<1x4xf32>
    %119 = vector.broadcast %118 : vector<1x4xf32> to vector<160x4xf32>
    %120 = arith.mulf %116, %119 : vector<160x4xf32>
    %121 = arith.addf %115, %120 : vector<160x4xf32>
    %c144_i32_70 = arith.constant 144 : i32
    %122 = tpu.dynamic_rotate %67 by %c144_i32_70 dim 0 : vector<160x4xf32>, i32 -> vector<160x4xf32>
    %c7 = arith.constant 7 : index
    %c0_71 = arith.constant 0 : index
    %c0_72 = arith.constant 0 : index
    %123 = vector.load %arg7[%c7, %c0_71, %c0_72] : memref<9x1x4xf32, #tpu.memory_space<vmem>>, vector<1x1x4xf32>
    %124 = vector.shape_cast %123 : vector<1x1x4xf32> to vector<1x4xf32>
    %125 = vector.broadcast %124 : vector<1x4xf32> to vector<160x4xf32>
    %126 = arith.mulf %122, %125 : vector<160x4xf32>
    %127 = arith.addf %121, %126 : vector<160x4xf32>
    %c144_i32_73 = arith.constant 144 : i32
    %128 = tpu.dynamic_rotate %81 by %c144_i32_73 dim 0 : vector<160x4xf32>, i32 -> vector<160x4xf32>
    %c8 = arith.constant 8 : index
    %c0_74 = arith.constant 0 : index
    %c0_75 = arith.constant 0 : index
    %129 = vector.load %arg7[%c8, %c0_74, %c0_75] : memref<9x1x4xf32, #tpu.memory_space<vmem>>, vector<1x1x4xf32>
    %130 = vector.shape_cast %129 : vector<1x1x4xf32> to vector<1x4xf32>
    %131 = vector.broadcast %130 : vector<1x4xf32> to vector<160x4xf32>
    %132 = arith.mulf %128, %131 : vector<160x4xf32>
    %133 = arith.addf %127, %132 : vector<160x4xf32>
    %134 = vector.extract_strided_slice %133 {offsets = [16, 0], sizes = [128, 4], strides = [1, 1]} : vector<160x4xf32> to vector<128x4xf32>
    %c0_76 = arith.constant 0 : index
    %c0_77 = arith.constant 0 : index
    %135 = vector.load %arg8[%c0_76, %c0_77] : memref<4x4xf32, #tpu.memory_space<vmem>>, vector<4x4xf32>
    %cst_78 = arith.constant dense<0.000000e+00> : vector<128x4xf32>
    %136 = tpu.matmul %134, %135, %cst_78 {dimension_numbers = #tpu.dot_dimension_numbers<[1], [0], [0], [1], [0, 0, 1, 1], [], []>} : vector<128x4xf32>, vector<4x4xf32>, vector<128x4xf32> -> vector<128x4xf32>
    %c0_79 = arith.constant 0 : index
    %c0_80 = arith.constant 0 : index
    %137 = vector.load %arg9[%c0_79, %c0_80] : memref<1x4xf32, #tpu.memory_space<vmem>>, vector<1x4xf32>
    %138 = vector.broadcast %137 : vector<1x4xf32> to vector<128x4xf32>
    %139 = arith.mulf %136, %138 : vector<128x4xf32>
    %c0_81 = arith.constant 0 : index
    %c0_82 = arith.constant 0 : index
    %140 = vector.load %arg10[%c0_81, %c0_82] : memref<1x4xf32, #tpu.memory_space<vmem>>, vector<1x4xf32>
    %141 = vector.broadcast %140 : vector<1x4xf32> to vector<128x4xf32>
    %142 = arith.addf %139, %141 : vector<128x4xf32>
    %cst_83 = arith.constant 0.000000e+00 : f32
    %143 = vector.broadcast %cst_83 : f32 to vector<128x4xf32>
    %144 = arith.maximumf %142, %143 : vector<128x4xf32>
    %c0_84 = arith.constant 0 : index
    %c0_85 = arith.constant 0 : index
    %145 = vector.load %arg11[%c0_84, %c0_85] : memref<4x16xf32, #tpu.memory_space<vmem>>, vector<4x16xf32>
    %cst_86 = arith.constant dense<0.000000e+00> : vector<128x16xf32>
    %146 = tpu.matmul %144, %145, %cst_86 {dimension_numbers = #tpu.dot_dimension_numbers<[1], [0], [0], [1], [0, 0, 1, 1], [], []>} : vector<128x4xf32>, vector<4x16xf32>, vector<128x16xf32> -> vector<128x16xf32>
    %c0_87 = arith.constant 0 : index
    %c0_88 = arith.constant 0 : index
    %147 = vector.load %arg12[%c0_87, %c0_88] : memref<1x16xf32, #tpu.memory_space<vmem>>, vector<1x16xf32>
    %148 = vector.broadcast %147 : vector<1x16xf32> to vector<128x16xf32>
    %149 = arith.mulf %146, %148 : vector<128x16xf32>
    %c0_89 = arith.constant 0 : index
    %c0_90 = arith.constant 0 : index
    %150 = vector.load %arg13[%c0_89, %c0_90] : memref<1x16xf32, #tpu.memory_space<vmem>>, vector<1x16xf32>
    %151 = vector.broadcast %150 : vector<1x16xf32> to vector<128x16xf32>
    %152 = arith.addf %149, %151 : vector<128x16xf32>
    %c0_91 = arith.constant 0 : index
    %c0_92 = arith.constant 0 : index
    %c0_93 = arith.constant 0 : index
    %c0_94 = arith.constant 0 : index
    %153 = vector.load %arg2[%c0_91, %c0_92, %c0_93, %c0_94] : memref<1x8x16x16xf32, #tpu.memory_space<vmem>>, vector<1x8x16x16xf32>
    %154 = vector.shape_cast %153 : vector<1x8x16x16xf32> to vector<8x16x16xf32>
    %155 = vector.shape_cast %154 : vector<8x16x16xf32> to vector<128x16xf32>
    %156 = arith.addf %152, %155 : vector<128x16xf32>
    %cst_95 = arith.constant 0.000000e+00 : f32
    %157 = vector.broadcast %cst_95 : f32 to vector<128x16xf32>
    %158 = arith.maximumf %156, %157 : vector<128x16xf32>
    %159 = vector.shape_cast %158 : vector<128x16xf32> to vector<8x16x16xf32>
    %c0_96 = arith.constant 0 : index
    %c0_97 = arith.constant 0 : index
    %c0_98 = arith.constant 0 : index
    %c0_99 = arith.constant 0 : index
    %160 = vector.load %arg14[%c0_96, %c0_97, %c0_98, %c0_99] : memref<1x8x16x16xf32, #tpu.memory_space<vmem>>, vector<1x8x16x16xf32>
    %161 = vector.shape_cast %160 : vector<1x8x16x16xf32> to vector<8x16x16xf32>
    %162 = vector.shape_cast %159 : vector<8x16x16xf32> to vector<1x8x16x16xf32>
    tpu.vector_store %arg14[%c0_96, %c0_97, %c0_98, %c0_99], %162 {strides = array<i32>} : memref<1x8x16x16xf32, #tpu.memory_space<vmem>>, vector<1x8x16x16xf32>,
    return
  }
  func.func @transform_0(%arg0: i32, %arg1: i32) -> (i32, i32, i32, i32) {
    %c0_i32 = arith.constant 0 : i32
    %c0_i32_0 = arith.constant 0 : i32
    %c0_i32_1 = arith.constant 0 : i32
    return %arg0, %arg1, %c0_i32, %c0_i32_0 : i32, i32, i32, i32
  }
  func.func @transform_2(%arg0: i32, %arg1: i32) -> (i32, i32) {
    %c0_i32 = arith.constant 0 : i32
    %c0_i32_0 = arith.constant 0 : i32
    %c0_i32_1 = arith.constant 0 : i32
    return %c0_i32, %c0_i32_0 : i32, i32
  }
  func.func @transform_3(%arg0: i32, %arg1: i32) -> (i32, i32) {
    %c0_i32 = arith.constant 0 : i32
    %c0_i32_0 = arith.constant 0 : i32
    %c0_i32_1 = arith.constant 0 : i32
    return %c0_i32, %c0_i32_0 : i32, i32
  }
  func.func @transform_4(%arg0: i32, %arg1: i32) -> (i32, i32) {
    %c0_i32 = arith.constant 0 : i32
    %c0_i32_0 = arith.constant 0 : i32
    %c0_i32_1 = arith.constant 0 : i32
    return %c0_i32, %c0_i32_0 : i32, i32
  }
  func.func @transform_5(%arg0: i32, %arg1: i32) -> (i32, i32, i32) {
    %c0_i32 = arith.constant 0 : i32
    %c0_i32_0 = arith.constant 0 : i32
    %c0_i32_1 = arith.constant 0 : i32
    %c0_i32_2 = arith.constant 0 : i32
    return %c0_i32, %c0_i32_0, %c0_i32_1 : i32, i32, i32
  }
  func.func @transform_6(%arg0: i32, %arg1: i32) -> (i32, i32) {
    %c0_i32 = arith.constant 0 : i32
    %c0_i32_0 = arith.constant 0 : i32
    %c0_i32_1 = arith.constant 0 : i32
    return %c0_i32, %c0_i32_0 : i32, i32
  }
  func.func @transform_7(%arg0: i32, %arg1: i32) -> (i32, i32) {
    %c0_i32 = arith.constant 0 : i32
    %c0_i32_0 = arith.constant 0 : i32
    %c0_i32_1 = arith.constant 0 : i32
    return %c0_i32, %c0_i32_0 : i32, i32
  }
  func.func @transform_8(%arg0: i32, %arg1: i32) -> (i32, i32) {
    %c0_i32 = arith.constant 0 : i32
    %c0_i32_0 = arith.constant 0 : i32
    %c0_i32_1 = arith.constant 0 : i32
    return %c0_i32, %c0_i32_0 : i32, i32
  }
  func.func @transform_9(%arg0: i32, %arg1: i32) -> (i32, i32) {
    %c0_i32 = arith.constant 0 : i32
    %c0_i32_0 = arith.constant 0 : i32
    %c0_i32_1 = arith.constant 0 : i32
    return %c0_i32, %c0_i32_0 : i32, i32
  }
  func.func @transform_10(%arg0: i32, %arg1: i32) -> (i32, i32) {
    %c0_i32 = arith.constant 0 : i32
    %c0_i32_0 = arith.constant 0 : i32
    %c0_i32_1 = arith.constant 0 : i32
    return %c0_i32, %c0_i32_0 : i32, i32
  }
  func.func @transform_11(%arg0: i32, %arg1: i32) -> (i32, i32) {
    %c0_i32 = arith.constant 0 : i32
    %c0_i32_0 = arith.constant 0 : i32
    %c0_i32_1 = arith.constant 0 : i32
    return %c0_i32, %c0_i32_0 : i32, i32
  }
  func.func @transform_12(%arg0: i32, %arg1: i32) -> (i32, i32, i32, i32) {
    %c0_i32 = arith.constant 0 : i32
    %c0_i32_0 = arith.constant 0 : i32
    %c0_i32_1 = arith.constant 0 : i32
    return %arg0, %arg1, %c0_i32, %c0_i32_0 : i32, i32, i32, i32
  }
}

</mosaic_0001>

<bundles_post_ra>
// kernel: tpu_custom_call.1
= control target key start
LH: loop header
LB: loop body
LE: loop exit
PB: predicated region body
PF: predicated region fallthrough
CT: control target
= control target key end

     0   :  { %s4355_s0 = inlined_call_operand.hbm [shape: f32[2,16,16,16], index: 0, kind: input, shape index: {}]   ;;  %s4356_s1 = inlined_call_operand.hbm [shape: f32[2,16,16,16], index: 1, kind: input, shape index: {}]   ;;  %s4357_s2 = inlined_call_operand.vmem [shape: f32[16,4], index: 2, kind: input, shape index: {}]   ;;  %s4358_s3 = inlined_call_operand.vmem [shape: f32[1,4], index: 3, kind: input, shape index: {}]   ;;  %s4359_s4 = inlined_call_operand.vmem [shape: f32[1,4], index: 4, kind: input, shape index: {}]   ;;  %s4360_s5 = inlined_call_operand.vmem [shape: f32[9,1,4], index: 5, kind: input, shape index: {}]   ;;  %s4361_s6 = inlined_call_operand.vmem [shape: f32[4,4], index: 6, kind: input, shape index: {}]   ;;  %s4362_s7 = inlined_call_operand.vmem [shape: f32[1,4], index: 7, kind: input, shape index: {}]   ;;  %s4363_s8 = inlined_call_operand.vmem [shape: f32[1,4], index: 8, kind: input, shape index: {}]   ;;  %s4364_s9 = inlined_call_operand.vmem [shape: f32[4,16], index: 9, kind: input, shape index: {}]   ;;  %s4365_s10 = inlined_call_operand.vmem [shape: f32[1,16], index: 10, kind: input, shape index: {}]   ;;  %s4366_s11 = inlined_call_operand.vmem [shape: f32[1,16], index: 11, kind: input, shape index: {}]   ;;  %s4367_s12 = inlined_call_operand.hbm [shape: f32[2,16,16,16], index: 12, kind: output, shape index: {}]  }
   0x1   :  { %4401 = sst [smem:[#allocation58_spill]] %s4355_s0 }
   0x2   :  { %4402 = sst [smem:[#allocation59_spill]] %s4360_s5 }
   0x3   :  { %4403 = sst [smem:[#allocation60_spill]] %s4362_s7 }
   0x4   :  { %4404 = sst [smem:[#allocation61_spill]] %s4363_s8 }
   0x5   :  { %4405 = sst [smem:[#allocation62_spill]] %s4364_s9 }
   0x6   :  { %4406 = sst [smem:[#allocation63_spill]] %s4365_s10 }
   0x7   :  { %4407 = sst [smem:[#allocation64_spill]] %s4366_s11 }
   0x8   :  { %4408 = sst [smem:[#allocation65_spill]] %s4367_s12 }
   0x9   :  { %17 = vsyncpa [#allocation5], 0 }
   0xa   :  { %19 = vsyncpa [#allocation5 + $0x1], 0 }
   0xb   :  { %20 = vsyncpa [#allocation6], 0 }
   0xc   :  { %22 = vsyncpa [#allocation6 + $0x1], 0  ;;  %s3093_s21 = smov 0   ;;  %s3095_s22 = smov 0  }
   0xd   :  { %s3097_s23 = smov 0   ;;  %s3099_s24 = smov 0  }
   0xe   :  { %s3101_s25 = smov 0   ;;  %s3103_s26 = smov 0  }
   0xf   :  { %s3105_s27 = smov 0   ;;  %s3107_s28 = smov 0  }
  0x10 LB: > { %4409 = sst [smem:[#allocation18_spill]] %s2990_s21  ;;  %s2489_s29 = sadd.s32 4294967295, %s3018_s28   ;;  %s3018_s28 = sphi %s3107_s28, %s28_s28   ;;  %s3014_s27 = sphi %s3105_s27, %s4543_s27   ;;  %s3010_s26 = sphi %s3103_s26, %s4542_s26   ;;  %s3006_s25 = sphi %s3101_s25, %s4541_s25   ;;  %s3002_s24 = sphi %s3099_s24, %s4540_s24   ;;  %s2998_s23 = sphi %s3097_s23, %s4546_s23   ;;  %s2994_s22 = sphi %s3095_s22, %s4545_s22   ;;  %s2990_s21 = sphi %s3093_s21, %s4544_s21  }
  0x11   : > { %4410 = sst [smem:[#allocation19_spill]] %s3010_s26  ;;  %s2490_s30 = sadd.s32 4294967294, %s3018_s28  }
  0x12   : > { %4411 = sst [smem:[#allocation20_spill]] %s3014_s27  ;;  %s37_s13 = sadd.s32 1, %s3010_s26 }
  0x13   : > { %s40_s14 = sadd.s32 1, %s3014_s27  ;;  %p38_p0 = scmp.ge.s32.totalorder %s37_s13, 2 }
  0x14   : > { %s49_s15 = sadd.s32 1, %s2998_s23  ;;  %p56_p1 = scmp.ne.s32.totalorder %s2998_s23, %s2994_s22 }
  0x15   : > { %p57_p2 = scmp.eq.s32.totalorder %s3018_s28, 0  ;;  %s4548_s13 = smov (%p38_p0, %s37_s13), 0 }
  0x16   : > { %4412 = sst [smem:[#allocation21_spill]] %s4548_s13  ;;  %s4550_s14 = smov (!%p38_p0, %s40_s14), %s3014_s27 }
  0x17   : > { %s45_s16 = ssub.s32 %s3010_s26, %s4548_s13  ;;  %p3146_p3 = por %p57_p2, %p56_p1 }
  0x18   : > { %p42_p4 = scmp.ge.s32.totalorder %s4550_s14, 2  ;;  %p62_p5 = scmp.ne.s32.totalorder %s2994_s22, %s2990_s21 }
  0x19   : > { %p63_p6 = scmp.eq.s32.totalorder %s2489_s29, 0  ;;  %p298_p7 = scmp.eq.s32.totalorder %s2489_s29, 3 }
  0x1a   : > { %s4552_s14 = smov (%p42_p4, %s4550_s14), 0  ;;  %p304_p10 = scmp.eq.s32.totalorder %s2490_s30, 3 }
  0x1b   : > { %4414 = sst [smem:[#allocation22_spill]] %s4552_s14  ;;  %p3154_p8 = por %p63_p6, %p62_p5 }
  0x1c   : > { %p3158_p9 = por %p298_p7, %p56_p1  ;;  %s44_s20 = ssub.s32 %s3014_s27, %s4552_s14 }
  0x1d   : > { %s46_s13 = sor.u32 %s45_s16, %s44_s20  ;;  %p3164_p12 = por %p304_p10, %p62_p5 }
  0x1e   : > { %s4416_s19 = scalar_select %p3158_p9, 1, 0 }
  0x1f   : > { %p47_p11 = scmp.eq.s32.totalorder %s46_s13, 0  ;;  %p2766_p13 = scmp.lt.s32.totalorder %s3018_s28, 4 }
  0x20   : > { %s4417_s21 = scalar_select %p3164_p12, 1, 0 }
  0x21   : > { %s354_s29 = sand.u32 1, %s2998_s23   ;;  %s2594_s10 = sshll.u32 %s3010_s26, 4 }
  0x22   : > { %s3171_s12 = scalar_select %p47_p11, %s2998_s23, %s49_s15  }
  0x23   : > { %s2493_s11 = sshll.u32 %s354_s29, 7  ;;  %s2496_s8 = sshll.u32 %s3014_s27, 5 }
  0x24   : > { %4418 = sst [smem:[#allocation23_spill]] %s3171_s12  ;;  %s358_s7 = scalar_lea.vmem [#allocation4], %s2493_s11 }
  0x25   : > { %s368_s9 = sshll.u32 %s358_s7, 4  ;;  %s365_s5 = sadd.s32 %s2594_s10, %s2496_s8  ;;  %s3175_s9 = int_to_ptr.vmem [resolvable:$true] %s368_s9 }
  0x26   : > { %s2497_s14 = sshll.u32 %s365_s5, 7  ;;  %p3179_p0 = pnand %p2766_p13, %p3146_p3 }
  0x27   : > { %s4420_s0 = sld [smem:[#allocation58_spill]]  ;;  %s3188_s7 = scalar_lea.sflag [#allocation5], %s354_s29 }
  0x28   : > { %p2840_p2 = pneg %p3179_p0 }
  0x2d   : > { %s3186_s15 = scalar_lea.hbm %s4420_s0, %s2497_s14  ;;  %s2843_s11 = scalar_lea.hbm %s4420_s0, 8192 }
  0x2e   : > { %s2838_s8 = scalar_lea.hbm %s3186_s15, 2048  ;;  %p2844_p5 = scmp.lt.u32.totalorder %s3186_s15, %s4420_s0 }
  0x2f   : > { %p2839_p1 = scmp.ne.s32.totalorder %s3186_s15, %s2838_s8  ;;  %p2845_p6 = scmp.lt.u32.totalorder %s2843_s11, %s2838_s8 }
  0x30   : > { %p2847_p10 = scmp.lt.u32.totalorder %s2838_s8, %s3186_s15 }
  0x31   : > { %p2841_p3 = pnand %p2840_p2, %p2839_p1  ;;  %p2846_p7 = por %p2845_p6, %p2844_p5 }
  0x33   : > { %p2842_p4 = pneg %p2841_p3  ;;  %p2848_p11 = por %p2847_p10, %p2846_p7 }
  0x35   : > { %p2849_p13 = pnand %p2848_p11, %p2842_p4 }
  0x37   : > { %2852 = shalt.err (!%p2849_p13)
}
  0x38   : > { %s2853_s20 = scalar_lea.vmem %s3175_s9, 2048  ;;  %s3020_s29 = smov [#allocation4]  }
  0x39   : > { %p2854_p1 = scmp.ne.s32.totalorder %s3175_s9, %s2853_s20  ;;  %s2858_s13 = sshll.u32 %s3020_s29, 4  ;;  %s2859_s13 = int_to_ptr.vmem [resolvable:$false] %s2858_s13 }
  0x3a   : > { %s2860_s16 = scalar_lea.vmem %s2859_s13, 4096  ;;  %p2861_p9 = scmp.lt.s32.totalorder %s3175_s9, %s2859_s13 }
  0x3b   : > { %p2856_p3 = pnand %p2854_p1, %p2840_p2  ;;  %p2862_p5 = scmp.lt.s32.totalorder %s2860_s16, %s2853_s20 }
  0x3d   : > { %p2857_p12 = pneg %p2856_p3  ;;  %p2863_p6 = por %p2862_p5, %p2861_p9 }
  0x3f   : > { %p2864_p7 = pnand %p2863_p6, %p2857_p12 }
  0x41   : > { %2867 = shalt.err (!%p2864_p7)
}
  0x42   : > { %s3021_s8 = smov 128   ;;  %s3022_s5 = smov 8  }
  0x43   : > { %2761 = dma.hbm_to_vmem [thread:$0]  (!%p3179_p0), %s3186_s15, 2048, %s3175_s9, %s3188_s7, %s3021_s8, %s3021_s8, %s3022_s5  }
  0x44   : > { %p2498_p2 = scmp.ge.s32.totalorder %s3018_s28, 1  ;;  %p376_p4 = scmp.lt.s32.totalorder %s3018_s28, 5 }
  0x46   : > { %p377_p10 = pnand %p2498_p2, %p376_p4 }
  0x48   : > { %380 = sbr.rel (%p377_p10) target bundleno = 1062 (0x426), region = 64 }
  0x4f   : > { %s3219_s10 = sand.u32 1, %s2994_s22  }
  0x50   : > { %s4374_s11 = sshll.u32 %s3219_s10, 7  ;;  %s383_s14 = scalar_lea.sflag [#allocation5], %s3219_s10 }
  0x51   : > { %s3225_s17 = scalar_lea.vmem [#allocation4], %s4374_s11 }
  0x52   : > { %2977 = dma.done.wait (%p3154_p8), %s383_s14, 2048  }
  0x53   : > { %2979 = vsyncadd (%p3154_p8), %s383_s14, 4294965248  ;;  %vm485_vm0 = vcmask 130048   ;;  %v483_v0 = vld [vmem:[%s4357_s2] sm:$0xff]  ;;  %v484_v1 = vld [vmem:[%s4357_s2 + $0x8] sm:$0xff]  ;;  %s2501_s18 = sshll.u32 %s3002_s24, 3  ;;  %s2504_s16 = sshll.u32 %s3006_s25, 8 }
  0x54   : > { %v467_v2 = vld [vmem:[%s3225_s17] sm:$0xff]  ;;  %v2744_v3 = vpack.c.bf16 %v484_v1, %v483_v0  ;;  %v477_v4 = vld [vmem:[%s3225_s17 + $0x50] sm:$0xff]  ;;  %v468_v5 = vld [vmem:[%s3225_s17 + $0x8] sm:$0xff]  ;;  %s2502_s20 = sadd.s32 4294967295, %s2501_s18  ;;  %s431_s29 = sadd.s32 8, %s2501_s18 }
  0x55   : > { %2658 = vmatprep.mubr.msk.f32.mxu0 %vm485_vm0, %v467_v2  ;;  %v478_v6 = vld [vmem:[%s3225_s17 + $0x58] sm:$0xff]  ;;  %v469_v7 = vld [vmem:[%s3225_s17 + $0x10] sm:$0xff]  ;;  %2673 = vmatprep.mubr.msk.f32.mxu1 %vm485_vm0, %v477_v4  ;;  %v479_v8 = vld [vmem:[%s3225_s17 + $0x60] sm:$0xff]  ;;  %p429_p8 = scmp.gt.s32.totalorder %s2502_s20, 0  ;;  %p432_p9 = scmp.lt.s32.totalorder %s431_s29, 15 }
  0x56   : > { %2745 = vmatprep.subr.bf16.mxu0 %v2744_v3  ;;  %2752 = vmatprep.subr.bf16.mxu1 %v2744_v3  ;;  %v470_v9 = vld [vmem:[%s3225_s17 + $0x18] sm:$0xff]  ;;  %v480_v10 = vld [vmem:[%s3225_s17 + $0x68] sm:$0xff]  ;;  %v471_v11 = vld [vmem:[%s3225_s17 + $0x20] sm:$0xff]  ;;  %s3023_s15 = smov [#allocation2]   ;;  %s2870_s26 = scalar_lea.hbm %s4356_s1, 8192 }
  0x57   : > { %2747 = vmatpush3.bf16.msra.mxu0 %v2744_v3  ;;  %2753 = vmatpush3.bf16.msra.mxu1 %v2744_v3  ;;  %v481_v12 = vld [vmem:[%s3225_s17 + $0x70] sm:$0xff]  ;;  %v472_v13 = vld [vmem:[%s3225_s17 + $0x28] sm:$0xff]  ;;  %v482_v14 = vld [vmem:[%s3225_s17 + $0x78] sm:$0xff]  ;;  %s4554_s20 = smov (!%p429_p8, %s2502_s20), 0  ;;  %s4556_s29 = smov (!%p432_p9, %s431_s29), 15 }
  0x58   : > { %v473_v15 = vld [vmem:[%s3225_s17 + $0x30] sm:$0xff]  ;;  %v474_v16 = vld [vmem:[%s3225_s17 + $0x38] sm:$0xff]  ;;  %v475_v17 = vld [vmem:[%s3225_s17 + $0x40] sm:$0xff]  ;;  %s2503_s13 = sshll.u32 %s4554_s20, 4  ;;  %s446_s7 = sshll.u32 %s3023_s15, 4  ;;  %s3276_s7 = int_to_ptr.vmem [resolvable:$true] %s446_s7 }
  0x59   : > { %v476_v18 = vld [vmem:[%s3225_s17 + $0x48] sm:$0xff]  ;;  %s436_s8 = sadd.s32 %s2504_s16, %s2503_s13  ;;  %s2506_s11 = sshll.u32 %s4556_s29, 4 }
  0x5a   : > { %2659 = vmatmul.mubr.msk.f32.vlgmr.msra.gmra.mrb[0].mxu0 %vm485_vm0, %v468_v5  ;;  %2674 = vmatmul.mubr.msk.f32.vlgmr.msra.gmra.mrb[0].mxu1 %vm485_vm0, %v478_v6  ;;  %s2505_s5 = sshll.u32 %s436_s8, 4 }
  0x5b   : > { %2661 = vmatprep.mubr.msk.f32.mxu0 %vm485_vm0, %v469_v7  ;;  %2676 = vmatprep.mubr.msk.f32.mxu1 %vm485_vm0, %v479_v8  ;;  %s438_s30 = scalar_lea.hbm %s4356_s1, %s2505_s5 }
  0x5c   : > { %s2868_s0 = scalar_lea.hbm %s438_s30, 256  ;;  %p2871_p0 = scmp.lt.u32.totalorder %s438_s30, %s4356_s1 }
  0x5d   : > { %p2869_p12 = scmp.ne.s32.totalorder %s438_s30, %s2868_s0  ;;  %p2872_p11 = scmp.lt.u32.totalorder %s2870_s26, %s2868_s0 }
  0x5e   : > { %2662 = vmatmul.mubr.msk.f32.gmra.mrb[2].mxu0 %vm485_vm0, %v470_v9  ;;  %2677 = vmatmul.mubr.msk.f32.gmra.mrb[2].mxu1 %vm485_vm0, %v480_v10  ;;  %p2874_p1 = scmp.lt.u32.totalorder %s2868_s0, %s438_s30 }
  0x5f   : > { %2664 = vmatprep.mubr.msk.f32.mxu0 %vm485_vm0, %v471_v11  ;;  %2679 = vmatprep.mubr.msk.f32.mxu1 %vm485_vm0, %v481_v12  ;;  %p2873_p13 = por %p2872_p11, %p2871_p0 }
  0x61   : > { %p2875_p3 = por %p2874_p1, %p2873_p13 }
  0x62   : > { %2665 = vmatmul.mubr.msk.f32.gmra.mrb[4].mxu0 %vm485_vm0, %v472_v13  ;;  %2680 = vmatmul.mubr.msk.f32.gmra.mrb[4].mxu1 %vm485_vm0, %v482_v14 }
  0x63   : > { %2667 = vmatprep.mubr.msk.f32.mxu0 %vm485_vm0, %v473_v15  ;;  %p2876_p5 = pnand %p2875_p3, %p2869_p12 }
  0x66   : > { %2668 = vmatmul.mubr.msk.f32.gmra.mrb[6].mxu0 %vm485_vm0, %v474_v16 }
  0x67   : > { %2670 = vmatprep.mubr.msk.f32.mxu0 %vm485_vm0, %v475_v17 }
  0x6a   : > { %2671 = vmatmul.mubr.msk.f32.gmra.mrb[8].mxu0 %vm485_vm0, %v476_v18 }
  0x6b   : > { %2879 = shalt.err (!%p2876_p5)  }
  0x6c   : > { %s2880_s29 = scalar_lea.vmem %s3276_s7, 256  ;;  %s2884_s13 = scalar_lea.vmem %s3276_s7, 512 }
  0x6d   : > { %p2881_p6 = scmp.ne.s32.totalorder %s3276_s7, %s2880_s29  ;;  %p2885_p7 = scmp.lt.s32.totalorder %s3276_s7, %s3276_s7 }
  0x6e   : > { %p2886_p2 = scmp.lt.s32.totalorder %s2884_s13, %s2880_s29 }
  0x70   : > { %p2887_p4 = por %p2886_p2, %p2885_p7 }
  0x72   : > { %p2888_p10 = pnand %p2887_p4, %p2881_p6 }
  0x74   : > { %2891 = shalt.err (!%p2888_p10)  }
  0x75   : > { %449 = dma.hbm_to_vmem [thread:$0]  %s438_s30, 256, %s3276_s7, [#allocation3] }
  0x76   : > { %s451_s12 = sadd.s32 %s2506_s11, %s2504_s16  ;;  %s3024_s27 = smov [#allocation2 + $0x10]  }
  0x77   : > { %s2507_s0 = sshll.u32 %s451_s12, 4  ;;  %s463_s8 = sshll.u32 %s3024_s27, 4  ;;  %s464_s8 = int_to_ptr.vmem [resolvable:$true] %s463_s8 }
  0x78   : > { %s453_s9 = scalar_lea.hbm %s4356_s1, %s2507_s0 }
  0x79   : > { %s2892_s15 = scalar_lea.hbm %s453_s9, 256  ;;  %p2895_p9 = scmp.lt.u32.totalorder %s453_s9, %s4356_s1 }
  0x7a   : > { %p2893_p8 = scmp.ne.s32.totalorder %s453_s9, %s2892_s15  ;;  %p2896_p12 = scmp.lt.u32.totalorder %s2870_s26, %s2892_s15 }
  0x7b   : > { %p2898_p11 = scmp.lt.u32.totalorder %s2892_s15, %s453_s9 }
  0x7c   : > { %p2897_p0 = por %p2896_p12, %p2895_p9 }
  0x7e   : > { %p2899_p13 = por %p2898_p11, %p2897_p0 }
  0x80   : > { %p2900_p1 = pnand %p2899_p13, %p2893_p8 }
  0x82   : > { %2903 = shalt.err (!%p2900_p1)  }
  0x83   : > { %s2904_s11 = scalar_lea.vmem %s464_s8, 256  ;;  %p2909_p5 = scmp.lt.s32.totalorder %s464_s8, %s3276_s7 }
  0x84   : > { %p2905_p3 = scmp.ne.s32.totalorder %s464_s8, %s2904_s11  ;;  %p2910_p6 = scmp.lt.s32.totalorder %s2884_s13, %s2904_s11 }
  0x86   : > { %p2911_p7 = por %p2910_p6, %p2909_p5 }
  0x88   : > { %p2912_p2 = pnand %p2911_p7, %p2905_p3 }
  0x8a   : > { %2915 = shalt.err (!%p2912_p2)  }
  0x8b   : > { %466 = dma.hbm_to_vmem [thread:$0]  %s453_s9, 256, %s464_s8, [#allocation3 + $0x1] }
  0x8c   : > { %s4421_s26 = sshll.u32 %s3219_s10, 7 }
  0x8d   : > { %s3316_s16 = scalar_lea.vmem [#allocation7], %s4421_s26 }
 0x12d   : > { %v2660_v19 = vpop.f32.mrb[0].mxu0  ;;  %v2675_v20 = vpop.f32.mrb[0].mxu1 }
 0x12e   : > { %v600_v21 = vpop.f32.mrb[1].mxu0  ;;  %v650_v22 = vpop.f32.mrb[1].mxu1 }
 0x131   : > { %v3298_v23 = vpop.f32.mrb[2].mxu0  ;;  %v2678_v24 = vpop.f32.mrb[2].mxu1 }
 0x132   : > { %v3300_v25 = vpop.f32.mrb[3].mxu0  ;;  %v660_v26 = vpop.f32.mrb[3].mxu1 }
 0x135   : > { %v3302_v27 = vpop.f32.mrb[4].mxu0  ;;  %v2681_v28 = vpop.f32.mrb[4].mxu1 }
 0x136   : > { %v3304_v29 = vpop.f32.mrb[5].mxu0  ;;  %v670_v30 = vpop.f32.mrb[5].mxu1 }
 0x139   : > { %v3306_v31 = vpop.f32.mrb[6].mxu0 }
 0x13a   : > { %v3308_v32 = vpop.f32.mrb[7].mxu0 }
 0x13d   : > { %v3310_v33 = vpop.f32.mrb[8].mxu0 }
 0x13e   : > { %v3312_v34 = vpop.f32.mrb[9].mxu0 }
 0x13f   : > { %2980 = dma.done.wait [#allocation3], 256 }
 0x140   : > { %2981 = vsyncadd [#allocation3], 4294967040 }
 0x141   : > { %2982 = dma.done.wait [#allocation3 + $0x1], 256 }
 0x142   : > { %2983 = vsyncadd [#allocation3 + $0x1], 4294967040  ;;  %v688_v35 = vld [vmem:[%s4357_s2] sm:$0xff]  ;;  %v689_v36 = vld [vmem:[%s4357_s2 + $0x8] sm:$0xff]  ;;  %vm1841_vm1 = vcmask 1043456   ;;  %v861_v44 = vlaneseq  ;;  %p1042_p4 = scmp.gt.s32.totalorder %s3002_s24, 0 }
 0x143   : > { %v684_v37 = vld [vmem:[#allocation2] sm:$0xff]  ;;  %v2748_v38 = vpack.c.bf16 %v689_v36, %v688_v35  ;;  %v685_v39 = vld [vmem:[#allocation2 + $0x8] sm:$0xff]  ;;  %v686_v40 = vld [vmem:[#allocation2 + $0x10] sm:$0xff]  ;;  %s4424_s18 = sld [smem:[#allocation59_spill]]  ;;  %p1086_p10 = scmp.lt.s32.totalorder %s3002_s24, 1 }
 0x144   : > { %2686 = vmatprep.mubr.msk.f32.mxu1 %vm485_vm0, %v684_v37  ;;  %v687_v41 = vld [vmem:[#allocation2 + $0x18] sm:$0xff]  ;;  %v1791_v42 = vld [vmem:[%s4361_s6] sm:$0xf]  ;;  %v3345_v48 = vshrl.u32 %v861_v44, 7  ;;  %s3390_s20 = scalar_select %p1042_p4, 1, 0 }
 0x145   : > { %2749 = vmatprep.subr.bf16.mxu1 %v2748_v38  ;;  %v3336_v43 = vld [vmem:[%s4358_s3] ss:$0 sm:$0xff]  ;;  %s3443_s29 = scalar_select %p1086_p10, 1, 0 }
 0x146   : > { %2751 = vmatpush3.bf16.msra.mxu1 %v2748_v38  ;;  %v807_v45 = vmul.f32 %v2675_v20, %v3336_v43  ;;  %v808_v46 = vmul.f32 %v3336_v43, %v660_v26  ;;  %v3343_v47 = vld [vmem:[%s4359_s4] ss:$0 sm:$0xff]  ;;  %v810_v51 = vmul.f32 %v3336_v43, %v670_v30  ;;  %v876_v52 = vadd.s32 112, %v3345_v48  ;;  %s4531_s0 = sld [smem:[#allocation60_spill]]  ;;  %s4532_s5 = sld [smem:[#allocation61_spill]] }
 0x147   : > { %2692 = vmatprep.subr.msk.mxu1 %vm1841_vm1, %v1791_v42  ;;  %v809_v53 = vmul.f32 %v2678_v24, %v3336_v43  ;;  %v797_v56 = vmul.f32 %v2660_v19, %v3336_v43  ;;  %v796_v60 = vmul.f32 %v3336_v43, %v600_v21  ;;  %vm1230_vm2 = vcmp.lt.s32.totalorder %v3345_v48, 1  ;;  %s4533_s15 = sld [smem:[#allocation63_spill]]  ;;  %s4534_s30 = sld [smem:[#allocation64_spill]] }
 0x148   : > { %v834_v49 = vadd.f32 %v3343_v47, %v807_v45  ;;  %v835_v50 = vadd.f32 %v3343_v47, %v808_v46  ;;  %v837_v57 = vadd.f32 %v3343_v47, %v810_v51  ;;  %v984_v58 = vand.u32 15, %v876_v52  ;;  %s2588_s7 = sshll.u32 %s3006_s25, 5  ;;  %s2376_s25 = sshll.u32 %s3316_s16, 4  ;;  %s4292_s25 = int_to_ptr.vmem [resolvable:$true] %s2376_s25 }
 0x149   : > { %2687 = vmatmul.mubr.msk.f32.vlgmr.msra.gmra.mrb[6].mxu1 %vm485_vm0, %v685_v39  ;;  %v836_v61 = vadd.f32 %v3343_v47, %v809_v53  ;;  %v824_v63 = vadd.f32 %v3343_v47, %v797_v56  ;;  %v806_v0 = vmul.f32 %v3336_v43, %v650_v22  ;;  %v878_v2 = vadd.s32 128, %v3345_v48  ;;  %v3382_v7 = vld [vmem:[%s4424_s18] ss:$0 sm:$0xff]  ;;  %v3402_v16 = vld [vmem:[%s4424_s18 + $0x1] ss:$0 sm:$0xff]  ;;  %s4535_s12 = sld [smem:[#allocation65_spill]] }
 0x14a   : > { %2689 = vmatprep.mubr.msk.f32.mxu1 %vm485_vm0, %v686_v40  ;;  %2693 = vmatpush3.msk.msra.mxu1 %vm1841_vm1, %v1791_v42  ;;  %v3352_v54 = vmax.f32 %v834_v49, 0.0  ;;  %v3354_v55 = vmax.f32 %v835_v50, 0.0  ;;  %v3366_v1 = vmax.f32 %v837_v57, 0.0  ;;  %vm1204_vm3 = vcmp.ge.s32.totalorder %v984_v58, 1  ;;  %v3439_v37 = vld [vmem:[%s4424_s18 + $0x2] ss:$0 sm:$0xff] }
 0x14b   : > { %v823_v4 = vadd.f32 %v3343_v47, %v796_v60  ;;  %v3376_v5 = vmax.f32 %v836_v61, 0.0  ;;  %v811_v6 = vmul.f32 %v2681_v28, %v3336_v43  ;;  %v833_v10 = vadd.f32 %v3343_v47, %v806_v0  ;;  %v3469_v56 = vld [vmem:[%s4424_s18 + $0x3] ss:$0 sm:$0xff]  ;;  %s2360_s27 = scalar_lea.sflag [#allocation6], %s3219_s10  ;;  %s2916_s8 = scalar_lea.vmem %s4292_s25, 2048 }
 0x14c   : > { %v4383_v59 = vrot.slane %v3354_v55, 7  ;;  %v4381_v62 = vrot.slane %v3352_v54, 7  ;;  %4422 = vst [vmem:[#allocation24_spill] sm:$0xff] %v3366_v1  ;;  %v3388_v11 = vmax.f32 %v824_v63, 0.0  ;;  %vm1351_vm4 = vcmp.lt.s32.totalorder %v3345_v48, 7  ;;  %p2917_p8 = scmp.ne.s32.totalorder %s4292_s25, %s2916_s8  ;;  %p4536_p9 = scmp.ne.s32.totalorder %s4416_s19, 0 }
 0x14d   : > { %2690 = vmatmul.mubr.msk.f32.gmra.mrb[8].mxu1 %vm485_vm0, %v687_v41  ;;  %4423 = vst [vmem:[#allocation25_spill] sm:$0xff] %v3376_v5  ;;  %v4385_v9 = vrot.slane %v3376_v5, 1  ;;  %v998_v12 = vand.u32 15, %v878_v2  ;;  %v4382_v13 = vrot.slane %v3366_v1, 7  ;;  %v3394_v14 = vmax.f32 %v823_v4, 0.0 }
 0x14e   : > { %v1236_v3 = vsel %vm1230_vm2, %v4381_v62, %v4383_v59  ;;  %v3397_v15 = vadd.s32 8, %v3345_v48  ;;  %v4377_v17 = vrot.slane %v3354_v55, 1  ;;  %v798_v18 = vmul.f32 %v3336_v43, %v3300_v25  ;;  %p2918_p12 = pnand %p2917_p8, %p4536_p9 }
 0x14f   : > { %v3384_v8 = vsel %vm1204_vm3, %v1236_v3, 0.0  ;;  %v838_v19 = vadd.f32 %v3343_v47, %v811_v6  ;;  %v4384_v20 = vrot.slane %v3376_v5, 7  ;;  %v1493_v22 = vmul.f32 %v3402_v16, %v3354_v55 }
 0x150   : > { %4425 = vst [vmem:[#allocation26_spill] sm:$0xff] %v3384_v8  ;;  %v1453_v21 = vmul.f32 %v3382_v7, %v3384_v8  ;;  %v3415_v24 = vadd.s32 16, %v3345_v48  ;;  %v3423_v25 = vsel %vm1351_vm4, %v4377_v17, %v4385_v9  ;;  %v799_v26 = vmul.f32 %v3298_v23, %v3336_v43  ;;  %p2919_p0 = pneg %p2918_p12 }
 0x151   : > { %4426 = vst [vmem:[#allocation27_spill] sm:$0xff] %v3423_v25  ;;  %v1213_v28 = vrot.slane %v3388_v11, 7  ;;  %vm1206_vm5 = vcmp.ge.s32.totalorder %v998_v12, 1  ;;  %v1234_v30 = vsel %vm1230_vm2, %v4384_v20, %v4382_v13  ;;  %v825_v23 = vadd.f32 %v3343_v47, %v798_v18 }
 0x152   : > { %v3446_v38 = vmax.f32 %v833_v10, 0.0  ;;  %v4379_v39 = vrot.slane %v3394_v14, 7  ;;  %v3449_v40 = vmax.f32 %v838_v19, 0.0  ;;  %v1509_v41 = vadd.f32 %v1493_v22, %v1453_v21 }
 0x153   : > { %v1533_v42 = vmul.f32 %v3439_v37, %v3423_v25  ;;  %v4380_v45 = vrot.slane %v3394_v14, 1  ;;  %v3455_v46 = vsel %vm1206_vm5, %v1234_v30, 0.0  ;;  %v826_v49 = vadd.f32 %v3343_v47, %v799_v26  ;;  %v3506_v26 = vld [vmem:[%s4424_s18 + $0x4] ss:$0 sm:$0xff] }
 0x154   : > { %4427 = vst [vmem:[#allocation28_spill] sm:$0xff] %v3455_v46  ;;  %v1247_v50 = vsel %vm1230_vm2, %v4379_v39, %v1213_v28  ;;  %v4378_v51 = vrot.slane %v3449_v40, 1  ;;  %v800_v52 = vmul.f32 %v3336_v43, %v3304_v29  ;;  %v866_v53 = vadd.s32 32, %v3345_v48 }
 0x155   : > { %v3473_v58 = vadd.s32 144, %v3345_v48  ;;  %v3475_v60 = vmax.f32 %v825_v23, 0.0  ;;  %v865_v61 = vadd.s32 24, %v3345_v48  ;;  %v4386_v63 = vrot.slane %v3366_v1, 1 }
 0x156   : > { %v1549_v0 = vadd.f32 %v1533_v42, %v1509_v41  ;;  %v1573_v29 = vmul.f32 %v3469_v56, %v3455_v46  ;;  %v1334_v2 = vrot.slane %v3388_v11, 1  ;;  %v1442_v3 = vmul.f32 %v3382_v7, %v1247_v50 }
 0x157   : > { %v3485_v4 = vmul.f32 %v3402_v16, %v3394_v14  ;;  %v3488_v10 = vmax.f32 %v826_v49, 0.0  ;;  %v3497_v18 = vsel %vm1351_vm4, %v4386_v63, %v4378_v51  ;;  %v827_v19 = vadd.f32 %v3343_v47, %v800_v52 }
 0x158   : > { %4428 = vst [vmem:[#allocation29_spill] sm:$0xff] %v3497_v18  ;;  %v914_v21 = vand.u32 15, %v866_v53  ;;  %v3501_v22 = vmul.f32 %v3469_v56, %v1247_v50  ;;  %v907_v30 = vand.u32 15, %v865_v61  ;;  %v1214_v23 = vrot.slane %v3475_v60, 7  ;;  %v3516_v50 = vld [vmem:[%s4424_s18 + $0x5] ss:$0 sm:$0xff] }
 0x159   : > { %v1335_v41 = vrot.slane %v3475_v60, 1  ;;  %v1589_v49 = vadd.f32 %v1573_v29, %v1549_v0  ;;  %v1613_v52 = vmul.f32 %v3506_v26, %v3366_v1  ;;  %v1368_v53 = vsel %vm1351_vm4, %v4380_v45, %v1334_v2 }
 0x15a   : > { %4429 = vst [vmem:[#allocation30_spill] sm:$0xff] %v3501_v22  ;;  %v3524_v61 = vmul.f32 %v3506_v26, %v3388_v11  ;;  %v1653_v0 = vmul.f32 %v3516_v50, %v3497_v18  ;;  %v1336_v29 = vrot.slane %v3488_v10, 1  ;;  %v801_v17 = vmul.f32 %v3302_v27, %v3336_v43 }
 0x15b   : > { %v3531_v51 = vmax.f32 %v827_v19, 0.0  ;;  %vm1194_vm6 = vcmp.ge.s32.totalorder %v914_v21, 1  ;;  %v867_v39 = vadd.s32 40, %v3345_v48  ;;  %v868_v42 = vadd.s32 48, %v3345_v48 }
 0x15c   : > { %4430 = vst [vmem:[#allocation31_spill] sm:$0xff] %v3524_v61  ;;  %v1246_v45 = vsel %vm1230_vm2, %v1213_v28, %v1214_v23  ;;  %vm1314_vm7 = vcmp.le.s32.totalorder %v907_v30, 14  ;;  %v1367_v6 = vsel %vm1351_vm4, %v1334_v2, %v1335_v41  ;;  %v3540_v62 = vmul.f32 %v3439_v37, %v1368_v53 }
 0x15d   : > { %v1629_v13 = vadd.f32 %v1613_v52, %v1589_v49  ;;  %v1337_v27 = vrot.slane %v3531_v51, 1  ;;  %v1483_v19 = vmul.f32 %v3402_v16, %v3475_v60  ;;  %v802_v21 = vmul.f32 %v3336_v43, %v3308_v32 }
 0x15e   : > { %v1366_v12 = vsel %vm1351_vm4, %v1335_v41, %v1336_v29  ;;  %v3551_v28 = vmul.f32 %v3506_v26, %v3394_v14  ;;  %v3554_v2 = vmul.f32 %v3516_v50, %v1368_v53  ;;  %v828_v30 = vadd.f32 %v3343_v47, %v801_v17 }
 0x15f   : > { %v1295_v49 = vsel %vm1194_vm6, %v1246_v45, 0.0  ;;  %v1415_v52 = vsel %vm1314_vm7, %v1367_v6, 0.0  ;;  %v921_v57 = vand.u32 15, %v867_v39  ;;  %v1482_v35 = vmul.f32 %v3402_v16, %v3388_v11  ;;  %v3571_v11 = vld [vmem:[%s4424_s18 + $0x6] ss:$0 sm:$0xff] }
 0x160   : > { %4431 = vst [vmem:[#allocation32_spill] sm:$0xff] %v3551_v28  ;;  %4432 = vst [vmem:[#allocation33_spill] sm:$0xff] %v3554_v2  ;;  %v1443_v32 = vmul.f32 %v3382_v7, %v1295_v49  ;;  %v1215_v44 = vrot.slane %v3488_v10, 7  ;;  %v928_v41 = vand.u32 15, %v868_v42  ;;  %v1216_v59 = vrot.slane %v3531_v51, 7 }
 0x161   : > { %v3562_v20 = vadd.f32 %v1653_v0, %v1629_v13  ;;  %v1365_v53 = vsel %vm1351_vm4, %v1336_v29, %v1337_v27  ;;  %v1523_v17 = vmul.f32 %v3439_v37, %v1366_v12  ;;  %v829_v45 = vadd.f32 %v3343_v47, %v802_v21  ;;  %v3587_v0 = vld [vmem:[%s4424_s18 + $0x7] ss:$0 sm:$0xff] }
 0x162   : > { %v3574_v39 = vmul.f32 %v3469_v56, %v1295_v49  ;;  %v3577_v6 = vmul.f32 %v3516_v50, %v1415_v52  ;;  %v3580_v13 = vmul.f32 %v3516_v50, %v1366_v12  ;;  %v3582_v42 = vmax.f32 %v828_v30, 0.0  ;;  %v3600_v30 = vld [vmem:[%s4424_s18 + $0x8] ss:$0 sm:$0xff] }
 0x163   : > { %4433 = vst [vmem:[#allocation34_spill] sm:$0xff] %v3562_v20  ;;  %v3590_v29 = vmul.f32 %v3571_v11, %v1295_v49  ;;  %vm1316_vm8 = vcmp.le.s32.totalorder %v921_v57, 14  ;;  %v1498_v21 = vadd.f32 %v1482_v35, %v1442_v3  ;;  %v1522_v36 = vmul.f32 %v3439_v37, %v1415_v52 }
 0x164   : > { %4434 = vst [vmem:[#allocation35_spill] sm:$0xff] %v3574_v39  ;;  %4435 = vst [vmem:[#allocation36_spill] sm:$0xff] %v3577_v6  ;;  %v1499_v9 = vadd.f32 %v1483_v19, %v1443_v32  ;;  %v3595_v63 = vmul.f32 %v3587_v0, %v3475_v60  ;;  %vm1196_vm9 = vcmp.ge.s32.totalorder %v928_v41, 1  ;;  %v1244_v18 = vsel %vm1230_vm2, %v1215_v44, %v1216_v59 }
 0x165   : > { %4436 = vst [vmem:[#allocation37_spill] sm:$0xff] %v3580_v13  ;;  %4437 = vst [vmem:[#allocation38_spill] sm:$0xff] %v3590_v29  ;;  %v3605_v49 = vmul.f32 %v3600_v30, %v1366_v12  ;;  %v3609_v35 = vmul.f32 %v3587_v0, %v3488_v10  ;;  %v3611_v57 = vmax.f32 %v829_v45, 0.0  ;;  %v869_v3 = vadd.s32 56, %v3345_v48 }
 0x166   : > { %4438 = vst [vmem:[#allocation39_spill] sm:$0xff] %v3595_v63  ;;  %v1245_v19 = vsel %vm1230_vm2, %v1214_v23, %v1215_v44  ;;  %v1417_v52 = vsel %vm1316_vm8, %v1365_v53, 0.0  ;;  %v1338_v32 = vrot.slane %v3582_v42, 1  ;;  %v1217_v41 = vrot.slane %v3582_v42, 7 }
 0x167   : > { %4439 = vst [vmem:[#allocation40_spill] sm:$0xff] %v3605_v49  ;;  %4440 = vst [vmem:[#allocation41_spill] sm:$0xff] %v3609_v35  ;;  %v1297_v46 = vsel %vm1196_vm9, %v1244_v18, 0.0  ;;  %v1538_v25 = vadd.f32 %v1522_v36, %v1498_v21  ;;  %v1562_v12 = vmul.f32 %v3469_v56, %v1245_v19  ;;  %v870_v49 = vadd.s32 64, %v3345_v48 }
 0x168   : > { %v1539_v63 = vadd.f32 %v1523_v17, %v1499_v9  ;;  %v1445_v45 = vmul.f32 %v3382_v7, %v1297_v46  ;;  %v1485_v35 = vmul.f32 %v3402_v16, %v3531_v51  ;;  %v803_v44 = vmul.f32 %v3306_v31, %v3336_v43 }
 0x169   : > { %v3626_v23 = vmul.f32 %v3571_v11, %v1245_v19  ;;  %v3630_v18 = vmul.f32 %v3506_v26, %v3475_v60  ;;  %v935_v36 = vand.u32 15, %v869_v3  ;;  %v1339_v53 = vrot.slane %v3611_v57, 1 }
 0x16a   : > { %v3634_v9 = vmul.f32 %v3600_v30, %v1417_v52  ;;  %v1364_v17 = vsel %vm1351_vm4, %v1337_v27, %v1338_v32  ;;  %v1563_v21 = vmul.f32 %v3469_v56, %v1297_v46  ;;  %v1243_v31 = vsel %vm1230_vm2, %v1216_v59, %v1217_v41 }
 0x16b   : > { %4441 = vst [vmem:[#allocation42_spill] sm:$0xff] %v3626_v23  ;;  %4442 = vst [vmem:[#allocation43_spill] sm:$0xff] %v3630_v18  ;;  %v1578_v8 = vadd.f32 %v1562_v12, %v1538_v25  ;;  %v1602_v29 = vmul.f32 %v3506_v26, %v3488_v10  ;;  %v942_v60 = vand.u32 15, %v870_v49  ;;  %v1218_v3 = vrot.slane %v3611_v57, 7 }
 0x16c   : > { %4443 = vst [vmem:[#allocation44_spill] sm:$0xff] %v3634_v9  ;;  %v1501_v2 = vadd.f32 %v1485_v35, %v1445_v45  ;;  %v3645_v23 = vmul.f32 %v3571_v11, %v1297_v46  ;;  %v3649_v9 = vmul.f32 %v3587_v0, %v3531_v51  ;;  %v830_v27 = vadd.f32 %v3343_v47, %v803_v44 }
 0x16d   : > { %v1525_v28 = vmul.f32 %v3439_v37, %v1364_v17  ;;  %vm1318_vm10 = vcmp.le.s32.totalorder %v935_v36, 14  ;;  %v1363_v59 = vsel %vm1351_vm4, %v1338_v32, %v1339_v53  ;;  %v804_v25 = vmul.f32 %v3336_v43, %v3312_v34 }
 0x16e   : > { %4444 = vst [vmem:[#allocation45_spill] sm:$0xff] %v3645_v23  ;;  %4445 = vst [vmem:[#allocation46_spill] sm:$0xff] %v3649_v9  ;;  %v1643_v49 = vmul.f32 %v3516_v50, %v1364_v17  ;;  %v3659_v46 = vmul.f32 %v3600_v30, %v1364_v17  ;;  %v1446_v35 = vmul.f32 %v3382_v7, %v1243_v31  ;;  %vm1198_vm11 = vcmp.ge.s32.totalorder %v942_v60, 1 }
 0x16f   : > { %v1486_v12 = vmul.f32 %v3402_v16, %v3582_v42  ;;  %v1618_v45 = vadd.f32 %v1602_v29, %v1578_v8  ;;  %v1642_v44 = vmul.f32 %v3516_v50, %v1417_v52  ;;  %v1242_v32 = vsel %vm1230_vm2, %v1217_v41, %v1218_v3 }
 0x170   : > { %4446 = vst [vmem:[#allocation47_spill] sm:$0xff] %v3659_v46  ;;  %v1419_v36 = vsel %vm1318_vm10, %v1363_v59, 0.0  ;;  %v3667_v9 = vmax.f32 %v830_v27, 0.0  ;;  %v1444_v34 = vmul.f32 %v3382_v7, %v1245_v19  ;;  %v1484_v17 = vmul.f32 %v3402_v16, %v3488_v10 }
 0x171   : > { %v1541_v46 = vadd.f32 %v1525_v28, %v1501_v2  ;;  %v1579_v23 = vadd.f32 %v1563_v21, %v1539_v63  ;;  %v1603_v13 = vmul.f32 %v3506_v26, %v3531_v51  ;;  %v831_v8 = vadd.f32 %v3343_v47, %v804_v25 }
 0x172   : > { %v1564_v29 = vmul.f32 %v3469_v56, %v1243_v31  ;;  %v1682_v60 = vmul.f32 %v3571_v11, %v1243_v31  ;;  %v1299_v41 = vsel %vm1198_vm11, %v1242_v32, 0.0  ;;  %v805_v27 = vmul.f32 %v3310_v33, %v3336_v43 }
 0x173   : > { %v1502_v59 = vadd.f32 %v1486_v12, %v1446_v35  ;;  %v1526_v19 = vmul.f32 %v3439_v37, %v1419_v36  ;;  %v1658_v6 = vadd.f32 %v1642_v44, %v1618_v45  ;;  %v1722_v63 = vmul.f32 %v3587_v0, %v3582_v42 }
 0x174   : > { %v1340_v10 = vrot.slane %v3667_v9, 1  ;;  %v1487_v51 = vmul.f32 %v3402_v16, %v3611_v57  ;;  %v1500_v28 = vadd.f32 %v1484_v17, %v1444_v34  ;;  %v1524_v2 = vmul.f32 %v3439_v37, %v1417_v52 }
 0x175   : > { %v1447_v21 = vmul.f32 %v3382_v7, %v1299_v41  ;;  %v1619_v31 = vadd.f32 %v1603_v13, %v1579_v23  ;;  %v3687_v25 = vmax.f32 %v831_v8, 0.0  ;;  %v871_v33 = vadd.s32 72, %v3345_v48 }
 0x176   : > { %v1644_v35 = vmul.f32 %v3516_v50, %v1419_v36  ;;  %v1219_v12 = vrot.slane %v3667_v9, 7  ;;  %v832_v45 = vadd.f32 %v3343_v47, %v805_v27  ;;  %v872_v44 = vadd.s32 80, %v3345_v48 }
 0x177   : > { %v3694_v32 = vadd.f32 %v1526_v19, %v1502_v59  ;;  %v1698_v34 = vadd.f32 %v1682_v60, %v1658_v6  ;;  %v1762_v52 = vmul.f32 %v3600_v30, %v1419_v36  ;;  %v1723_v13 = vmul.f32 %v3587_v0, %v3611_v57 }
 0x178   : > { %v1362_v23 = vsel %vm1351_vm4, %v1339_v53, %v1340_v10  ;;  %v1565_v17 = vmul.f32 %v3469_v56, %v1299_v41  ;;  %v1683_v8 = vmul.f32 %v3571_v11, %v1299_v41  ;;  %v1540_v20 = vadd.f32 %v1524_v2, %v1500_v28 }
 0x179   : > { %v1503_v18 = vadd.f32 %v1487_v51, %v1447_v21  ;;  %v1659_v27 = vadd.f32 %v1643_v49, %v1619_v31  ;;  %v949_v61 = vand.u32 15, %v871_v33  ;;  %v1341_v59 = vrot.slane %v3687_v25, 1 }
 0x17a   : > { %v1241_v6 = vsel %vm1230_vm2, %v1218_v3, %v1219_v12  ;;  %v3706_v36 = vmax.f32 %v832_v45, 0.0  ;;  %v956_v60 = vand.u32 15, %v872_v44  ;;  %v1220_v19 = vrot.slane %v3687_v25, 7 }
 0x17b   : > { %v1738_v39 = vadd.f32 %v1722_v63, %v1698_v34  ;;  %v1527_v53 = vmul.f32 %v3439_v37, %v1362_v23  ;;  %v1645_v22 = vmul.f32 %v3516_v50, %v1362_v23  ;;  %v873_v41 = vadd.s32 88, %v3345_v48 }
 0x17c   : > { %v1580_v51 = vadd.f32 %v1564_v29, %v1540_v20  ;;  %v1604_v49 = vmul.f32 %v3506_v26, %v3582_v42  ;;  %v1581_v28 = vadd.f32 %v1565_v17, %v1541_v46  ;;  %v1605_v3 = vmul.f32 %v3506_v26, %v3611_v57 }
 0x17d   : > { %v1699_v2 = vadd.f32 %v1683_v8, %v1659_v27  ;;  %vm1320_vm12 = vcmp.le.s32.totalorder %v949_v61, 14  ;;  %v1361_v21 = vsel %vm1351_vm4, %v1340_v10, %v1341_v59  ;;  %v1448_v63 = vmul.f32 %v3382_v7, %v1241_v6 }
 0x17e   : > { %v1488_v31 = vmul.f32 %v3402_v16, %v3667_v9  ;;  %vm1200_vm13 = vcmp.ge.s32.totalorder %v956_v60, 1  ;;  %v1240_v20 = vsel %vm1230_vm2, %v1219_v12, %v1220_v19  ;;  %v1221_v42 = vrot.slane %v3706_v36, 7 }
 0x17f   : > { %v1763_v46 = vmul.f32 %v3600_v30, %v1362_v23  ;;  %v1342_v57 = vrot.slane %v3706_v36, 1  ;;  %v963_v29 = vand.u32 15, %v873_v41  ;;  %v4393_v61 = vrot.slane %v3446_v38, 1 }
 0x180   : > { %v3727_v33 = vadd.f32 %v1762_v52, %v1738_v39  ;;  %v1421_v10 = vsel %vm1320_vm12, %v1361_v21, 0.0  ;;  %v1620_v45 = vadd.f32 %v1604_v49, %v1580_v51  ;;  %v1621_v44 = vadd.f32 %v1605_v3, %v1581_v28 }
 0x181   : > { %v3729_v34 = vadd.f32 %v1527_v53, %v1503_v18  ;;  %v1739_v17 = vadd.f32 %v1723_v13, %v1699_v2  ;;  %v1301_v8 = vsel %vm1200_vm13, %v1240_v20, 0.0  ;;  %v877_v12 = vadd.s32 120, %v3345_v48 }
 0x182   : > { %4447 = vst [vmem:[#allocation48_spill] sm:$0xff] %v3727_v33  ;;  %v1504_v27 = vadd.f32 %v1488_v31, %v1448_v63  ;;  %v1566_v60 = vmul.f32 %v3469_v56, %v1241_v6  ;;  %v1684_v23 = vmul.f32 %v3571_v11, %v1241_v6  ;;  %v1239_v39 = vsel %vm1230_vm2, %v1220_v19, %v1221_v42 }
 0x183   : > { %v1528_v52 = vmul.f32 %v3439_v37, %v1421_v10  ;;  %v1489_v18 = vmul.f32 %v3402_v16, %v3687_v25  ;;  %vm1322_vm14 = vcmp.le.s32.totalorder %v963_v29, 14  ;;  %v1359_v13 = vsel %vm1351_vm4, %v1342_v57, %v4393_v61 }
 0x184   : > { %v1660_v53 = vadd.f32 %v1644_v35, %v1620_v45  ;;  %v1449_v41 = vmul.f32 %v3382_v7, %v1301_v8  ;;  %v1661_v6 = vadd.f32 %v1645_v22, %v1621_v44  ;;  %v1685_v51 = vmul.f32 %v3571_v11, %v1301_v8 }
 0x185   : > { %v1360_v19 = vsel %vm1351_vm4, %v1341_v59, %v1342_v57  ;;  %v1450_v49 = vmul.f32 %v3382_v7, %v1239_v39  ;;  %v1490_v28 = vmul.f32 %v3402_v16, %v3706_v36  ;;  %v991_v3 = vand.u32 15, %v877_v12 }
 0x186   : > { %v3752_v2 = vadd.f32 %v1763_v46, %v1739_v17  ;;  %v3755_v21 = vmul.f32 %v3516_v50, %v1421_v10  ;;  %v1724_v22 = vmul.f32 %v3587_v0, %v3667_v9  ;;  %v3759_v35 = vsel %vm1322_vm14, %v1359_v13, 0.0 }
 0x187   : > { %4449 = vst [vmem:[#allocation50_spill] sm:$0xff] %v3759_v35  ;;  %v3761_v63 = vadd.f32 %v1528_v52, %v1504_v27  ;;  %v3764_v59 = vmul.f32 %v3600_v30, %v1421_v10  ;;  %v1567_v31 = vmul.f32 %v3469_v56, %v1301_v8  ;;  %v1725_v20 = vmul.f32 %v3587_v0, %v3687_v25 }
 0x188   : > { %4448 = vst [vmem:[#allocation49_spill] sm:$0xff] %v3752_v2  ;;  %v1700_v46 = vadd.f32 %v1684_v23, %v1660_v53  ;;  %v1505_v57 = vadd.f32 %v1489_v18, %v1449_v41  ;;  %v1529_v29 = vmul.f32 %v3439_v37, %v1360_v19  ;;  %v1701_v45 = vadd.f32 %v1685_v51, %v1661_v6 }
 0x189   : > { %4450 = vst [vmem:[#allocation51_spill] sm:$0xff] %v3764_v59  ;;  %v1506_v44 = vadd.f32 %v1490_v28, %v1450_v49  ;;  %v1530_v17 = vmul.f32 %v3439_v37, %v3759_v35  ;;  %vm1326_vm15 = vcmp.le.s32.totalorder %v991_v3, 14  ;;  %v4451_v12 = vrot.slane %v3366_v1, 1 }
 0x18a   : > { %v4452_v10 = vrot.slane %v3376_v5, 1  ;;  %v4453_v27 = vstv %s3390_s20  ;;  %v1582_v23 = vadd.f32 %v1566_v60, %v3694_v32  ;;  %v1606_v18 = vmul.f32 %v3506_v26, %v3667_v9  ;;  %s2595_s20 = sshll.u32 %s3002_s24, 4 }
 0x18b   : > { %vm3780_vm3 = vcmp.eq.s32.totalorder %v4453_v27, 1  ;;  %v874_v13 = vadd.s32 96, %v3345_v48  ;;  %v4456_v53 = vrot.slane %v3376_v5, 7  ;;  %v4457_v41 = vrot.slane %v3354_v55, 7  ;;  %s2373_s24 = sadd.s32 %s2595_s20, %s2588_s7 }
 0x18c   : > { %v1355_v8 = vsel %vm1351_vm4, %v4452_v10, %v4451_v12  ;;  %v3797_v51 = vmul.f32 %v3516_v50, %v1360_v19  ;;  %v3800_v49 = vmul.f32 %v3600_v30, %v1360_v19  ;;  %v1494_v9 = vmul.f32 %v3402_v16, %v3376_v5 }
 0x18d   : > { %v3794_v6 = vsel %vm1230_vm2, %v4457_v41, %v4456_v53  ;;  %v3806_v60 = vadd.f32 %v1724_v22, %v1700_v46  ;;  %v3808_v28 = vadd.f32 %v1529_v29, %v1505_v57  ;;  %v3811_v3 = vmul.f32 %v3469_v56, %v1239_v39 }
 0x18e   : > { %4458 = vst [vmem:[#allocation52_spill] sm:$0xff] %v3800_v49  ;;  %v1454_v32 = vmul.f32 %v3382_v7, %v3794_v6  ;;  %v3813_v12 = vsel %vm1326_vm15, %v1355_v8, 0.0  ;;  %v3815_v10 = vadd.f32 %v1725_v20, %v1701_v45  ;;  %v3817_v27 = vadd.f32 %v1530_v17, %v1506_v44 }
 0x18f   : > { %4459 = vst [vmem:[#allocation53_spill] sm:$0xff] %v3806_v60  ;;  %4460 = vst [vmem:[#allocation54_spill] sm:$0xff] %v3813_v12  ;;  %v3821_v19 = vmul.f32 %v3516_v50, %v3759_v35  ;;  %v3824_v53 = vmul.f32 %v3571_v11, %v1239_v39  ;;  %v4463_v46 = vand.u32 15, %v3415_v24  ;;  %v4466_v20 = vand.u32 15, %v3397_v15 }
 0x190   : > { %4461 = vst [vmem:[#allocation55_spill] sm:$0xff] %v3815_v10  ;;  %v3838_v45 = vadd.f32 %v1606_v18, %v1582_v23  ;;  %v970_v44 = vand.u32 15, %v874_v13  ;;  %v1222_v17 = vrot.slane %v3446_v38, 7  ;;  %v3845_v41 = vmul.f32 %v3402_v16, %v3446_v38 }
 0x191   : > { %4462 = vst [vmem:[#allocation56_spill] sm:$0xff] %v3821_v19  ;;  %vm3828_vm5 = vcmp.ge.s32.totalorder %v4463_v46, 1  ;;  %vm3834_vm6 = vcmp.le.s32.totalorder %v4466_v20, 14  ;;  %v1510_v46 = vadd.f32 %v1494_v9, %v1454_v32  ;;  %v1534_v15 = vmul.f32 %v3439_v37, %v3813_v12 }
 0x192   : > { %v4469_v23 = vstv %s3443_s29  ;;  %v1583_v13 = vadd.f32 %v1567_v31, %v3729_v34  ;;  %v4472_v61 = vrot.slane %v3449_v40, 7  ;;  %v4473_v39 = vrot.slane %v3366_v1, 7  ;;  %s4530_s29 = sld [smem:[#allocation62_spill]] }
 0x193   : > { %vm3852_vm7 = vcmp.eq.s32.totalorder %v4469_v23, 1  ;;  %v4475_v34 = vrot.slane %v3352_v54, 1  ;;  %v4476_v31 = vrot.slane %v3446_v38, 1  ;;  %v879_v23 = vadd.s32 136, %v3345_v48 }
 0x194   : > { %v3865_v32 = vsel %vm1230_vm2, %v4473_v39, %v4472_v61  ;;  %vm1202_vm8 = vcmp.ge.s32.totalorder %v970_v44, 1  ;;  %v4477_v1 = vrot.slane %v3352_v54, 7  ;;  %v4485_v52 = vrot.slane %v3394_v14, 1 }
 0x195   : > { %4474 = vst [vmem:[#allocation57_spill] sm:$0xff] %v3865_v32  ;;  %vm1792_vm13 = vcmask 31744  }
 0x21c   : > { %v2688_v22 = vpop.f32.mrb[6].mxu1 }
 0x21d   : > { %v795_v8 = vmul.f32 %v2688_v22, %v3336_v43  ;;  %v768_v24 = vpop.f32.mrb[7].mxu1  ;;  %v1607_v22 = vmul.f32 %v3506_v26, %v3687_v25  ;;  %v3878_v25 = vsel %vm1351_vm4, %v4476_v31, %v4475_v34  ;;  %v1550_v34 = vadd.f32 %v1534_v15, %v1510_v46 }
 0x21e   : > { %v794_v20 = vmul.f32 %v3336_v43, %v768_v24  ;;  %v1238_v24 = vsel %vm1230_vm2, %v1221_v42, %v1222_v17  ;;  %v3887_v42 = vsel %vm1230_vm2, %v1222_v17, %v4477_v1  ;;  %v1574_v31 = vmul.f32 %v3469_v56, %v3865_v32 }
 0x21f   : > { %v822_v9 = vadd.f32 %v3343_v47, %v795_v8  ;;  %v875_v8 = vadd.s32 104, %v3345_v48  ;;  %v3901_v1 = vmul.f32 %v3439_v37, %v3878_v25  ;;  %v3903_v17 = vadd.f32 %v1607_v22, %v1583_v13 }
 0x220   : > { %v821_v61 = vadd.f32 %v3343_v47, %v794_v20  ;;  %v2691_v39 = vpop.f32.mrb[8].mxu1  ;;  %v4478_v20 = vand.u32 15, %v3345_v48  ;;  %v881_v13 = vadd.s32 152, %v3345_v48 }
 0x221   : > { %v842_v12 = vmax.f32 %v822_v9, 0.0  ;;  %v813_v2 = vmul.f32 %v2691_v39, %v3336_v43  ;;  %v778_v33 = vpop.f32.mrb[9].mxu1  ;;  %v3908_v9 = vsel %vm1202_vm8, %v1238_v24, 0.0  ;;  %v4484_v24 = vrot.slane %v3394_v14, 7 }
 0x222   : > { %v841_v35 = vmax.f32 %v821_v61, 0.0  ;;  %vm3894_vm9 = vcmp.ge.s32.totalorder %v4478_v20, 1  ;;  %v812_v5 = vmul.f32 %v3336_v43, %v778_v33  ;;  %v1005_v61 = vand.u32 15, %v879_v23 }
 0x223   : > { %v1171_v46 = vsel %vm3780_vm3, %v842_v12, 0.0  ;;  %v840_v15 = vadd.f32 %v3343_v47, %v813_v2  ;;  %v4481_v43 = vand.u32 15, %v3473_v58  ;;  %v1590_v2 = vadd.f32 %v1574_v31, %v1550_v34 }
 0x224   : > { %v1211_v39 = vrot.slane %v1171_v46, 7  ;;  %v1332_v20 = vrot.slane %v1171_v46, 1  ;;  %v1170_v32 = vsel %vm3780_vm3, %v841_v35, 0.0  ;;  %v839_v35 = vadd.f32 %v3343_v47, %v812_v5 }
 0x225   : > { %vm3914_vm10 = vcmp.ge.s32.totalorder %v4481_v43, 1  ;;  %v1210_v22 = vrot.slane %v1170_v32, 7  ;;  %v1331_v12 = vrot.slane %v1170_v32, 1  ;;  %v860_v49 = vmax.f32 %v840_v15, 0.0 }
 0x226   : > { %v1248_v23 = vsel %vm1230_vm2, %v1211_v39, %v4484_v24  ;;  %v1369_v58 = vsel %vm1351_vm4, %v1332_v20, %v4485_v52  ;;  %v1614_v43 = vmul.f32 %v3506_v26, %v3449_v40  ;;  %v1480_v24 = vmul.f32 %v3402_v16, %v1171_v46 }
 0x227   : > { %v1293_v10 = vsel %vm3828_vm5, %v1248_v23, 0.0  ;;  %v1413_v34 = vsel %vm3834_vm6, %v1369_v58, 0.0  ;;  %v1249_v31 = vsel %vm1230_vm2, %v1210_v22, %v1211_v39  ;;  %v1370_v14 = vsel %vm1351_vm4, %v1331_v12, %v1332_v20 }
 0x228   : > { %v1441_v15 = vmul.f32 %v3382_v7, %v1293_v10  ;;  %v1440_v47 = vmul.f32 %v3382_v7, %v1249_v31  ;;  %v977_v5 = vand.u32 15, %v875_v8  ;;  %v1520_v52 = vmul.f32 %v3439_v37, %v1413_v34 }
 0x229   : > { %v1189_v57 = vsel %vm3852_vm7, %v860_v49, 0.0  ;;  %v859_v29 = vmax.f32 %v839_v35, 0.0  ;;  %v1451_v23 = vmul.f32 %v3382_v7, %v3908_v9  ;;  %vm3949_vm11 = vcmp.le.s32.totalorder %v1005_v61, 14 }
 0x22a   : > { %v1497_v39 = vadd.f32 %v3485_v4, %v1441_v15  ;;  %v1496_v58 = vadd.f32 %v1480_v24, %v1440_v47  ;;  %v1229_v20 = vrot.slane %v1189_v57, 7  ;;  %v1350_v59 = vrot.slane %v1189_v57, 1 }
 0x22b   : > { %v1188_v46 = vsel %vm3852_vm7, %v859_v29, 0.0  ;;  %v1019_v8 = vand.u32 15, %v881_v13  ;;  %v1630_v34 = vadd.f32 %v1614_v43, %v1590_v2  ;;  %v1479_v4 = vmul.f32 %v3402_v16, %v1170_v32  ;;  %v4490_v2 = vld [vmem:[#allocation30_spill] sm:$0xff]  ;;  %v4494_v29 = vld [vmem:[#allocation31_spill] sm:$0xff] }
 0x22c   : > { %v1536_v60 = vadd.f32 %v1520_v52, %v1496_v58  ;;  %v1250_v49 = vsel %vm1230_vm2, %v1229_v20, %v1210_v22  ;;  %v1228_v35 = vrot.slane %v1188_v46, 7  ;;  %v1349_v19 = vrot.slane %v1188_v46, 1 }
 0x22d   : > { %v1291_v15 = vsel %vm3894_vm9, %v1250_v49, 0.0  ;;  %v1537_v18 = vadd.f32 %v3540_v62, %v1497_v39  ;;  %vm3959_vm12 = vcmp.le.s32.totalorder %v977_v5, 14  ;;  %v1371_v13 = vsel %vm1351_vm4, %v1350_v59, %v1331_v12  ;;  %v4492_v5 = vld [vmem:[#allocation35_spill] sm:$0xff] }
 0x22e   : > { %v1576_v43 = vadd.f32 %v4490_v2, %v1536_v60  ;;  %v1439_v22 = vmul.f32 %v3382_v7, %v1291_v15  ;;  %v1231_v24 = vsel %vm1230_vm2, %v1228_v35, %v1229_v20  ;;  %v4491_v32 = vrot.slane %v3449_v40, 7 }
 0x22f   : > { %v1519_v62 = vmul.f32 %v3439_v37, %v1370_v14  ;;  %v1577_v52 = vadd.f32 %v4492_v5, %v1537_v18  ;;  %v4493_v12 = vrot.slane %v3449_v40, 1  ;;  %v4495_v14 = vld [vmem:[#allocation43_spill] sm:$0xff]  ;;  %v1352_v15 = vsel %vm1351_vm4, %v1349_v19, %v1350_v59  ;;  %v4506_v18 = vld [vmem:[#allocation45_spill] sm:$0xff] }
 0x230   : > { %v1232_v44 = vsel %vm1230_vm2, %v4491_v32, %v1228_v35  ;;  %v1616_v39 = vadd.f32 %v4494_v29, %v1576_v43  ;;  %v1495_v58 = vadd.f32 %v1479_v4, %v1439_v22  ;;  %vm3992_vm2 = vcmp.le.s32.totalorder %v1019_v8, 14  ;;  %v4498_v43 = vld [vmem:[#allocation34_spill] sm:$0xff] }
 0x231   : > { %v1309_v47 = vsel %vm3914_vm10, %v1232_v44, 0.0  ;;  %v1353_v60 = vsel %vm1351_vm4, %v4493_v12, %v1349_v19  ;;  %v1617_v35 = vadd.f32 %v4495_v14, %v1577_v52  ;;  %v1559_v4 = vmul.f32 %v3469_v56, %v1293_v10  ;;  %v4499_v44 = vld [vmem:[#allocation36_spill] sm:$0xff]  ;;  %v4500_v19 = vld [vmem:[#allocation37_spill] sm:$0xff]  ;;  %v4504_v14 = vld [vmem:[#allocation42_spill] sm:$0xff] }
 0x232   : > { %v1693_v20 = vmul.f32 %v3571_v11, %v1309_v47  ;;  %v3985_v49 = vsel %vm3949_vm11, %v1353_v60, 0.0  ;;  %v1535_v2 = vadd.f32 %v1519_v62, %v1495_v58  ;;  %v1733_v31 = vmul.f32 %v3587_v0, %v1188_v46 }
 0x233   : > { %v1654_v33 = vmul.f32 %v3516_v50, %v3985_v49  ;;  %v1694_v32 = vmul.f32 %v3571_v11, %v1231_v24  ;;  %v1656_v47 = vadd.f32 %v4499_v44, %v1616_v39  ;;  %v1773_v5 = vmul.f32 %v3600_v30, %v1352_v15  ;;  %v4503_v39 = vld [vmem:[#allocation32_spill] sm:$0xff] }
 0x234   : > { %v1709_v22 = vadd.f32 %v1693_v20, %v4498_v43  ;;  %v1575_v59 = vadd.f32 %v1559_v4, %v1535_v2  ;;  %v1657_v8 = vadd.f32 %v4500_v19, %v1617_v35  ;;  %v1431_v60 = vsel %vm3992_vm2, %v1371_v13, 0.0  ;;  %v4510_v19 = vld [vmem:[#allocation39_spill] sm:$0xff] }
 0x235   : > { %v1670_v52 = vadd.f32 %v1654_v33, %v1630_v34  ;;  %v1734_v10 = vmul.f32 %v3587_v0, %v1189_v57  ;;  %v1507_v62 = vadd.f32 %v3845_v41, %v1451_v23  ;;  %v4501_v46 = vrot.slane %v3354_v55, 1  ;;  %v4505_v33 = vld [vmem:[#allocation33_spill] sm:$0xff] }
 0x236   : > { %v1749_v12 = vadd.f32 %v1733_v31, %v1709_v22  ;;  %v4502_v24 = vrot.slane %v3352_v54, 1  ;;  %v1615_v58 = vadd.f32 %v4503_v39, %v1575_v59  ;;  %v1569_v20 = vmul.f32 %v3469_v56, %v3908_v9 }
 0x237   : > { %v1710_v34 = vadd.f32 %v1694_v32, %v1670_v52  ;;  %v1452_v13 = vmul.f32 %v3382_v7, %v3887_v42  ;;  %v1696_v41 = vadd.f32 %v4504_v14, %v1656_v47  ;;  %v1492_v23 = vmul.f32 %v3402_v16, %v3352_v54  ;;  %v4507_v32 = vld [vmem:[#allocation38_spill] sm:$0xff] }
 0x238   : > { %v1357_v29 = vsel %vm1351_vm4, %v4502_v24, %v4501_v46  ;;  %v4018_v57 = vadd.f32 %v1773_v5, %v1749_v12  ;;  %v1774_v48 = vmul.f32 %v3600_v30, %v1431_v60  ;;  %v1655_v15 = vadd.f32 %v4505_v33, %v1615_v58  ;;  %v4508_v5 = vld [vmem:[#allocation26_spill] sm:$0xff]  ;;  %v4509_v12 = vld [vmem:[#allocation41_spill] sm:$0xff] }
 0x239   : > { %v1750_v35 = vadd.f32 %v1734_v10, %v1710_v34  ;;  %v1697_v4 = vadd.f32 %v4506_v18, %v1657_v8  ;;  %v4028_v2 = vsel %vm3959_vm12, %v1357_v29, 0.0  ;;  %v1570_v7 = vmul.f32 %v3469_v56, %v3887_v42  ;;  %v4511_v60 = vld [vmem:[#allocation46_spill] sm:$0xff] }
 0x23a   : > { %v1547_v43 = vadd.f32 %v3901_v1, %v1507_v62  ;;  %v1584_v22 = vadd.f32 %v3811_v3, %v3761_v63  ;;  %v1608_v16 = vmul.f32 %v3506_v26, %v3706_v36  ;;  %v1695_v44 = vadd.f32 %v4507_v32, %v1655_v15  ;;  %v4519_v32 = vld [vmem:[#allocation55_spill] sm:$0xff] }
 0x23b   : > { %v4037_v31 = vadd.f32 %v1774_v48, %v1750_v35  ;;  %v1585_v47 = vadd.f32 %v1569_v20, %v3808_v28  ;;  %v1609_v61 = vmul.f32 %v3506_v26, %v3446_v38  ;;  %v1571_v52 = vmul.f32 %v3469_v56, %v4508_v5 }
 0x23c   : > { %v1736_v1 = vadd.f32 %v4509_v12, %v1696_v41  ;;  %v1662_v63 = vadd.f32 %v3755_v21, %v3838_v45  ;;  %v1508_v3 = vadd.f32 %v1492_v23, %v1452_v13  ;;  %v1532_v59 = vmul.f32 %v3439_v37, %v4028_v2  ;;  %v4512_v37 = vld [vmem:[#allocation40_spill] sm:$0xff] }
 0x23d   : > { %v1735_v8 = vadd.f32 %v4510_v19, %v1695_v44  ;;  %v1737_v10 = vadd.f32 %v4511_v60, %v1697_v4  ;;  %v1663_v28 = vadd.f32 %v3797_v51, %v3903_v17  ;;  %v1687_v62 = vmul.f32 %v3571_v11, %v3908_v9  ;;  %v4513_v51 = vld [vmem:[#allocation44_spill] sm:$0xff] }
 0x23e   : > { %v1649_v46 = vmul.f32 %v3516_v50, %v3878_v25  ;;  %v1624_v24 = vadd.f32 %v1608_v16, %v1584_v22  ;;  %v1586_v21 = vadd.f32 %v1570_v7, %v3817_v27  ;;  %v1610_v45 = vmul.f32 %v3506_v26, %v3352_v54  ;;  %v4514_v27 = vld [vmem:[#allocation47_spill] sm:$0xff]  ;;  %v4520_v44 = vld [vmem:[#allocation52_spill] sm:$0xff] }
 0x23f   : > { %v1775_v29 = vadd.f32 %v4512_v37, %v1735_v8  ;;  %v1625_v34 = vadd.f32 %v1609_v61, %v1585_v47  ;;  %v1587_v39 = vadd.f32 %v1571_v52, %v1547_v43  ;;  %v1611_v58 = vmul.f32 %v3506_v26, %v3354_v55  ;;  %v4516_v7 = vld [vmem:[#allocation27_spill] sm:$0xff]  ;;  %v4517_v43 = vld [vmem:[#allocation53_spill] sm:$0xff] }
 0x240   : > { %v1776_v17 = vadd.f32 %v4513_v51, %v1736_v1  ;;  %v1726_v9 = vmul.f32 %v3587_v0, %v3706_v36  ;;  %v1548_v20 = vadd.f32 %v1532_v59, %v1508_v3  ;;  %v1572_v13 = vmul.f32 %v3469_v56, %v3794_v6  ;;  %v4515_v36 = vld [vmem:[#allocation56_spill] sm:$0xff]  ;;  %v4518_v22 = vld [vmem:[#allocation51_spill] sm:$0xff]  ;;  %v4521_v52 = vld [vmem:[#allocation25_spill] sm:$0xff] }
 0x241   : > { %2694 = vmatprep.mubr.msk.f32.mxu1 %vm1792_vm13, %v1775_v29  ;;  %v1777_v14 = vadd.f32 %v4514_v27, %v1737_v10  ;;  %v1702_v41 = vadd.f32 %v3824_v53, %v1662_v63  ;;  %v1703_v23 = vadd.f32 %v1687_v62, %v1663_v28  ;;  %v1727_v35 = vmul.f32 %v3587_v0, %v3446_v38  ;;  %v4522_v1 = vld [vmem:[#allocation50_spill] sm:$0xff]  ;;  %v4523_v59 = vld [vmem:[#allocation48_spill] sm:$0xff] }
 0x242   : > { %2695 = vmatmul.mubr.msk.f32.vlgmr.msra.gmra.mrb[10].mxu1 %vm1792_vm13, %v1776_v17  ;;  %v1650_v48 = vmul.f32 %v3516_v50, %v4028_v2  ;;  %v1664_v33 = vadd.f32 %v4515_v36, %v1624_v24  ;;  %v1688_v56 = vmul.f32 %v3571_v11, %v3887_v42  ;;  %v1626_v15 = vadd.f32 %v1610_v45, %v1586_v21  ;;  %v4526_v21 = vld [vmem:[#allocation54_spill] sm:$0xff]  ;;  %v4527_v17 = vld [vmem:[#allocation24_spill] sm:$0xff] }
 0x243   : > { %2697 = vmatprep.mubr.msk.f32.mxu1 %vm1792_vm13, %v1777_v14  ;;  %v1665_v18 = vadd.f32 %v1649_v46, %v1625_v34  ;;  %v1689_v53 = vmul.f32 %v3571_v11, %v4508_v5  ;;  %v1627_v4 = vadd.f32 %v1611_v58, %v1587_v39  ;;  %v1651_v38 = vmul.f32 %v3516_v50, %v4516_v7 }
 0x244   : > { %v1780_v16 = vadd.f32 %v4518_v22, %v4517_v43  ;;  %v1781_v47 = vadd.f32 %v4520_v44, %v4519_v32  ;;  %v1588_v61 = vadd.f32 %v1572_v13, %v1548_v20  ;;  %v1612_v42 = vmul.f32 %v3506_v26, %v4521_v52  ;;  %v4524_v26 = vld [vmem:[#allocation49_spill] sm:$0xff] }
 0x245   : > { %v1742_v12 = vadd.f32 %v1726_v9, %v1702_v41  ;;  %v1766_v63 = vmul.f32 %v3600_v30, %v4522_v1  ;;  %v1743_v3 = vadd.f32 %v1727_v35, %v1703_v23  ;;  %v1767_v5 = vmul.f32 %v3600_v30, %v3878_v25  ;;  %v4525_v25 = vld [vmem:[#allocation28_spill] sm:$0xff] }
 0x246   : > { %2698 = vmatmul.mubr.msk.f32.gmra.mrb[12].mxu1 %vm1792_vm13, %v4523_v59  ;;  %v1704_v19 = vadd.f32 %v1688_v56, %v1664_v33  ;;  %v1728_v8 = vmul.f32 %v3587_v0, %v3352_v54  ;;  %v1666_v60 = vadd.f32 %v1650_v48, %v1626_v15  ;;  %v1690_v10 = vmul.f32 %v3571_v11, %v3794_v6  ;;  %v4529_v48 = vld [vmem:[#allocation29_spill] sm:$0xff] }
 0x247   : > { %2700 = vmatprep.mubr.msk.f32.mxu1 %vm1792_vm13, %v4524_v26  ;;  %v1705_v28 = vadd.f32 %v1689_v53, %v1665_v18  ;;  %v1729_v62 = vmul.f32 %v3587_v0, %v3354_v55  ;;  %v1667_v46 = vadd.f32 %v1651_v38, %v1627_v4  ;;  %v1691_v24 = vmul.f32 %v3571_v11, %v4525_v25 }
 0x248   : > { %v1652_v45 = vmul.f32 %v3516_v50, %v4526_v21  ;;  %v1628_v37 = vadd.f32 %v1612_v42, %v1588_v61  ;;  %v1782_v54 = vadd.f32 %v1766_v63, %v1742_v12  ;;  %v1768_v29 = vmul.f32 %v3600_v30, %v4028_v2  ;;  %v4528_v2 = vld [vmem:[#allocation57_spill] sm:$0xff] }
 0x249   : > { %v1783_v6 = vadd.f32 %v1767_v5, %v1743_v3  ;;  %v1744_v34 = vadd.f32 %v1728_v8, %v1704_v19  ;;  %v1706_v39 = vadd.f32 %v1690_v10, %v1666_v60  ;;  %v1730_v55 = vmul.f32 %v3587_v0, %v4521_v52 }
 0x24a   : > { %2701 = vmatmul.mubr.msk.f32.gmra.mrb[14].mxu1 %vm1792_vm13, %v1780_v16  ;;  %v1745_v58 = vadd.f32 %v1729_v62, %v1705_v28  ;;  %v1769_v51 = vmul.f32 %v3600_v30, %v4516_v7  ;;  %v1707_v50 = vadd.f32 %v1691_v24, %v1667_v46  ;;  %v1731_v9 = vmul.f32 %v3587_v0, %v4527_v17 }
 0x24b   : > { %2703 = vmatprep.mubr.msk.f32.mxu1 %vm1792_vm13, %v1781_v47  ;;  %v1668_v20 = vadd.f32 %v1652_v45, %v1628_v37  ;;  %v1692_v13 = vmul.f32 %v3571_v11, %v4528_v2  ;;  %v1784_v27 = vadd.f32 %v1768_v29, %v1744_v34  ;;  %v1746_v14 = vadd.f32 %v1730_v55, %v1706_v39 }
 0x24c   : > { %v1770_v41 = vmul.f32 %v3600_v30, %v4526_v21  ;;  %v1785_v23 = vadd.f32 %v1769_v51, %v1745_v58  ;;  %v1747_v35 = vadd.f32 %v1731_v9, %v1707_v50  ;;  %v1771_v36 = vmul.f32 %v3600_v30, %v4529_v48 }
 0x24d   : > { %v1708_v33 = vadd.f32 %v1692_v13, %v1668_v20  ;;  %v1732_v56 = vmul.f32 %v3587_v0, %v3449_v40  ;;  %v1772_v53 = vmul.f32 %v3600_v30, %v3985_v49  ;;  %v2052_v40 = vld [vmem:[%s4530_s29] sm:$0xf]  ;;  %s2589_s29 = sshll.u32 %s2373_s24, 7 }
 0x24e   : > { %2704 = vmatmul.mubr.msk.f32.gmra.mrb[16].mxu1 %vm1792_vm13, %v1782_v54  ;;  %v1786_v11 = vadd.f32 %v1770_v41, %v1746_v14  ;;  %v1787_v15 = vadd.f32 %v1771_v36, %v1747_v35  ;;  %2718 = vmatprep.subr.msk.mxu0 %vm1841_vm1, %v2052_v40  ;;  %v4148_v0 = vld [vmem:[%s4531_s0] ss:$0 sm:$0xff]  ;;  %s4297_s0 = scalar_lea.hbm %s4535_s12, %s2589_s29 }
 0x24f   : > { %2706 = vmatprep.mubr.msk.f32.mxu1 %vm1792_vm13, %v1783_v6  ;;  %v1748_v18 = vadd.f32 %v1732_v56, %v1708_v33  ;;  %2719 = vmatpush3.msk.msra.mxu0 %vm1841_vm1, %v2052_v40  ;;  %v4153_v49 = vld [vmem:[%s4532_s5] ss:$0 sm:$0xff]  ;;  %s3025_s5 = smov [#allocation7]  }
 0x250   : > { %s2920_s14 = sshll.u32 %s3025_s5, 4  ;;  %s2921_s14 = int_to_ptr.vmem [resolvable:$false] %s2920_s14 }
 0x251   : > { %v1788_v4 = vadd.f32 %v1772_v53, %v1748_v18  ;;  %s2922_s9 = scalar_lea.vmem %s2921_s14, 4096  ;;  %p2923_p11 = scmp.lt.s32.totalorder %s4292_s25, %s2921_s14 }
 0x252   : > { %2707 = vmatmul.mubr.msk.f32.gmra.mrb[18].mxu1 %vm1792_vm13, %v1784_v27  ;;  %p2924_p13 = scmp.lt.s32.totalorder %s2922_s9, %s2916_s8 }
 0x253   : > { %2709 = vmatprep.mubr.msk.f32.mxu1 %vm1792_vm13, %v1785_v23 }
 0x254   : > { %p2925_p1 = por %p2924_p13, %p2923_p11 }
 0x256   : > { %2710 = vmatmul.mubr.msk.f32.gmra.mrb[20].mxu1 %vm1792_vm13, %v1786_v11  ;;  %p2926_p3 = pnand %p2925_p1, %p2919_p0 }
 0x257   : > { %2712 = vmatprep.mubr.msk.f32.mxu1 %vm1792_vm13, %v1787_v15 }
 0x25a   : > { %2713 = vmatmul.mubr.msk.f32.gmra.mrb[22].mxu1 %vm1792_vm13, %v1788_v4 }
 0x25b   : > { %2715 = vmatprep.mubr.msk.f32.mxu1 %vm1792_vm13, %v4018_v57 }
 0x25e   : > { %2716 = vmatmul.mubr.msk.f32.gmra.mrb[24].mxu1 %vm1792_vm13, %v4037_v31 }
 0x315   : > { %v2696_v30 = vpop.f32.mrb[10].mxu1 }
 0x316   : > { %v1998_v57 = vmul.f32 %v2696_v30, %v4148_v0  ;;  %v1911_v31 = vpop.f32.mrb[11].mxu1 }
 0x317   : > { %v1997_v7 = vmul.f32 %v4148_v0, %v1911_v31 }
 0x318   : > { %v2021_v38 = vadd.f32 %v4153_v49, %v1998_v57 }
 0x319   : > { %v2699_v43 = vpop.f32.mrb[12].mxu1  ;;  %v2020_v22 = vadd.f32 %v4153_v49, %v1997_v7 }
 0x31a   : > { %v2000_v16 = vmul.f32 %v2699_v43, %v4148_v0  ;;  %v1921_v32 = vpop.f32.mrb[13].mxu1  ;;  %v2037_v61 = vmax.f32 %v2021_v38, 0.0  ;;  %v2296_v43 = vld [vmem:[%s3225_s17 + $0x8] sm:$0xff] }
 0x31b   : > { %v1999_v44 = vmul.f32 %v4148_v0, %v1921_v32  ;;  %v2036_v47 = vmax.f32 %v2020_v22, 0.0  ;;  %v2295_v32 = vld [vmem:[%s3225_s17] sm:$0xff] }
 0x31c   : > { %v2023_v52 = vadd.f32 %v4153_v49, %v2000_v16 }
 0x31d   : > { %v2022_v42 = vadd.f32 %v4153_v49, %v1999_v44  ;;  %v2702_v12 = vpop.f32.mrb[14].mxu1  ;;  %2720 = vmatprep.mubr.msk.f32.mxu0 %vm1792_vm13, %v2036_v47 }
 0x31e   : > { %v2002_v1 = vmul.f32 %v2702_v12, %v4148_v0  ;;  %v1931_v63 = vpop.f32.mrb[15].mxu1  ;;  %2721 = vmatmul.mubr.msk.f32.vlgmr.msra.gmra.mrb[10].mxu0 %vm1792_vm13, %v2037_v61  ;;  %v2039_v59 = vmax.f32 %v2023_v52, 0.0 }
 0x31f   : > { %v2038_v3 = vmax.f32 %v2022_v42, 0.0  ;;  %v2001_v5 = vmul.f32 %v4148_v0, %v1931_v63 }
 0x320   : > { %v2025_v19 = vadd.f32 %v4153_v49, %v2002_v1  ;;  %v2298_v1 = vld [vmem:[%s3225_s17 + $0x18] sm:$0xff] }
 0x321   : > { %v2024_v8 = vadd.f32 %v4153_v49, %v2001_v5  ;;  %v2705_v60 = vpop.f32.mrb[16].mxu1  ;;  %2723 = vmatprep.mubr.msk.f32.mxu0 %vm1792_vm13, %v2038_v3 }
 0x322   : > { %v2004_v10 = vmul.f32 %v2705_v60, %v4148_v0  ;;  %v1941_v26 = vpop.f32.mrb[17].mxu1  ;;  %2724 = vmatmul.mubr.msk.f32.gmra.mrb[12].mxu0 %vm1792_vm13, %v2039_v59  ;;  %v2041_v46 = vmax.f32 %v2025_v19, 0.0  ;;  %v2297_v59 = vld [vmem:[%s3225_s17 + $0x10] sm:$0xff] }
 0x323   : > { %v2040_v28 = vmax.f32 %v2024_v8, 0.0  ;;  %v2003_v62 = vmul.f32 %v4148_v0, %v1941_v26 }
 0x324   : > { %v2027_v25 = vadd.f32 %v4153_v49, %v2004_v10 }
 0x325   : > { %v2026_v24 = vadd.f32 %v4153_v49, %v2003_v62  ;;  %v2708_v21 = vpop.f32.mrb[18].mxu1  ;;  %2726 = vmatprep.mubr.msk.f32.mxu0 %vm1792_vm13, %v2040_v28 }
 0x326   : > { %v2006_v45 = vmul.f32 %v2708_v21, %v4148_v0  ;;  %v1951_v37 = vpop.f32.mrb[19].mxu1  ;;  %2727 = vmatmul.mubr.msk.f32.gmra.mrb[14].mxu0 %vm1792_vm13, %v2041_v46  ;;  %v2043_v6 = vmax.f32 %v2027_v25, 0.0  ;;  %v2300_v46 = vld [vmem:[%s3225_s17 + $0x28] sm:$0xff] }
 0x327   : > { %v2042_v54 = vmax.f32 %v2026_v24, 0.0  ;;  %v2005_v29 = vmul.f32 %v4148_v0, %v1951_v37 }
 0x328   : > { %v2029_v34 = vadd.f32 %v4153_v49, %v2006_v45  ;;  %v2299_v45 = vld [vmem:[%s3225_s17 + $0x20] sm:$0xff] }
 0x329   : > { %v2028_v39 = vadd.f32 %v4153_v49, %v2005_v29  ;;  %v2711_v55 = vpop.f32.mrb[20].mxu1  ;;  %2729 = vmatprep.mubr.msk.f32.mxu0 %vm1792_vm13, %v2042_v54 }
 0x32a   : > { %v2008_v58 = vmul.f32 %v2711_v55, %v4148_v0  ;;  %v1961_v51 = vpop.f32.mrb[21].mxu1  ;;  %2730 = vmatmul.mubr.msk.f32.gmra.mrb[16].mxu0 %vm1792_vm13, %v2043_v6  ;;  %v2045_v9 = vmax.f32 %v2029_v34, 0.0 }
 0x32b   : > { %v2044_v50 = vmax.f32 %v2028_v39, 0.0  ;;  %v2007_v17 = vmul.f32 %v4148_v0, %v1961_v51 }
 0x32c   : > { %v2031_v20 = vadd.f32 %v4153_v49, %v2008_v58  ;;  %v2302_v58 = vld [vmem:[%s3225_s17 + $0x38] sm:$0xff] }
 0x32d   : > { %v2030_v2 = vadd.f32 %v4153_v49, %v2007_v17  ;;  %v2714_v13 = vpop.f32.mrb[22].mxu1  ;;  %2732 = vmatprep.mubr.msk.f32.mxu0 %vm1792_vm13, %v2044_v50 }
 0x32e   : > { %v2010_v27 = vmul.f32 %v2714_v13, %v4148_v0  ;;  %v1971_v14 = vpop.f32.mrb[23].mxu1  ;;  %2733 = vmatmul.mubr.msk.f32.gmra.mrb[18].mxu0 %vm1792_vm13, %v2045_v9  ;;  %v2047_v35 = vmax.f32 %v2031_v20, 0.0  ;;  %v2301_v9 = vld [vmem:[%s3225_s17 + $0x30] sm:$0xff] }
 0x32f   : > { %v2046_v41 = vmax.f32 %v2030_v2, 0.0  ;;  %v2009_v23 = vmul.f32 %v4148_v0, %v1971_v14 }
 0x330   : > { %v2033_v48 = vadd.f32 %v4153_v49, %v2010_v27 }
 0x331   : > { %v2032_v36 = vadd.f32 %v4153_v49, %v2009_v23  ;;  %v2717_v33 = vpop.f32.mrb[24].mxu1  ;;  %2735 = vmatprep.mubr.msk.f32.mxu0 %vm1792_vm13, %v2046_v41 }
 0x332   : > { %v2012_v56 = vmul.f32 %v2717_v33, %v4148_v0  ;;  %v1981_v11 = vpop.f32.mrb[25].mxu1  ;;  %2736 = vmatmul.mubr.msk.f32.gmra.mrb[20].mxu0 %vm1792_vm13, %v2047_v35  ;;  %v2049_v53 = vmax.f32 %v2033_v48, 0.0  ;;  %v2304_v35 = vld [vmem:[%s3225_s17 + $0x48] sm:$0xff] }
 0x333   : > { %v2048_v15 = vmax.f32 %v2032_v36, 0.0  ;;  %v2011_v18 = vmul.f32 %v4148_v0, %v1981_v11  ;;  %v4206_v0 = vld [vmem:[%s4533_s15] ss:$0 sm:$0xff] }
 0x334   : > { %v2035_v4 = vadd.f32 %v4153_v49, %v2012_v56  ;;  %v2303_v56 = vld [vmem:[%s3225_s17 + $0x40] sm:$0xff] }
 0x335   : > { %v2034_v40 = vadd.f32 %v4153_v49, %v2011_v18  ;;  %2738 = vmatprep.mubr.msk.f32.mxu0 %vm1792_vm13, %v2048_v15  ;;  %v4211_v49 = vld [vmem:[%s4534_s30] ss:$0 sm:$0xff] }
 0x336   : > { %2739 = vmatmul.mubr.msk.f32.gmra.mrb[22].mxu0 %vm1792_vm13, %v2049_v53  ;;  %v2051_v57 = vmax.f32 %v2035_v4, 0.0 }
 0x337   : > { %v2050_v30 = vmax.f32 %v2034_v40, 0.0 }
 0x339   : > { %2741 = vmatprep.mubr.msk.f32.mxu0 %vm1792_vm13, %v2050_v30 }
 0x33a   : > { %2742 = vmatmul.mubr.msk.f32.gmra.mrb[24].mxu0 %vm1792_vm13, %v2051_v57  ;;  %v2306_v57 = vld [vmem:[%s3225_s17 + $0x58] sm:$0xff] }
 0x3f1   : > { %v2722_v31 = vpop.f32.mrb[10].mxu0 }
 0x3f2   : > { %v2257_v7 = vmul.f32 %v2722_v31, %v4206_v0  ;;  %v2170_v38 = vpop.f32.mrb[11].mxu0 }
 0x3f3   : > { %v2256_v22 = vmul.f32 %v4206_v0, %v2170_v38 }
 0x3f4   : > { %v2280_v16 = vadd.f32 %v4211_v49, %v2257_v7 }
 0x3f5   : > { %v2279_v44 = vadd.f32 %v4211_v49, %v2256_v22  ;;  %v2725_v47 = vpop.f32.mrb[12].mxu0 }
 0x3f6   : > { %v2312_v61 = vadd.f32 %v2296_v43, %v2280_v16  ;;  %v2259_v52 = vmul.f32 %v2725_v47, %v4206_v0  ;;  %v2180_v42 = vpop.f32.mrb[13].mxu0  ;;  %v2305_v43 = vld [vmem:[%s3225_s17 + $0x50] sm:$0xff] }
 0x3f7   : > { %v2311_v12 = vadd.f32 %v2295_v32, %v2279_v44  ;;  %v2258_v63 = vmul.f32 %v4206_v0, %v2180_v42  ;;  %v2308_v42 = vld [vmem:[%s3225_s17 + $0x68] sm:$0xff] }
 0x3f8   : > { %v2328_v3 = vmax.f32 %v2312_v61, 0.0  ;;  %v2282_v5 = vadd.f32 %v4211_v49, %v2259_v52 }
 0x3f9   : > { %v2327_v19 = vmax.f32 %v2311_v12, 0.0  ;;  %v2281_v8 = vadd.f32 %v4211_v49, %v2258_v63  ;;  %v2728_v60 = vpop.f32.mrb[14].mxu0 }
 0x3fa   : > { %2344 = vst.msk [vmem:[%s3316_s16 + $0x8] sm:$0xff] %vm485_vm0, %v2328_v3  ;;  %v2314_v10 = vadd.f32 %v2298_v1, %v2282_v5  ;;  %v2261_v26 = vmul.f32 %v2728_v60, %v4206_v0  ;;  %v2190_v28 = vpop.f32.mrb[15].mxu0  ;;  %v2307_v3 = vld [vmem:[%s3225_s17 + $0x60] sm:$0xff] }
 0x3fb   : > { %2343 = vst.msk [vmem:[%s3316_s16] sm:$0xff] %vm485_vm0, %v2327_v19  ;;  %v2313_v62 = vadd.f32 %v2297_v59, %v2281_v8  ;;  %v2260_v25 = vmul.f32 %v4206_v0, %v2190_v28  ;;  %v2310_v28 = vld [vmem:[%s3225_s17 + $0x78] sm:$0xff] }
 0x3fc   : > { %v2330_v24 = vmax.f32 %v2314_v10, 0.0  ;;  %v2284_v21 = vadd.f32 %v4211_v49, %v2261_v26 }
 0x3fd   : > { %v2329_v37 = vmax.f32 %v2313_v62, 0.0  ;;  %v2283_v54 = vadd.f32 %v4211_v49, %v2260_v25  ;;  %v2731_v29 = vpop.f32.mrb[16].mxu0 }
 0x3fe   : > { %2346 = vst.msk [vmem:[%s3316_s16 + $0x18] sm:$0xff] %vm485_vm0, %v2330_v24  ;;  %v2316_v6 = vadd.f32 %v2300_v46, %v2284_v21  ;;  %v2263_v34 = vmul.f32 %v2731_v29, %v4206_v0  ;;  %v2200_v39 = vpop.f32.mrb[17].mxu0  ;;  %v2309_v24 = vld [vmem:[%s3225_s17 + $0x70] sm:$0xff] }
 0x3ff   : > { %2345 = vst.msk [vmem:[%s3316_s16 + $0x10] sm:$0xff] %vm485_vm0, %v2329_v37  ;;  %v2315_v55 = vadd.f32 %v2299_v45, %v2283_v54  ;;  %v2262_v51 = vmul.f32 %v4206_v0, %v2200_v39 }
 0x400   : > { %v2332_v50 = vmax.f32 %v2316_v6, 0.0  ;;  %v2286_v17 = vadd.f32 %v4211_v49, %v2263_v34 }
 0x401   : > { %v2331_v20 = vmax.f32 %v2315_v55, 0.0  ;;  %v2285_v2 = vadd.f32 %v4211_v49, %v2262_v51  ;;  %v2734_v13 = vpop.f32.mrb[18].mxu0 }
 0x402   : > { %2348 = vst.msk [vmem:[%s3316_s16 + $0x28] sm:$0xff] %vm485_vm0, %v2332_v50  ;;  %v2318_v27 = vadd.f32 %v2302_v58, %v2286_v17  ;;  %v2265_v14 = vmul.f32 %v2734_v13, %v4206_v0  ;;  %v2210_v41 = vpop.f32.mrb[19].mxu0 }
 0x403   : > { %2347 = vst.msk [vmem:[%s3316_s16 + $0x20] sm:$0xff] %vm485_vm0, %v2331_v20  ;;  %v2317_v23 = vadd.f32 %v2301_v9, %v2285_v2  ;;  %v2264_v48 = vmul.f32 %v4206_v0, %v2210_v41 }
 0x404   : > { %v2334_v36 = vmax.f32 %v2318_v27, 0.0  ;;  %v2288_v33 = vadd.f32 %v4211_v49, %v2265_v14 }
 0x405   : > { %v2333_v11 = vmax.f32 %v2317_v23, 0.0  ;;  %v2287_v15 = vadd.f32 %v4211_v49, %v2264_v48  ;;  %v2737_v18 = vpop.f32.mrb[20].mxu0 }
 0x406   : > { %2350 = vst.msk [vmem:[%s3316_s16 + $0x38] sm:$0xff] %vm485_vm0, %v2334_v36  ;;  %v2320_v53 = vadd.f32 %v2304_v35, %v2288_v33  ;;  %v2267_v4 = vmul.f32 %v2737_v18, %v4206_v0  ;;  %v2220_v40 = vpop.f32.mrb[21].mxu0 }
 0x407   : > { %2349 = vst.msk [vmem:[%s3316_s16 + $0x30] sm:$0xff] %vm485_vm0, %v2333_v11  ;;  %v2319_v30 = vadd.f32 %v2303_v56, %v2287_v15  ;;  %v2266_v31 = vmul.f32 %v4206_v0, %v2220_v40 }
 0x408   : > { %v2336_v7 = vmax.f32 %v2320_v53, 0.0  ;;  %v2290_v38 = vadd.f32 %v4211_v49, %v2267_v4 }
 0x409   : > { %v2335_v22 = vmax.f32 %v2319_v30, 0.0  ;;  %v2289_v16 = vadd.f32 %v4211_v49, %v2266_v31  ;;  %v2740_v32 = vpop.f32.mrb[22].mxu0 }
 0x40a   : > { %2352 = vst.msk [vmem:[%s3316_s16 + $0x48] sm:$0xff] %vm485_vm0, %v2336_v7  ;;  %v2322_v44 = vadd.f32 %v2306_v57, %v2290_v38  ;;  %v2269_v47 = vmul.f32 %v2740_v32, %v4206_v0  ;;  %v2230_v61 = vpop.f32.mrb[23].mxu0 }
 0x40b   : > { %2351 = vst.msk [vmem:[%s3316_s16 + $0x40] sm:$0xff] %vm485_vm0, %v2335_v22  ;;  %v2321_v52 = vadd.f32 %v2305_v43, %v2289_v16  ;;  %v2268_v12 = vmul.f32 %v4206_v0, %v2230_v61 }
 0x40c   : > { %v2338_v1 = vmax.f32 %v2322_v44, 0.0  ;;  %v2292_v63 = vadd.f32 %v4211_v49, %v2269_v47 }
 0x40d   : > { %v2337_v5 = vmax.f32 %v2321_v52, 0.0  ;;  %v2291_v59 = vadd.f32 %v4211_v49, %v2268_v12  ;;  %v2743_v19 = vpop.f32.mrb[24].mxu0 }
 0x40e   : > { %2354 = vst.msk [vmem:[%s3316_s16 + $0x58] sm:$0xff] %vm485_vm0, %v2338_v1  ;;  %v2324_v8 = vadd.f32 %v2308_v42, %v2292_v63  ;;  %v2271_v60 = vmul.f32 %v2743_v19, %v4206_v0  ;;  %v2240_v10 = vpop.f32.mrb[25].mxu0 }
 0x40f   : > { %2353 = vst.msk [vmem:[%s3316_s16 + $0x50] sm:$0xff] %vm485_vm0, %v2337_v5  ;;  %v2323_v26 = vadd.f32 %v2307_v3, %v2291_v59  ;;  %v2270_v62 = vmul.f32 %v4206_v0, %v2240_v10 }
 0x410   : > { %v2340_v46 = vmax.f32 %v2324_v8, 0.0  ;;  %v2294_v25 = vadd.f32 %v4211_v49, %v2271_v60 }
 0x411   : > { %v2339_v21 = vmax.f32 %v2323_v26, 0.0  ;;  %v2293_v45 = vadd.f32 %v4211_v49, %v2270_v62 }
 0x412   : > { %2356 = vst.msk [vmem:[%s3316_s16 + $0x68] sm:$0xff] %vm485_vm0, %v2340_v46  ;;  %v2326_v37 = vadd.f32 %v2310_v28, %v2294_v25 }
 0x413   : > { %2355 = vst.msk [vmem:[%s3316_s16 + $0x60] sm:$0xff] %vm485_vm0, %v2339_v21  ;;  %v2325_v0 = vadd.f32 %v2309_v24, %v2293_v45 }
 0x414   : > { %v2342_v54 = vmax.f32 %v2326_v37, 0.0 }
 0x415   : > { %v2341_v29 = vmax.f32 %v2325_v0, 0.0 }
 0x416   : > { %2358 = vst.msk [vmem:[%s3316_s16 + $0x78] sm:$0xff] %vm485_vm0, %v2342_v54 }
 0x417   : > { %2357 = vst.msk [vmem:[%s3316_s16 + $0x70] sm:$0xff] %vm485_vm0, %v2341_v29 }
 0x418   : > { %2929 = shalt.err (!%p2926_p3)
}
 0x419   : > { %s2930_s16 = scalar_lea.hbm %s4297_s0, 2048  ;;  %s2934_s26 = scalar_lea.hbm %s4535_s12, 8192 }
 0x41a   : > { %p2931_p5 = scmp.ne.s32.totalorder %s4297_s0, %s2930_s16  ;;  %p2935_p2 = scmp.lt.u32.totalorder %s4297_s0, %s4535_s12 }
 0x41b   : > { %p2936_p4 = scmp.lt.u32.totalorder %s2934_s26, %s2930_s16  ;;  %p2938_p8 = scmp.lt.u32.totalorder %s2930_s16, %s4297_s0 }
 0x41c   : > { %p2932_p6 = pnand %p2931_p5, %p4536_p9 }
 0x41d   : > { %p2937_p10 = por %p2936_p4, %p2935_p2 }
 0x41e   : > { %p2933_p7 = pneg %p2932_p6 }
 0x41f   : > { %p2939_p12 = por %p2938_p8, %p2937_p10 }
 0x421   : > { %p2940_p0 = pnand %p2939_p12, %p2933_p7 }
 0x423   : > { %2943 = shalt.err (!%p2940_p0)
}
 0x424   : > { %s3026_s7 = smov 128   ;;  %s3027_s24 = smov 8  }
 0x425   : > { %2756 = dma.vmem_to_hbm [thread:$0]  (%p4536_p9), %s4292_s25, 2048, %s4297_s0, %s2360_s27, %s3026_s7, %s3026_s7, %s3027_s24  }
 0x426 PF: > { %s4537_s29 = sld [smem:[#allocation18_spill]]  ;;  %p2767_p11 = scmp.ge.s32.totalorder %s3018_s28, 2 }
 0x427   : > { %p4538_p13 = scmp.ne.s32.totalorder %s4417_s21, 0 }
 0x429   : > { %p2763_p1 = pnand %p2767_p11, %p4538_p13 }
 0x42c   : > { %s2391_s17 = sand.u32 1, %s4537_s29  }
 0x42d   : > { %s2392_s13 = scalar_lea.sflag [#allocation6], %s2391_s17 }
 0x42e   : > { %2985 = dma.done.wait (!%p2763_p1), %s2392_s13, 2048  }
 0x42f   : > { %2987 = vsyncadd (!%p2763_p1), %s2392_s13, 4294965248  ;;  %s28_s28 = sadd.s32 1, %s3018_s28   ;;  %s4539_s8 = sld [smem:[#allocation23_spill]] }
 0x430   : > { %p25_p3 = scmp.ge.s32.totalorder %s28_s28, 6   ;;  %s4540_s24 = sld [smem:[#allocation19_spill]] }
 0x431   : > { %s4541_s25 = sld [smem:[#allocation20_spill]]  ;;  %s4542_s26 = sld [smem:[#allocation21_spill]] }
 0x432   : > { %s4543_s27 = sld [smem:[#allocation22_spill]]  ;;  %s4544_s21 = smov %s2994_s22 }
 0x433   : > { %s4545_s22 = smov %s2998_s23  ;;  %27 = sbr.rel (!%p25_p3) target bundleno = 16 (0x10), region = 130 }
 0x435   : > { %s4546_s23 = smov %s4539_s8 }
 0x43a   :  { %2397 = vsyncpa [#allocation5], 1 }
 0x43b   :  { %2399 = vsyncpa [#allocation5 + $0x1], 1 }
 0x43c   :  { %2400 = vsyncpa [#allocation6], 1 }
 0x43d   :  { %2402 = vsyncpa [#allocation6 + $0x1], 1 }
 0x43e   :  { %2403 = vsyncmov [#allocation3] }
 0x441   :  { %s2404_s19 = vpop.sfrf %2403 }
 0x442   :  { %p2592_p9 = scmp.ne.s32.totalorder %s2404_s19, 0 }
 0x444   :  { %2408 = shalt.err (%p2592_p9)  }
 0x445   :  { %2410 = vsyncmov [#allocation3 + $0x1] }
 0x448   :  { %s2411_s10 = vpop.sfrf %2410 }
 0x449   :  { %p2593_p5 = scmp.ne.s32.totalorder %s2411_s10, 0 }
 0x44b   :  { %2415 = shalt.err (%p2593_p5)  }

// kernel: tpu_custom_call.1
= control target key start
LH: loop header
LB: loop body
LE: loop exit
PB: predicated region body
PF: predicated region fallthrough
CT: control target
= control target key end

     0   :  { %s4355_s0 = inlined_call_operand.hbm [shape: f32[2,16,16,16], index: 0, kind: input, shape index: {}]   ;;  %s4356_s1 = inlined_call_operand.hbm [shape: f32[2,16,16,16], index: 1, kind: input, shape index: {}]   ;;  %s4357_s2 = inlined_call_operand.vmem [shape: f32[16,4], index: 2, kind: input, shape index: {}]   ;;  %s4358_s3 = inlined_call_operand.vmem [shape: f32[1,4], index: 3, kind: input, shape index: {}]   ;;  %s4359_s4 = inlined_call_operand.vmem [shape: f32[1,4], index: 4, kind: input, shape index: {}]   ;;  %s4360_s5 = inlined_call_operand.vmem [shape: f32[9,1,4], index: 5, kind: input, shape index: {}]   ;;  %s4361_s6 = inlined_call_operand.vmem [shape: f32[4,4], index: 6, kind: input, shape index: {}]   ;;  %s4362_s7 = inlined_call_operand.vmem [shape: f32[1,4], index: 7, kind: input, shape index: {}]   ;;  %s4363_s8 = inlined_call_operand.vmem [shape: f32[1,4], index: 8, kind: input, shape index: {}]   ;;  %s4364_s9 = inlined_call_operand.vmem [shape: f32[4,16], index: 9, kind: input, shape index: {}]   ;;  %s4365_s10 = inlined_call_operand.vmem [shape: f32[1,16], index: 10, kind: input, shape index: {}]   ;;  %s4366_s11 = inlined_call_operand.vmem [shape: f32[1,16], index: 11, kind: input, shape index: {}]   ;;  %s4367_s12 = inlined_call_operand.hbm [shape: f32[2,16,16,16], index: 12, kind: output, shape index: {}]  }
   0x1   :  { %4401 = sst [smem:[#allocation58_spill]] %s4355_s0 }
   0x2   :  { %4402 = sst [smem:[#allocation59_spill]] %s4360_s5 }
   0x3   :  { %4403 = sst [smem:[#allocation60_spill]] %s4362_s7 }
   0x4   :  { %4404 = sst [smem:[#allocation61_spill]] %s4363_s8 }
   0x5   :  { %4405 = sst [smem:[#allocation62_spill]] %s4364_s9 }
   0x6   :  { %4406 = sst [smem:[#allocation63_spill]] %s4365_s10 }
   0x7   :  { %4407 = sst [smem:[#allocation64_spill]] %s4366_s11 }
   0x8   :  { %4408 = sst [smem:[#allocation65_spill]] %s4367_s12 }
   0x9   :  { %17 = vsyncpa [#allocation5], 0 }
   0xa   :  { %19 = vsyncpa [#allocation5 + $0x1], 0 }
   0xb   :  { %20 = vsyncpa [#allocation6], 0 }
   0xc   :  { %22 = vsyncpa [#allocation6 + $0x1], 0  ;;  %s3093_s21 = smov 0   ;;  %s3095_s22 = smov 0  }
   0xd   :  { %s3097_s23 = smov 0   ;;  %s3099_s24 = smov 0  }
   0xe   :  { %s3101_s25 = smov 0   ;;  %s3103_s26 = smov 0  }
   0xf   :  { %s3105_s27 = smov 0   ;;  %s3107_s28 = smov 0  }
  0x10 LB: > { %4409 = sst [smem:[#allocation18_spill]] %s2990_s21  ;;  %s2489_s29 = sadd.s32 4294967295, %s3018_s28   ;;  %s3018_s28 = sphi %s3107_s28, %s28_s28   ;;  %s3014_s27 = sphi %s3105_s27, %s4543_s27   ;;  %s3010_s26 = sphi %s3103_s26, %s4542_s26   ;;  %s3006_s25 = sphi %s3101_s25, %s4541_s25   ;;  %s3002_s24 = sphi %s3099_s24, %s4540_s24   ;;  %s2998_s23 = sphi %s3097_s23, %s4546_s23   ;;  %s2994_s22 = sphi %s3095_s22, %s4545_s22   ;;  %s2990_s21 = sphi %s3093_s21, %s4544_s21  }
  0x11   : > { %4410 = sst [smem:[#allocation19_spill]] %s3010_s26  ;;  %s2490_s30 = sadd.s32 4294967294, %s3018_s28  }
  0x12   : > { %4411 = sst [smem:[#allocation20_spill]] %s3014_s27  ;;  %s37_s13 = sadd.s32 1, %s3010_s26 }
  0x13   : > { %s40_s14 = sadd.s32 1, %s3014_s27  ;;  %p38_p0 = scmp.ge.s32.totalorder %s37_s13, 2 }
  0x14   : > { %s49_s15 = sadd.s32 1, %s2998_s23  ;;  %p56_p1 = scmp.ne.s32.totalorder %s2998_s23, %s2994_s22 }
  0x15   : > { %p57_p2 = scmp.eq.s32.totalorder %s3018_s28, 0  ;;  %s4548_s13 = smov (%p38_p0, %s37_s13), 0 }
  0x16   : > { %4412 = sst [smem:[#allocation21_spill]] %s4548_s13  ;;  %s4550_s14 = smov (!%p38_p0, %s40_s14), %s3014_s27 }
  0x17   : > { %s45_s16 = ssub.s32 %s3010_s26, %s4548_s13  ;;  %p3146_p3 = por %p57_p2, %p56_p1 }
  0x18   : > { %p42_p4 = scmp.ge.s32.totalorder %s4550_s14, 2  ;;  %p62_p5 = scmp.ne.s32.totalorder %s2994_s22, %s2990_s21 }
  0x19   : > { %p63_p6 = scmp.eq.s32.totalorder %s2489_s29, 0  ;;  %p298_p7 = scmp.eq.s32.totalorder %s2489_s29, 3 }
  0x1a   : > { %s4552_s14 = smov (%p42_p4, %s4550_s14), 0  ;;  %p304_p10 = scmp.eq.s32.totalorder %s2490_s30, 3 }
  0x1b   : > { %4414 = sst [smem:[#allocation22_spill]] %s4552_s14  ;;  %p3154_p8 = por %p63_p6, %p62_p5 }
  0x1c   : > { %p3158_p9 = por %p298_p7, %p56_p1  ;;  %s44_s20 = ssub.s32 %s3014_s27, %s4552_s14 }
  0x1d   : > { %s46_s13 = sor.u32 %s45_s16, %s44_s20  ;;  %p3164_p12 = por %p304_p10, %p62_p5 }
  0x1e   : > { %s4416_s19 = scalar_select %p3158_p9, 1, 0 }
  0x1f   : > { %p47_p11 = scmp.eq.s32.totalorder %s46_s13, 0  ;;  %p2766_p13 = scmp.lt.s32.totalorder %s3018_s28, 4 }
  0x20   : > { %s4417_s21 = scalar_select %p3164_p12, 1, 0 }
  0x21   : > { %s354_s29 = sand.u32 1, %s2998_s23   ;;  %s2594_s10 = sshll.u32 %s3010_s26, 4 }
  0x22   : > { %s3171_s12 = scalar_select %p47_p11, %s2998_s23, %s49_s15  }
  0x23   : > { %s2493_s11 = sshll.u32 %s354_s29, 7  ;;  %s2496_s8 = sshll.u32 %s3014_s27, 5 }
  0x24   : > { %4418 = sst [smem:[#allocation23_spill]] %s3171_s12  ;;  %s358_s7 = scalar_lea.vmem [#allocation4], %s2493_s11 }
  0x25   : > { %s368_s9 = sshll.u32 %s358_s7, 4  ;;  %s365_s5 = sadd.s32 %s2594_s10, %s2496_s8  ;;  %s3175_s9 = int_to_ptr.vmem [resolvable:$true] %s368_s9 }
  0x26   : > { %s2497_s14 = sshll.u32 %s365_s5, 7  ;;  %p3179_p0 = pnand %p2766_p13, %p3146_p3 }
  0x27   : > { %s4420_s0 = sld [smem:[#allocation58_spill]]  ;;  %s3188_s7 = scalar_lea.sflag [#allocation5], %s354_s29 }
  0x28   : > { %p2840_p2 = pneg %p3179_p0 }
  0x2d   : > { %s3186_s15 = scalar_lea.hbm %s4420_s0, %s2497_s14  ;;  %s2843_s11 = scalar_lea.hbm %s4420_s0, 8192 }
  0x2e   : > { %s2838_s8 = scalar_lea.hbm %s3186_s15, 2048  ;;  %p2844_p5 = scmp.lt.u32.totalorder %s3186_s15, %s4420_s0 }
  0x2f   : > { %p2839_p1 = scmp.ne.s32.totalorder %s3186_s15, %s2838_s8  ;;  %p2845_p6 = scmp.lt.u32.totalorder %s2843_s11, %s2838_s8 }
  0x30   : > { %p2847_p10 = scmp.lt.u32.totalorder %s2838_s8, %s3186_s15 }
  0x31   : > { %p2841_p3 = pnand %p2840_p2, %p2839_p1  ;;  %p2846_p7 = por %p2845_p6, %p2844_p5 }
  0x33   : > { %p2842_p4 = pneg %p2841_p3  ;;  %p2848_p11 = por %p2847_p10, %p2846_p7 }
  0x35   : > { %p2849_p13 = pnand %p2848_p11, %p2842_p4 }
  0x37   : > { %2852 = shalt.err (!%p2849_p13)
}
  0x38   : > { %s2853_s20 = scalar_lea.vmem %s3175_s9, 2048  ;;  %s3020_s29 = smov [#allocation4]  }
  0x39   : > { %p2854_p1 = scmp.ne.s32.totalorder %s3175_s9, %s2853_s20  ;;  %s2858_s13 = sshll.u32 %s3020_s29, 4  ;;  %s2859_s13 = int_to_ptr.vmem [resolvable:$false] %s2858_s13 }
  0x3a   : > { %s2860_s16 = scalar_lea.vmem %s2859_s13, 4096  ;;  %p2861_p9 = scmp.lt.s32.totalorder %s3175_s9, %s2859_s13 }
  0x3b   : > { %p2856_p3 = pnand %p2854_p1, %p2840_p2  ;;  %p2862_p5 = scmp.lt.s32.totalorder %s2860_s16, %s2853_s20 }
  0x3d   : > { %p2857_p12 = pneg %p2856_p3  ;;  %p2863_p6 = por %p2862_p5, %p2861_p9 }
  0x3f   : > { %p2864_p7 = pnand %p2863_p6, %p2857_p12 }
  0x41   : > { %2867 = shalt.err (!%p2864_p7)
}
  0x42   : > { %s3021_s8 = smov 128   ;;  %s3022_s5 = smov 8  }
  0x43   : > { %2761 = dma.hbm_to_vmem [thread:$0]  (!%p3179_p0), %s3186_s15, 2048, %s3175_s9, %s3188_s7, %s3021_s8, %s3021_s8, %s3022_s5  }
  0x44   : > { %p2498_p2 = scmp.ge.s32.totalorder %s3018_s28, 1  ;;  %p376_p4 = scmp.lt.s32.totalorder %s3018_s28, 5 }
  0x46   : > { %p377_p10 = pnand %p2498_p2, %p376_p4 }
  0x48   : > { %380 = sbr.rel (%p377_p10) target bundleno = 1062 (0x426), region = 64 }
  0x4f   : > { %s3219_s10 = sand.u32 1, %s2994_s22  }
  0x50   : > { %s4374_s11 = sshll.u32 %s3219_s10, 7  ;;  %s383_s14 = scalar_lea.sflag [#allocation5], %s3219_s10 }
  0x51   : > { %s3225_s17 = scalar_lea.vmem [#allocation4], %s4374_s11 }
  0x52   : > { %2977 = dma.done.wait (%p3154_p8), %s383_s14, 2048  }
  0x53   : > { %2979 = vsyncadd (%p3154_p8), %s383_s14, 4294965248  ;;  %vm485_vm0 = vcmask 130048   ;;  %v483_v0 = vld [vmem:[%s4357_s2] sm:$0xff]  ;;  %v484_v1 = vld [vmem:[%s4357_s2 + $0x8] sm:$0xff]  ;;  %s2501_s18 = sshll.u32 %s3002_s24, 3  ;;  %s2504_s16 = sshll.u32 %s3006_s25, 8 }
  0x54   : > { %v467_v2 = vld [vmem:[%s3225_s17] sm:$0xff]  ;;  %v2744_v3 = vpack.c.bf16 %v484_v1, %v483_v0  ;;  %v477_v4 = vld [vmem:[%s3225_s17 + $0x50] sm:$0xff]  ;;  %v468_v5 = vld [vmem:[%s3225_s17 + $0x8] sm:$0xff]  ;;  %s2502_s20 = sadd.s32 4294967295, %s2501_s18  ;;  %s431_s29 = sadd.s32 8, %s2501_s18 }
  0x55   : > { %2658 = vmatprep.mubr.msk.f32.mxu0 %vm485_vm0, %v467_v2  ;;  %v478_v6 = vld [vmem:[%s3225_s17 + $0x58] sm:$0xff]  ;;  %v469_v7 = vld [vmem:[%s3225_s17 + $0x10] sm:$0xff]  ;;  %2673 = vmatprep.mubr.msk.f32.mxu1 %vm485_vm0, %v477_v4  ;;  %v479_v8 = vld [vmem:[%s3225_s17 + $0x60] sm:$0xff]  ;;  %p429_p8 = scmp.gt.s32.totalorder %s2502_s20, 0  ;;  %p432_p9 = scmp.lt.s32.totalorder %s431_s29, 15 }
  0x56   : > { %2745 = vmatprep.subr.bf16.mxu0 %v2744_v3  ;;  %2752 = vmatprep.subr.bf16.mxu1 %v2744_v3  ;;  %v470_v9 = vld [vmem:[%s3225_s17 + $0x18] sm:$0xff]  ;;  %v480_v10 = vld [vmem:[%s3225_s17 + $0x68] sm:$0xff]  ;;  %v471_v11 = vld [vmem:[%s3225_s17 + $0x20] sm:$0xff]  ;;  %s3023_s15 = smov [#allocation2]   ;;  %s2870_s26 = scalar_lea.hbm %s4356_s1, 8192 }
  0x57   : > { %2747 = vmatpush3.bf16.msra.mxu0 %v2744_v3  ;;  %2753 = vmatpush3.bf16.msra.mxu1 %v2744_v3  ;;  %v481_v12 = vld [vmem:[%s3225_s17 + $0x70] sm:$0xff]  ;;  %v472_v13 = vld [vmem:[%s3225_s17 + $0x28] sm:$0xff]  ;;  %v482_v14 = vld [vmem:[%s3225_s17 + $0x78] sm:$0xff]  ;;  %s4554_s20 = smov (!%p429_p8, %s2502_s20), 0  ;;  %s4556_s29 = smov (!%p432_p9, %s431_s29), 15 }
  0x58   : > { %v473_v15 = vld [vmem:[%s3225_s17 + $0x30] sm:$0xff]  ;;  %v474_v16 = vld [vmem:[%s3225_s17 + $0x38] sm:$0xff]  ;;  %v475_v17 = vld [vmem:[%s3225_s17 + $0x40] sm:$0xff]  ;;  %s2503_s13 = sshll.u32 %s4554_s20, 4  ;;  %s446_s7 = sshll.u32 %s3023_s15, 4  ;;  %s3276_s7 = int_to_ptr.vmem [resolvable:$true] %s446_s7 }
  0x59   : > { %v476_v18 = vld [vmem:[%s3225_s17 + $0x48] sm:$0xff]  ;;  %s436_s8 = sadd.s32 %s2504_s16, %s2503_s13  ;;  %s2506_s11 = sshll.u32 %s4556_s29, 4 }
  0x5a   : > { %2659 = vmatmul.mubr.msk.f32.vlgmr.msra.gmra.mrb[0].mxu0 %vm485_vm0, %v468_v5  ;;  %2674 = vmatmul.mubr.msk.f32.vlgmr.msra.gmra.mrb[0].mxu1 %vm485_vm0, %v478_v6  ;;  %s2505_s5 = sshll.u32 %s436_s8, 4 }
  0x5b   : > { %2661 = vmatprep.mubr.msk.f32.mxu0 %vm485_vm0, %v469_v7  ;;  %2676 = vmatprep.mubr.msk.f32.mxu1 %vm485_vm0, %v479_v8  ;;  %s438_s30 = scalar_lea.hbm %s4356_s1, %s2505_s5 }
  0x5c   : > { %s2868_s0 = scalar_lea.hbm %s438_s30, 256  ;;  %p2871_p0 = scmp.lt.u32.totalorder %s438_s30, %s4356_s1 }
  0x5d   : > { %p2869_p12 = scmp.ne.s32.totalorder %s438_s30, %s2868_s0  ;;  %p2872_p11 = scmp.lt.u32.totalorder %s2870_s26, %s2868_s0 }
  0x5e   : > { %2662 = vmatmul.mubr.msk.f32.gmra.mrb[2].mxu0 %vm485_vm0, %v470_v9  ;;  %2677 = vmatmul.mubr.msk.f32.gmra.mrb[2].mxu1 %vm485_vm0, %v480_v10  ;;  %p2874_p1 = scmp.lt.u32.totalorder %s2868_s0, %s438_s30 }
  0x5f   : > { %2664 = vmatprep.mubr.msk.f32.mxu0 %vm485_vm0, %v471_v11  ;;  %2679 = vmatprep.mubr.msk.f32.mxu1 %vm485_vm0, %v481_v12  ;;  %p2873_p13 = por %p2872_p11, %p2871_p0 }
  0x61   : > { %p2875_p3 = por %p2874_p1, %p2873_p13 }
  0x62   : > { %2665 = vmatmul.mubr.msk.f32.gmra.mrb[4].mxu0 %vm485_vm0, %v472_v13  ;;  %2680 = vmatmul.mubr.msk.f32.gmra.mrb[4].mxu1 %vm485_vm0, %v482_v14 }
  0x63   : > { %2667 = vmatprep.mubr.msk.f32.mxu0 %vm485_vm0, %v473_v15  ;;  %p2876_p5 = pnand %p2875_p3, %p2869_p12 }
  0x66   : > { %2668 = vmatmul.mubr.msk.f32.gmra.mrb[6].mxu0 %vm485_vm0, %v474_v16 }
  0x67   : > { %2670 = vmatprep.mubr.msk.f32.mxu0 %vm485_vm0, %v475_v17 }
  0x6a   : > { %2671 = vmatmul.mubr.msk.f32.gmra.mrb[8].mxu0 %vm485_vm0, %v476_v18 }
  0x6b   : > { %2879 = shalt.err (!%p2876_p5)  }
  0x6c   : > { %s2880_s29 = scalar_lea.vmem %s3276_s7, 256  ;;  %s2884_s13 = scalar_lea.vmem %s3276_s7, 512 }
  0x6d   : > { %p2881_p6 = scmp.ne.s32.totalorder %s3276_s7, %s2880_s29  ;;  %p2885_p7 = scmp.lt.s32.totalorder %s3276_s7, %s3276_s7 }
  0x6e   : > { %p2886_p2 = scmp.lt.s32.totalorder %s2884_s13, %s2880_s29 }
  0x70   : > { %p2887_p4 = por %p2886_p2, %p2885_p7 }
  0x72   : > { %p2888_p10 = pnand %p2887_p4, %p2881_p6 }
  0x74   : > { %2891 = shalt.err (!%p2888_p10)  }
  0x75   : > { %449 = dma.hbm_to_vmem [thread:$0]  %s438_s30, 256, %s3276_s7, [#allocation3] }
  0x76   : > { %s451_s12 = sadd.s32 %s2506_s11, %s2504_s16  ;;  %s3024_s27 = smov [#allocation2 + $0x10]  }
  0x77   : > { %s2507_s0 = sshll.u32 %s451_s12, 4  ;;  %s463_s8 = sshll.u32 %s3024_s27, 4  ;;  %s464_s8 = int_to_ptr.vmem [resolvable:$true] %s463_s8 }
  0x78   : > { %s453_s9 = scalar_lea.hbm %s4356_s1, %s2507_s0 }
  0x79   : > { %s2892_s15 = scalar_lea.hbm %s453_s9, 256  ;;  %p2895_p9 = scmp.lt.u32.totalorder %s453_s9, %s4356_s1 }
  0x7a   : > { %p2893_p8 = scmp.ne.s32.totalorder %s453_s9, %s2892_s15  ;;  %p2896_p12 = scmp.lt.u32.totalorder %s2870_s26, %s2892_s15 }
  0x7b   : > { %p2898_p11 = scmp.lt.u32.totalorder %s2892_s15, %s453_s9 }
  0x7c   : > { %p2897_p0 = por %p2896_p12, %p2895_p9 }
  0x7e   : > { %p2899_p13 = por %p2898_p11, %p2897_p0 }
  0x80   : > { %p2900_p1 = pnand %p2899_p13, %p2893_p8 }
  0x82   : > { %2903 = shalt.err (!%p2900_p1)  }
  0x83   : > { %s2904_s11 = scalar_lea.vmem %s464_s8, 256  ;;  %p2909_p5 = scmp.lt.s32.totalorder %s464_s8, %s3276_s7 }
  0x84   : > { %p2905_p3 = scmp.ne.s32.totalorder %s464_s8, %s2904_s11  ;;  %p2910_p6 = scmp.lt.s32.totalorder %s2884_s13, %s2904_s11 }
  0x86   : > { %p2911_p7 = por %p2910_p6, %p2909_p5 }
  0x88   : > { %p2912_p2 = pnand %p2911_p7, %p2905_p3 }
  0x8a   : > { %2915 = shalt.err (!%p2912_p2)  }
  0x8b   : > { %466 = dma.hbm_to_vmem [thread:$0]  %s453_s9, 256, %s464_s8, [#allocation3 + $0x1] }
  0x8c   : > { %s4421_s26 = sshll.u32 %s3219_s10, 7 }
  0x8d   : > { %s3316_s16 = scalar_lea.vmem [#allocation7], %s4421_s26 }
 0x12d   : > { %v2660_v19 = vpop.f32.mrb[0].mxu0  ;;  %v2675_v20 = vpop.f32.mrb[0].mxu1 }
 0x12e   : > { %v600_v21 = vpop.f32.mrb[1].mxu0  ;;  %v650_v22 = vpop.f32.mrb[1].mxu1 }
 0x131   : > { %v3298_v23 = vpop.f32.mrb[2].mxu0  ;;  %v2678_v24 = vpop.f32.mrb[2].mxu1 }
 0x132   : > { %v3300_v25 = vpop.f32.mrb[3].mxu0  ;;  %v660_v26 = vpop.f32.mrb[3].mxu1 }
 0x135   : > { %v3302_v27 = vpop.f32.mrb[4].mxu0  ;;  %v2681_v28 = vpop.f32.mrb[4].mxu1 }
 0x136   : > { %v3304_v29 = vpop.f32.mrb[5].mxu0  ;;  %v670_v30 = vpop.f32.mrb[5].mxu1 }
 0x139   : > { %v3306_v31 = vpop.f32.mrb[6].mxu0 }
 0x13a   : > { %v3308_v32 = vpop.f32.mrb[7].mxu0 }
 0x13d   : > { %v3310_v33 = vpop.f32.mrb[8].mxu0 }
 0x13e   : > { %v3312_v34 = vpop.f32.mrb[9].mxu0 }
 0x13f   : > { %2980 = dma.done.wait [#allocation3], 256 }
 0x140   : > { %2981 = vsyncadd [#allocation3], 4294967040 }
 0x141   : > { %2982 = dma.done.wait [#allocation3 + $0x1], 256 }
 0x142   : > { %2983 = vsyncadd [#allocation3 + $0x1], 4294967040  ;;  %v688_v35 = vld [vmem:[%s4357_s2] sm:$0xff]  ;;  %v689_v36 = vld [vmem:[%s4357_s2 + $0x8] sm:$0xff]  ;;  %vm1841_vm1 = vcmask 1043456   ;;  %v861_v44 = vlaneseq  ;;  %p1042_p4 = scmp.gt.s32.totalorder %s3002_s24, 0 }
 0x143   : > { %v684_v37 = vld [vmem:[#allocation2] sm:$0xff]  ;;  %v2748_v38 = vpack.c.bf16 %v689_v36, %v688_v35  ;;  %v685_v39 = vld [vmem:[#allocation2 + $0x8] sm:$0xff]  ;;  %v686_v40 = vld [vmem:[#allocation2 + $0x10] sm:$0xff]  ;;  %s4424_s18 = sld [smem:[#allocation59_spill]]  ;;  %p1086_p10 = scmp.lt.s32.totalorder %s3002_s24, 1 }
 0x144   : > { %2686 = vmatprep.mubr.msk.f32.mxu1 %vm485_vm0, %v684_v37  ;;  %v687_v41 = vld [vmem:[#allocation2 + $0x18] sm:$0xff]  ;;  %v1791_v42 = vld [vmem:[%s4361_s6] sm:$0xf]  ;;  %v3345_v48 = vshrl.u32 %v861_v44, 7  ;;  %s3390_s20 = scalar_select %p1042_p4, 1, 0 }
 0x145   : > { %2749 = vmatprep.subr.bf16.mxu1 %v2748_v38  ;;  %v3336_v43 = vld [vmem:[%s4358_s3] ss:$0 sm:$0xff]  ;;  %s3443_s29 = scalar_select %p1086_p10, 1, 0 }
 0x146   : > { %2751 = vmatpush3.bf16.msra.mxu1 %v2748_v38  ;;  %v807_v45 = vmul.f32 %v2675_v20, %v3336_v43  ;;  %v808_v46 = vmul.f32 %v3336_v43, %v660_v26  ;;  %v3343_v47 = vld [vmem:[%s4359_s4] ss:$0 sm:$0xff]  ;;  %v810_v51 = vmul.f32 %v3336_v43, %v670_v30  ;;  %v876_v52 = vadd.s32 112, %v3345_v48  ;;  %s4531_s0 = sld [smem:[#allocation60_spill]]  ;;  %s4532_s5 = sld [smem:[#allocation61_spill]] }
 0x147   : > { %2692 = vmatprep.subr.msk.mxu1 %vm1841_vm1, %v1791_v42  ;;  %v809_v53 = vmul.f32 %v2678_v24, %v3336_v43  ;;  %v797_v56 = vmul.f32 %v2660_v19, %v3336_v43  ;;  %v796_v60 = vmul.f32 %v3336_v43, %v600_v21  ;;  %vm1230_vm2 = vcmp.lt.s32.totalorder %v3345_v48, 1  ;;  %s4533_s15 = sld [smem:[#allocation63_spill]]  ;;  %s4534_s30 = sld [smem:[#allocation64_spill]] }
 0x148   : > { %v834_v49 = vadd.f32 %v3343_v47, %v807_v45  ;;  %v835_v50 = vadd.f32 %v3343_v47, %v808_v46  ;;  %v837_v57 = vadd.f32 %v3343_v47, %v810_v51  ;;  %v984_v58 = vand.u32 15, %v876_v52  ;;  %s2588_s7 = sshll.u32 %s3006_s25, 5  ;;  %s2376_s25 = sshll.u32 %s3316_s16, 4  ;;  %s4292_s25 = int_to_ptr.vmem [resolvable:$true] %s2376_s25 }
 0x149   : > { %2687 = vmatmul.mubr.msk.f32.vlgmr.msra.gmra.mrb[6].mxu1 %vm485_vm0, %v685_v39  ;;  %v836_v61 = vadd.f32 %v3343_v47, %v809_v53  ;;  %v824_v63 = vadd.f32 %v3343_v47, %v797_v56  ;;  %v806_v0 = vmul.f32 %v3336_v43, %v650_v22  ;;  %v878_v2 = vadd.s32 128, %v3345_v48  ;;  %v3382_v7 = vld [vmem:[%s4424_s18] ss:$0 sm:$0xff]  ;;  %v3402_v16 = vld [vmem:[%s4424_s18 + $0x1] ss:$0 sm:$0xff]  ;;  %s4535_s12 = sld [smem:[#allocation65_spill]] }
 0x14a   : > { %2689 = vmatprep.mubr.msk.f32.mxu1 %vm485_vm0, %v686_v40  ;;  %2693 = vmatpush3.msk.msra.mxu1 %vm1841_vm1, %v1791_v42  ;;  %v3352_v54 = vmax.f32 %v834_v49, 0.0  ;;  %v3354_v55 = vmax.f32 %v835_v50, 0.0  ;;  %v3366_v1 = vmax.f32 %v837_v57, 0.0  ;;  %vm1204_vm3 = vcmp.ge.s32.totalorder %v984_v58, 1  ;;  %v3439_v37 = vld [vmem:[%s4424_s18 + $0x2] ss:$0 sm:$0xff] }
 0x14b   : > { %v823_v4 = vadd.f32 %v3343_v47, %v796_v60  ;;  %v3376_v5 = vmax.f32 %v836_v61, 0.0  ;;  %v811_v6 = vmul.f32 %v2681_v28, %v3336_v43  ;;  %v833_v10 = vadd.f32 %v3343_v47, %v806_v0  ;;  %v3469_v56 = vld [vmem:[%s4424_s18 + $0x3] ss:$0 sm:$0xff]  ;;  %s2360_s27 = scalar_lea.sflag [#allocation6], %s3219_s10  ;;  %s2916_s8 = scalar_lea.vmem %s4292_s25, 2048 }
 0x14c   : > { %v4383_v59 = vrot.slane %v3354_v55, 7  ;;  %v4381_v62 = vrot.slane %v3352_v54, 7  ;;  %4422 = vst [vmem:[#allocation24_spill] sm:$0xff] %v3366_v1  ;;  %v3388_v11 = vmax.f32 %v824_v63, 0.0  ;;  %vm1351_vm4 = vcmp.lt.s32.totalorder %v3345_v48, 7  ;;  %p2917_p8 = scmp.ne.s32.totalorder %s4292_s25, %s2916_s8  ;;  %p4536_p9 = scmp.ne.s32.totalorder %s4416_s19, 0 }
 0x14d   : > { %2690 = vmatmul.mubr.msk.f32.gmra.mrb[8].mxu1 %vm485_vm0, %v687_v41  ;;  %4423 = vst [vmem:[#allocation25_spill] sm:$0xff] %v3376_v5  ;;  %v4385_v9 = vrot.slane %v3376_v5, 1  ;;  %v998_v12 = vand.u32 15, %v878_v2  ;;  %v4382_v13 = vrot.slane %v3366_v1, 7  ;;  %v3394_v14 = vmax.f32 %v823_v4, 0.0 }
 0x14e   : > { %v1236_v3 = vsel %vm1230_vm2, %v4381_v62, %v4383_v59  ;;  %v3397_v15 = vadd.s32 8, %v3345_v48  ;;  %v4377_v17 = vrot.slane %v3354_v55, 1  ;;  %v798_v18 = vmul.f32 %v3336_v43, %v3300_v25  ;;  %p2918_p12 = pnand %p2917_p8, %p4536_p9 }
 0x14f   : > { %v3384_v8 = vsel %vm1204_vm3, %v1236_v3, 0.0  ;;  %v838_v19 = vadd.f32 %v3343_v47, %v811_v6  ;;  %v4384_v20 = vrot.slane %v3376_v5, 7  ;;  %v1493_v22 = vmul.f32 %v3402_v16, %v3354_v55 }
 0x150   : > { %4425 = vst [vmem:[#allocation26_spill] sm:$0xff] %v3384_v8  ;;  %v1453_v21 = vmul.f32 %v3382_v7, %v3384_v8  ;;  %v3415_v24 = vadd.s32 16, %v3345_v48  ;;  %v3423_v25 = vsel %vm1351_vm4, %v4377_v17, %v4385_v9  ;;  %v799_v26 = vmul.f32 %v3298_v23, %v3336_v43  ;;  %p2919_p0 = pneg %p2918_p12 }
 0x151   : > { %4426 = vst [vmem:[#allocation27_spill] sm:$0xff] %v3423_v25  ;;  %v1213_v28 = vrot.slane %v3388_v11, 7  ;;  %vm1206_vm5 = vcmp.ge.s32.totalorder %v998_v12, 1  ;;  %v1234_v30 = vsel %vm1230_vm2, %v4384_v20, %v4382_v13  ;;  %v825_v23 = vadd.f32 %v3343_v47, %v798_v18 }
 0x152   : > { %v3446_v38 = vmax.f32 %v833_v10, 0.0  ;;  %v4379_v39 = vrot.slane %v3394_v14, 7  ;;  %v3449_v40 = vmax.f32 %v838_v19, 0.0  ;;  %v1509_v41 = vadd.f32 %v1493_v22, %v1453_v21 }
 0x153   : > { %v1533_v42 = vmul.f32 %v3439_v37, %v3423_v25  ;;  %v4380_v45 = vrot.slane %v3394_v14, 1  ;;  %v3455_v46 = vsel %vm1206_vm5, %v1234_v30, 0.0  ;;  %v826_v49 = vadd.f32 %v3343_v47, %v799_v26  ;;  %v3506_v26 = vld [vmem:[%s4424_s18 + $0x4] ss:$0 sm:$0xff] }
 0x154   : > { %4427 = vst [vmem:[#allocation28_spill] sm:$0xff] %v3455_v46  ;;  %v1247_v50 = vsel %vm1230_vm2, %v4379_v39, %v1213_v28  ;;  %v4378_v51 = vrot.slane %v3449_v40, 1  ;;  %v800_v52 = vmul.f32 %v3336_v43, %v3304_v29  ;;  %v866_v53 = vadd.s32 32, %v3345_v48 }
 0x155   : > { %v3473_v58 = vadd.s32 144, %v3345_v48  ;;  %v3475_v60 = vmax.f32 %v825_v23, 0.0  ;;  %v865_v61 = vadd.s32 24, %v3345_v48  ;;  %v4386_v63 = vrot.slane %v3366_v1, 1 }
 0x156   : > { %v1549_v0 = vadd.f32 %v1533_v42, %v1509_v41  ;;  %v1573_v29 = vmul.f32 %v3469_v56, %v3455_v46  ;;  %v1334_v2 = vrot.slane %v3388_v11, 1  ;;  %v1442_v3 = vmul.f32 %v3382_v7, %v1247_v50 }
 0x157   : > { %v3485_v4 = vmul.f32 %v3402_v16, %v3394_v14  ;;  %v3488_v10 = vmax.f32 %v826_v49, 0.0  ;;  %v3497_v18 = vsel %vm1351_vm4, %v4386_v63, %v4378_v51  ;;  %v827_v19 = vadd.f32 %v3343_v47, %v800_v52 }
 0x158   : > { %4428 = vst [vmem:[#allocation29_spill] sm:$0xff] %v3497_v18  ;;  %v914_v21 = vand.u32 15, %v866_v53  ;;  %v3501_v22 = vmul.f32 %v3469_v56, %v1247_v50  ;;  %v907_v30 = vand.u32 15, %v865_v61  ;;  %v1214_v23 = vrot.slane %v3475_v60, 7  ;;  %v3516_v50 = vld [vmem:[%s4424_s18 + $0x5] ss:$0 sm:$0xff] }
 0x159   : > { %v1335_v41 = vrot.slane %v3475_v60, 1  ;;  %v1589_v49 = vadd.f32 %v1573_v29, %v1549_v0  ;;  %v1613_v52 = vmul.f32 %v3506_v26, %v3366_v1  ;;  %v1368_v53 = vsel %vm1351_vm4, %v4380_v45, %v1334_v2 }
 0x15a   : > { %4429 = vst [vmem:[#allocation30_spill] sm:$0xff] %v3501_v22  ;;  %v3524_v61 = vmul.f32 %v3506_v26, %v3388_v11  ;;  %v1653_v0 = vmul.f32 %v3516_v50, %v3497_v18  ;;  %v1336_v29 = vrot.slane %v3488_v10, 1  ;;  %v801_v17 = vmul.f32 %v3302_v27, %v3336_v43 }
 0x15b   : > { %v3531_v51 = vmax.f32 %v827_v19, 0.0  ;;  %vm1194_vm6 = vcmp.ge.s32.totalorder %v914_v21, 1  ;;  %v867_v39 = vadd.s32 40, %v3345_v48  ;;  %v868_v42 = vadd.s32 48, %v3345_v48 }
 0x15c   : > { %4430 = vst [vmem:[#allocation31_spill] sm:$0xff] %v3524_v61  ;;  %v1246_v45 = vsel %vm1230_vm2, %v1213_v28, %v1214_v23  ;;  %vm1314_vm7 = vcmp.le.s32.totalorder %v907_v30, 14  ;;  %v1367_v6 = vsel %vm1351_vm4, %v1334_v2, %v1335_v41  ;;  %v3540_v62 = vmul.f32 %v3439_v37, %v1368_v53 }
 0x15d   : > { %v1629_v13 = vadd.f32 %v1613_v52, %v1589_v49  ;;  %v1337_v27 = vrot.slane %v3531_v51, 1  ;;  %v1483_v19 = vmul.f32 %v3402_v16, %v3475_v60  ;;  %v802_v21 = vmul.f32 %v3336_v43, %v3308_v32 }
 0x15e   : > { %v1366_v12 = vsel %vm1351_vm4, %v1335_v41, %v1336_v29  ;;  %v3551_v28 = vmul.f32 %v3506_v26, %v3394_v14  ;;  %v3554_v2 = vmul.f32 %v3516_v50, %v1368_v53  ;;  %v828_v30 = vadd.f32 %v3343_v47, %v801_v17 }
 0x15f   : > { %v1295_v49 = vsel %vm1194_vm6, %v1246_v45, 0.0  ;;  %v1415_v52 = vsel %vm1314_vm7, %v1367_v6, 0.0  ;;  %v921_v57 = vand.u32 15, %v867_v39  ;;  %v1482_v35 = vmul.f32 %v3402_v16, %v3388_v11  ;;  %v3571_v11 = vld [vmem:[%s4424_s18 + $0x6] ss:$0 sm:$0xff] }
 0x160   : > { %4431 = vst [vmem:[#allocation32_spill] sm:$0xff] %v3551_v28  ;;  %4432 = vst [vmem:[#allocation33_spill] sm:$0xff] %v3554_v2  ;;  %v1443_v32 = vmul.f32 %v3382_v7, %v1295_v49  ;;  %v1215_v44 = vrot.slane %v3488_v10, 7  ;;  %v928_v41 = vand.u32 15, %v868_v42  ;;  %v1216_v59 = vrot.slane %v3531_v51, 7 }
 0x161   : > { %v3562_v20 = vadd.f32 %v1653_v0, %v1629_v13  ;;  %v1365_v53 = vsel %vm1351_vm4, %v1336_v29, %v1337_v27  ;;  %v1523_v17 = vmul.f32 %v3439_v37, %v1366_v12  ;;  %v829_v45 = vadd.f32 %v3343_v47, %v802_v21  ;;  %v3587_v0 = vld [vmem:[%s4424_s18 + $0x7] ss:$0 sm:$0xff] }
 0x162   : > { %v3574_v39 = vmul.f32 %v3469_v56, %v1295_v49  ;;  %v3577_v6 = vmul.f32 %v3516_v50, %v1415_v52  ;;  %v3580_v13 = vmul.f32 %v3516_v50, %v1366_v12  ;;  %v3582_v42 = vmax.f32 %v828_v30, 0.0  ;;  %v3600_v30 = vld [vmem:[%s4424_s18 + $0x8] ss:$0 sm:$0xff] }
 0x163   : > { %4433 = vst [vmem:[#allocation34_spill] sm:$0xff] %v3562_v20  ;;  %v3590_v29 = vmul.f32 %v3571_v11, %v1295_v49  ;;  %vm1316_vm8 = vcmp.le.s32.totalorder %v921_v57, 14  ;;  %v1498_v21 = vadd.f32 %v1482_v35, %v1442_v3  ;;  %v1522_v36 = vmul.f32 %v3439_v37, %v1415_v52 }
 0x164   : > { %4434 = vst [vmem:[#allocation35_spill] sm:$0xff] %v3574_v39  ;;  %4435 = vst [vmem:[#allocation36_spill] sm:$0xff] %v3577_v6  ;;  %v1499_v9 = vadd.f32 %v1483_v19, %v1443_v32  ;;  %v3595_v63 = vmul.f32 %v3587_v0, %v3475_v60  ;;  %vm1196_vm9 = vcmp.ge.s32.totalorder %v928_v41, 1  ;;  %v1244_v18 = vsel %vm1230_vm2, %v1215_v44, %v1216_v59 }
 0x165   : > { %4436 = vst [vmem:[#allocation37_spill] sm:$0xff] %v3580_v13  ;;  %4437 = vst [vmem:[#allocation38_spill] sm:$0xff] %v3590_v29  ;;  %v3605_v49 = vmul.f32 %v3600_v30, %v1366_v12  ;;  %v3609_v35 = vmul.f32 %v3587_v0, %v3488_v10  ;;  %v3611_v57 = vmax.f32 %v829_v45, 0.0  ;;  %v869_v3 = vadd.s32 56, %v3345_v48 }
 0x166   : > { %4438 = vst [vmem:[#allocation39_spill] sm:$0xff] %v3595_v63  ;;  %v1245_v19 = vsel %vm1230_vm2, %v1214_v23, %v1215_v44  ;;  %v1417_v52 = vsel %vm1316_vm8, %v1365_v53, 0.0  ;;  %v1338_v32 = vrot.slane %v3582_v42, 1  ;;  %v1217_v41 = vrot.slane %v3582_v42, 7 }
 0x167   : > { %4439 = vst [vmem:[#allocation40_spill] sm:$0xff] %v3605_v49  ;;  %4440 = vst [vmem:[#allocation41_spill] sm:$0xff] %v3609_v35  ;;  %v1297_v46 = vsel %vm1196_vm9, %v1244_v18, 0.0  ;;  %v1538_v25 = vadd.f32 %v1522_v36, %v1498_v21  ;;  %v1562_v12 = vmul.f32 %v3469_v56, %v1245_v19  ;;  %v870_v49 = vadd.s32 64, %v3345_v48 }
 0x168   : > { %v1539_v63 = vadd.f32 %v1523_v17, %v1499_v9  ;;  %v1445_v45 = vmul.f32 %v3382_v7, %v1297_v46  ;;  %v1485_v35 = vmul.f32 %v3402_v16, %v3531_v51  ;;  %v803_v44 = vmul.f32 %v3306_v31, %v3336_v43 }
 0x169   : > { %v3626_v23 = vmul.f32 %v3571_v11, %v1245_v19  ;;  %v3630_v18 = vmul.f32 %v3506_v26, %v3475_v60  ;;  %v935_v36 = vand.u32 15, %v869_v3  ;;  %v1339_v53 = vrot.slane %v3611_v57, 1 }
 0x16a   : > { %v3634_v9 = vmul.f32 %v3600_v30, %v1417_v52  ;;  %v1364_v17 = vsel %vm1351_vm4, %v1337_v27, %v1338_v32  ;;  %v1563_v21 = vmul.f32 %v3469_v56, %v1297_v46  ;;  %v1243_v31 = vsel %vm1230_vm2, %v1216_v59, %v1217_v41 }
 0x16b   : > { %4441 = vst [vmem:[#allocation42_spill] sm:$0xff] %v3626_v23  ;;  %4442 = vst [vmem:[#allocation43_spill] sm:$0xff] %v3630_v18  ;;  %v1578_v8 = vadd.f32 %v1562_v12, %v1538_v25  ;;  %v1602_v29 = vmul.f32 %v3506_v26, %v3488_v10  ;;  %v942_v60 = vand.u32 15, %v870_v49  ;;  %v1218_v3 = vrot.slane %v3611_v57, 7 }
 0x16c   : > { %4443 = vst [vmem:[#allocation44_spill] sm:$0xff] %v3634_v9  ;;  %v1501_v2 = vadd.f32 %v1485_v35, %v1445_v45  ;;  %v3645_v23 = vmul.f32 %v3571_v11, %v1297_v46  ;;  %v3649_v9 = vmul.f32 %v3587_v0, %v3531_v51  ;;  %v830_v27 = vadd.f32 %v3343_v47, %v803_v44 }
 0x16d   : > { %v1525_v28 = vmul.f32 %v3439_v37, %v1364_v17  ;;  %vm1318_vm10 = vcmp.le.s32.totalorder %v935_v36, 14  ;;  %v1363_v59 = vsel %vm1351_vm4, %v1338_v32, %v1339_v53  ;;  %v804_v25 = vmul.f32 %v3336_v43, %v3312_v34 }
 0x16e   : > { %4444 = vst [vmem:[#allocation45_spill] sm:$0xff] %v3645_v23  ;;  %4445 = vst [vmem:[#allocation46_spill] sm:$0xff] %v3649_v9  ;;  %v1643_v49 = vmul.f32 %v3516_v50, %v1364_v17  ;;  %v3659_v46 = vmul.f32 %v3600_v30, %v1364_v17  ;;  %v1446_v35 = vmul.f32 %v3382_v7, %v1243_v31  ;;  %vm1198_vm11 = vcmp.ge.s32.totalorder %v942_v60, 1 }
 0x16f   : > { %v1486_v12 = vmul.f32 %v3402_v16, %v3582_v42  ;;  %v1618_v45 = vadd.f32 %v1602_v29, %v1578_v8  ;;  %v1642_v44 = vmul.f32 %v3516_v50, %v1417_v52  ;;  %v1242_v32 = vsel %vm1230_vm2, %v1217_v41, %v1218_v3 }
 0x170   : > { %4446 = vst [vmem:[#allocation47_spill] sm:$0xff] %v3659_v46  ;;  %v1419_v36 = vsel %vm1318_vm10, %v1363_v59, 0.0  ;;  %v3667_v9 = vmax.f32 %v830_v27, 0.0  ;;  %v1444_v34 = vmul.f32 %v3382_v7, %v1245_v19  ;;  %v1484_v17 = vmul.f32 %v3402_v16, %v3488_v10 }
 0x171   : > { %v1541_v46 = vadd.f32 %v1525_v28, %v1501_v2  ;;  %v1579_v23 = vadd.f32 %v1563_v21, %v1539_v63  ;;  %v1603_v13 = vmul.f32 %v3506_v26, %v3531_v51  ;;  %v831_v8 = vadd.f32 %v3343_v47, %v804_v25 }
 0x172   : > { %v1564_v29 = vmul.f32 %v3469_v56, %v1243_v31  ;;  %v1682_v60 = vmul.f32 %v3571_v11, %v1243_v31  ;;  %v1299_v41 = vsel %vm1198_vm11, %v1242_v32, 0.0  ;;  %v805_v27 = vmul.f32 %v3310_v33, %v3336_v43 }
 0x173   : > { %v1502_v59 = vadd.f32 %v1486_v12, %v1446_v35  ;;  %v1526_v19 = vmul.f32 %v3439_v37, %v1419_v36  ;;  %v1658_v6 = vadd.f32 %v1642_v44, %v1618_v45  ;;  %v1722_v63 = vmul.f32 %v3587_v0, %v3582_v42 }
 0x174   : > { %v1340_v10 = vrot.slane %v3667_v9, 1  ;;  %v1487_v51 = vmul.f32 %v3402_v16, %v3611_v57  ;;  %v1500_v28 = vadd.f32 %v1484_v17, %v1444_v34  ;;  %v1524_v2 = vmul.f32 %v3439_v37, %v1417_v52 }
 0x175   : > { %v1447_v21 = vmul.f32 %v3382_v7, %v1299_v41  ;;  %v1619_v31 = vadd.f32 %v1603_v13, %v1579_v23  ;;  %v3687_v25 = vmax.f32 %v831_v8, 0.0  ;;  %v871_v33 = vadd.s32 72, %v3345_v48 }
 0x176   : > { %v1644_v35 = vmul.f32 %v3516_v50, %v1419_v36  ;;  %v1219_v12 = vrot.slane %v3667_v9, 7  ;;  %v832_v45 = vadd.f32 %v3343_v47, %v805_v27  ;;  %v872_v44 = vadd.s32 80, %v3345_v48 }
 0x177   : > { %v3694_v32 = vadd.f32 %v1526_v19, %v1502_v59  ;;  %v1698_v34 = vadd.f32 %v1682_v60, %v1658_v6  ;;  %v1762_v52 = vmul.f32 %v3600_v30, %v1419_v36  ;;  %v1723_v13 = vmul.f32 %v3587_v0, %v3611_v57 }
 0x178   : > { %v1362_v23 = vsel %vm1351_vm4, %v1339_v53, %v1340_v10  ;;  %v1565_v17 = vmul.f32 %v3469_v56, %v1299_v41  ;;  %v1683_v8 = vmul.f32 %v3571_v11, %v1299_v41  ;;  %v1540_v20 = vadd.f32 %v1524_v2, %v1500_v28 }
 0x179   : > { %v1503_v18 = vadd.f32 %v1487_v51, %v1447_v21  ;;  %v1659_v27 = vadd.f32 %v1643_v49, %v1619_v31  ;;  %v949_v61 = vand.u32 15, %v871_v33  ;;  %v1341_v59 = vrot.slane %v3687_v25, 1 }
 0x17a   : > { %v1241_v6 = vsel %vm1230_vm2, %v1218_v3, %v1219_v12  ;;  %v3706_v36 = vmax.f32 %v832_v45, 0.0  ;;  %v956_v60 = vand.u32 15, %v872_v44  ;;  %v1220_v19 = vrot.slane %v3687_v25, 7 }
 0x17b   : > { %v1738_v39 = vadd.f32 %v1722_v63, %v1698_v34  ;;  %v1527_v53 = vmul.f32 %v3439_v37, %v1362_v23  ;;  %v1645_v22 = vmul.f32 %v3516_v50, %v1362_v23  ;;  %v873_v41 = vadd.s32 88, %v3345_v48 }
 0x17c   : > { %v1580_v51 = vadd.f32 %v1564_v29, %v1540_v20  ;;  %v1604_v49 = vmul.f32 %v3506_v26, %v3582_v42  ;;  %v1581_v28 = vadd.f32 %v1565_v17, %v1541_v46  ;;  %v1605_v3 = vmul.f32 %v3506_v26, %v3611_v57 }
 0x17d   : > { %v1699_v2 = vadd.f32 %v1683_v8, %v1659_v27  ;;  %vm1320_vm12 = vcmp.le.s32.totalorder %v949_v61, 14  ;;  %v1361_v21 = vsel %vm1351_vm4, %v1340_v10, %v1341_v59  ;;  %v1448_v63 = vmul.f32 %v3382_v7, %v1241_v6 }
 0x17e   : > { %v1488_v31 = vmul.f32 %v3402_v16, %v3667_v9  ;;  %vm1200_vm13 = vcmp.ge.s32.totalorder %v956_v60, 1  ;;  %v1240_v20 = vsel %vm1230_vm2, %v1219_v12, %v1220_v19  ;;  %v1221_v42 = vrot.slane %v3706_v36, 7 }
 0x17f   : > { %v1763_v46 = vmul.f32 %v3600_v30, %v1362_v23  ;;  %v1342_v57 = vrot.slane %v3706_v36, 1  ;;  %v963_v29 = vand.u32 15, %v873_v41  ;;  %v4393_v61 = vrot.slane %v3446_v38, 1 }
 0x180   : > { %v3727_v33 = vadd.f32 %v1762_v52, %v1738_v39  ;;  %v1421_v10 = vsel %vm1320_vm12, %v1361_v21, 0.0  ;;  %v1620_v45 = vadd.f32 %v1604_v49, %v1580_v51  ;;  %v1621_v44 = vadd.f32 %v1605_v3, %v1581_v28 }
 0x181   : > { %v3729_v34 = vadd.f32 %v1527_v53, %v1503_v18  ;;  %v1739_v17 = vadd.f32 %v1723_v13, %v1699_v2  ;;  %v1301_v8 = vsel %vm1200_vm13, %v1240_v20, 0.0  ;;  %v877_v12 = vadd.s32 120, %v3345_v48 }
 0x182   : > { %4447 = vst [vmem:[#allocation48_spill] sm:$0xff] %v3727_v33  ;;  %v1504_v27 = vadd.f32 %v1488_v31, %v1448_v63  ;;  %v1566_v60 = vmul.f32 %v3469_v56, %v1241_v6  ;;  %v1684_v23 = vmul.f32 %v3571_v11, %v1241_v6  ;;  %v1239_v39 = vsel %vm1230_vm2, %v1220_v19, %v1221_v42 }
 0x183   : > { %v1528_v52 = vmul.f32 %v3439_v37, %v1421_v10  ;;  %v1489_v18 = vmul.f32 %v3402_v16, %v3687_v25  ;;  %vm1322_vm14 = vcmp.le.s32.totalorder %v963_v29, 14  ;;  %v1359_v13 = vsel %vm1351_vm4, %v1342_v57, %v4393_v61 }
 0x184   : > { %v1660_v53 = vadd.f32 %v1644_v35, %v1620_v45  ;;  %v1449_v41 = vmul.f32 %v3382_v7, %v1301_v8  ;;  %v1661_v6 = vadd.f32 %v1645_v22, %v1621_v44  ;;  %v1685_v51 = vmul.f32 %v3571_v11, %v1301_v8 }
 0x185   : > { %v1360_v19 = vsel %vm1351_vm4, %v1341_v59, %v1342_v57  ;;  %v1450_v49 = vmul.f32 %v3382_v7, %v1239_v39  ;;  %v1490_v28 = vmul.f32 %v3402_v16, %v3706_v36  ;;  %v991_v3 = vand.u32 15, %v877_v12 }
 0x186   : > { %v3752_v2 = vadd.f32 %v1763_v46, %v1739_v17  ;;  %v3755_v21 = vmul.f32 %v3516_v50, %v1421_v10  ;;  %v1724_v22 = vmul.f32 %v3587_v0, %v3667_v9  ;;  %v3759_v35 = vsel %vm1322_vm14, %v1359_v13, 0.0 }
 0x187   : > { %4449 = vst [vmem:[#allocation50_spill] sm:$0xff] %v3759_v35  ;;  %v3761_v63 = vadd.f32 %v1528_v52, %v1504_v27  ;;  %v3764_v59 = vmul.f32 %v3600_v30, %v1421_v10  ;;  %v1567_v31 = vmul.f32 %v3469_v56, %v1301_v8  ;;  %v1725_v20 = vmul.f32 %v3587_v0, %v3687_v25 }
 0x188   : > { %4448 = vst [vmem:[#allocation49_spill] sm:$0xff] %v3752_v2  ;;  %v1700_v46 = vadd.f32 %v1684_v23, %v1660_v53  ;;  %v1505_v57 = vadd.f32 %v1489_v18, %v1449_v41  ;;  %v1529_v29 = vmul.f32 %v3439_v37, %v1360_v19  ;;  %v1701_v45 = vadd.f32 %v1685_v51, %v1661_v6 }
 0x189   : > { %4450 = vst [vmem:[#allocation51_spill] sm:$0xff] %v3764_v59  ;;  %v1506_v44 = vadd.f32 %v1490_v28, %v1450_v49  ;;  %v1530_v17 = vmul.f32 %v3439_v37, %v3759_v35  ;;  %vm1326_vm15 = vcmp.le.s32.totalorder %v991_v3, 14  ;;  %v4451_v12 = vrot.slane %v3366_v1, 1 }
 0x18a   : > { %v4452_v10 = vrot.slane %v3376_v5, 1  ;;  %v4453_v27 = vstv %s3390_s20  ;;  %v1582_v23 = vadd.f32 %v1566_v60, %v3694_v32  ;;  %v1606_v18 = vmul.f32 %v3506_v26, %v3667_v9  ;;  %s2595_s20 = sshll.u32 %s3002_s24, 4 }
 0x18b   : > { %vm3780_vm3 = vcmp.eq.s32.totalorder %v4453_v27, 1  ;;  %v874_v13 = vadd.s32 96, %v3345_v48  ;;  %v4456_v53 = vrot.slane %v3376_v5, 7  ;;  %v4457_v41 = vrot.slane %v3354_v55, 7  ;;  %s2373_s24 = sadd.s32 %s2595_s20, %s2588_s7 }
 0x18c   : > { %v1355_v8 = vsel %vm1351_vm4, %v4452_v10, %v4451_v12  ;;  %v3797_v51 = vmul.f32 %v3516_v50, %v1360_v19  ;;  %v3800_v49 = vmul.f32 %v3600_v30, %v1360_v19  ;;  %v1494_v9 = vmul.f32 %v3402_v16, %v3376_v5 }
 0x18d   : > { %v3794_v6 = vsel %vm1230_vm2, %v4457_v41, %v4456_v53  ;;  %v3806_v60 = vadd.f32 %v1724_v22, %v1700_v46  ;;  %v3808_v28 = vadd.f32 %v1529_v29, %v1505_v57  ;;  %v3811_v3 = vmul.f32 %v3469_v56, %v1239_v39 }
 0x18e   : > { %4458 = vst [vmem:[#allocation52_spill] sm:$0xff] %v3800_v49  ;;  %v1454_v32 = vmul.f32 %v3382_v7, %v3794_v6  ;;  %v3813_v12 = vsel %vm1326_vm15, %v1355_v8, 0.0  ;;  %v3815_v10 = vadd.f32 %v1725_v20, %v1701_v45  ;;  %v3817_v27 = vadd.f32 %v1530_v17, %v1506_v44 }
 0x18f   : > { %4459 = vst [vmem:[#allocation53_spill] sm:$0xff] %v3806_v60  ;;  %4460 = vst [vmem:[#allocation54_spill] sm:$0xff] %v3813_v12  ;;  %v3821_v19 = vmul.f32 %v3516_v50, %v3759_v35  ;;  %v3824_v53 = vmul.f32 %v3571_v11, %v1239_v39  ;;  %v4463_v46 = vand.u32 15, %v3415_v24  ;;  %v4466_v20 = vand.u32 15, %v3397_v15 }
 0x190   : > { %4461 = vst [vmem:[#allocation55_spill] sm:$0xff] %v3815_v10  ;;  %v3838_v45 = vadd.f32 %v1606_v18, %v1582_v23  ;;  %v970_v44 = vand.u32 15, %v874_v13  ;;  %v1222_v17 = vrot.slane %v3446_v38, 7  ;;  %v3845_v41 = vmul.f32 %v3402_v16, %v3446_v38 }
 0x191   : > { %4462 = vst [vmem:[#allocation56_spill] sm:$0xff] %v3821_v19  ;;  %vm3828_vm5 = vcmp.ge.s32.totalorder %v4463_v46, 1  ;;  %vm3834_vm6 = vcmp.le.s32.totalorder %v4466_v20, 14  ;;  %v1510_v46 = vadd.f32 %v1494_v9, %v1454_v32  ;;  %v1534_v15 = vmul.f32 %v3439_v37, %v3813_v12 }
 0x192   : > { %v4469_v23 = vstv %s3443_s29  ;;  %v1583_v13 = vadd.f32 %v1567_v31, %v3729_v34  ;;  %v4472_v61 = vrot.slane %v3449_v40, 7  ;;  %v4473_v39 = vrot.slane %v3366_v1, 7  ;;  %s4530_s29 = sld [smem:[#allocation62_spill]] }
 0x193   : > { %vm3852_vm7 = vcmp.eq.s32.totalorder %v4469_v23, 1  ;;  %v4475_v34 = vrot.slane %v3352_v54, 1  ;;  %v4476_v31 = vrot.slane %v3446_v38, 1  ;;  %v879_v23 = vadd.s32 136, %v3345_v48 }
 0x194   : > { %v3865_v32 = vsel %vm1230_vm2, %v4473_v39, %v4472_v61  ;;  %vm1202_vm8 = vcmp.ge.s32.totalorder %v970_v44, 1  ;;  %v4477_v1 = vrot.slane %v3352_v54, 7  ;;  %v4485_v52 = vrot.slane %v3394_v14, 1 }
 0x195   : > { %4474 = vst [vmem:[#allocation57_spill] sm:$0xff] %v3865_v32  ;;  %vm1792_vm13 = vcmask 31744  }
 0x21c   : > { %v2688_v22 = vpop.f32.mrb[6].mxu1 }
 0x21d   : > { %v795_v8 = vmul.f32 %v2688_v22, %v3336_v43  ;;  %v768_v24 = vpop.f32.mrb[7].mxu1  ;;  %v1607_v22 = vmul.f32 %v3506_v26, %v3687_v25  ;;  %v3878_v25 = vsel %vm1351_vm4, %v4476_v31, %v4475_v34  ;;  %v1550_v34 = vadd.f32 %v1534_v15, %v1510_v46 }
 0x21e   : > { %v794_v20 = vmul.f32 %v3336_v43, %v768_v24  ;;  %v1238_v24 = vsel %vm1230_vm2, %v1221_v42, %v1222_v17  ;;  %v3887_v42 = vsel %vm1230_vm2, %v1222_v17, %v4477_v1  ;;  %v1574_v31 = vmul.f32 %v3469_v56, %v3865_v32 }
 0x21f   : > { %v822_v9 = vadd.f32 %v3343_v47, %v795_v8  ;;  %v875_v8 = vadd.s32 104, %v3345_v48  ;;  %v3901_v1 = vmul.f32 %v3439_v37, %v3878_v25  ;;  %v3903_v17 = vadd.f32 %v1607_v22, %v1583_v13 }
 0x220   : > { %v821_v61 = vadd.f32 %v3343_v47, %v794_v20  ;;  %v2691_v39 = vpop.f32.mrb[8].mxu1  ;;  %v4478_v20 = vand.u32 15, %v3345_v48  ;;  %v881_v13 = vadd.s32 152, %v3345_v48 }
 0x221   : > { %v842_v12 = vmax.f32 %v822_v9, 0.0  ;;  %v813_v2 = vmul.f32 %v2691_v39, %v3336_v43  ;;  %v778_v33 = vpop.f32.mrb[9].mxu1  ;;  %v3908_v9 = vsel %vm1202_vm8, %v1238_v24, 0.0  ;;  %v4484_v24 = vrot.slane %v3394_v14, 7 }
 0x222   : > { %v841_v35 = vmax.f32 %v821_v61, 0.0  ;;  %vm3894_vm9 = vcmp.ge.s32.totalorder %v4478_v20, 1  ;;  %v812_v5 = vmul.f32 %v3336_v43, %v778_v33  ;;  %v1005_v61 = vand.u32 15, %v879_v23 }
 0x223   : > { %v1171_v46 = vsel %vm3780_vm3, %v842_v12, 0.0  ;;  %v840_v15 = vadd.f32 %v3343_v47, %v813_v2  ;;  %v4481_v43 = vand.u32 15, %v3473_v58  ;;  %v1590_v2 = vadd.f32 %v1574_v31, %v1550_v34 }
 0x224   : > { %v1211_v39 = vrot.slane %v1171_v46, 7  ;;  %v1332_v20 = vrot.slane %v1171_v46, 1  ;;  %v1170_v32 = vsel %vm3780_vm3, %v841_v35, 0.0  ;;  %v839_v35 = vadd.f32 %v3343_v47, %v812_v5 }
 0x225   : > { %vm3914_vm10 = vcmp.ge.s32.totalorder %v4481_v43, 1  ;;  %v1210_v22 = vrot.slane %v1170_v32, 7  ;;  %v1331_v12 = vrot.slane %v1170_v32, 1  ;;  %v860_v49 = vmax.f32 %v840_v15, 0.0 }
 0x226   : > { %v1248_v23 = vsel %vm1230_vm2, %v1211_v39, %v4484_v24  ;;  %v1369_v58 = vsel %vm1351_vm4, %v1332_v20, %v4485_v52  ;;  %v1614_v43 = vmul.f32 %v3506_v26, %v3449_v40  ;;  %v1480_v24 = vmul.f32 %v3402_v16, %v1171_v46 }
 0x227   : > { %v1293_v10 = vsel %vm3828_vm5, %v1248_v23, 0.0  ;;  %v1413_v34 = vsel %vm3834_vm6, %v1369_v58, 0.0  ;;  %v1249_v31 = vsel %vm1230_vm2, %v1210_v22, %v1211_v39  ;;  %v1370_v14 = vsel %vm1351_vm4, %v1331_v12, %v1332_v20 }
 0x228   : > { %v1441_v15 = vmul.f32 %v3382_v7, %v1293_v10  ;;  %v1440_v47 = vmul.f32 %v3382_v7, %v1249_v31  ;;  %v977_v5 = vand.u32 15, %v875_v8  ;;  %v1520_v52 = vmul.f32 %v3439_v37, %v1413_v34 }
 0x229   : > { %v1189_v57 = vsel %vm3852_vm7, %v860_v49, 0.0  ;;  %v859_v29 = vmax.f32 %v839_v35, 0.0  ;;  %v1451_v23 = vmul.f32 %v3382_v7, %v3908_v9  ;;  %vm3949_vm11 = vcmp.le.s32.totalorder %v1005_v61, 14 }
 0x22a   : > { %v1497_v39 = vadd.f32 %v3485_v4, %v1441_v15  ;;  %v1496_v58 = vadd.f32 %v1480_v24, %v1440_v47  ;;  %v1229_v20 = vrot.slane %v1189_v57, 7  ;;  %v1350_v59 = vrot.slane %v1189_v57, 1 }
 0x22b   : > { %v1188_v46 = vsel %vm3852_vm7, %v859_v29, 0.0  ;;  %v1019_v8 = vand.u32 15, %v881_v13  ;;  %v1630_v34 = vadd.f32 %v1614_v43, %v1590_v2  ;;  %v1479_v4 = vmul.f32 %v3402_v16, %v1170_v32  ;;  %v4490_v2 = vld [vmem:[#allocation30_spill] sm:$0xff]  ;;  %v4494_v29 = vld [vmem:[#allocation31_spill] sm:$0xff] }
 0x22c   : > { %v1536_v60 = vadd.f32 %v1520_v52, %v1496_v58  ;;  %v1250_v49 = vsel %vm1230_vm2, %v1229_v20, %v1210_v22  ;;  %v1228_v35 = vrot.slane %v1188_v46, 7  ;;  %v1349_v19 = vrot.slane %v1188_v46, 1 }
 0x22d   : > { %v1291_v15 = vsel %vm3894_vm9, %v1250_v49, 0.0  ;;  %v1537_v18 = vadd.f32 %v3540_v62, %v1497_v39  ;;  %vm3959_vm12 = vcmp.le.s32.totalorder %v977_v5, 14  ;;  %v1371_v13 = vsel %vm1351_vm4, %v1350_v59, %v1331_v12  ;;  %v4492_v5 = vld [vmem:[#allocation35_spill] sm:$0xff] }
 0x22e   : > { %v1576_v43 = vadd.f32 %v4490_v2, %v1536_v60  ;;  %v1439_v22 = vmul.f32 %v3382_v7, %v1291_v15  ;;  %v1231_v24 = vsel %vm1230_vm2, %v1228_v35, %v1229_v20  ;;  %v4491_v32 = vrot.slane %v3449_v40, 7 }
 0x22f   : > { %v1519_v62 = vmul.f32 %v3439_v37, %v1370_v14  ;;  %v1577_v52 = vadd.f32 %v4492_v5, %v1537_v18  ;;  %v4493_v12 = vrot.slane %v3449_v40, 1  ;;  %v4495_v14 = vld [vmem:[#allocation43_spill] sm:$0xff]  ;;  %v1352_v15 = vsel %vm1351_vm4, %v1349_v19, %v1350_v59  ;;  %v4506_v18 = vld [vmem:[#allocation45_spill] sm:$0xff] }
 0x230   : > { %v1232_v44 = vsel %vm1230_vm2, %v4491_v32, %v1228_v35  ;;  %v1616_v39 = vadd.f32 %v4494_v29, %v1576_v43  ;;  %v1495_v58 = vadd.f32 %v1479_v4, %v1439_v22  ;;  %vm3992_vm2 = vcmp.le.s32.totalorder %v1019_v8, 14  ;;  %v4498_v43 = vld [vmem:[#allocation34_spill] sm:$0xff] }
 0x231   : > { %v1309_v47 = vsel %vm3914_vm10, %v1232_v44, 0.0  ;;  %v1353_v60 = vsel %vm1351_vm4, %v4493_v12, %v1349_v19  ;;  %v1617_v35 = vadd.f32 %v4495_v14, %v1577_v52  ;;  %v1559_v4 = vmul.f32 %v3469_v56, %v1293_v10  ;;  %v4499_v44 = vld [vmem:[#allocation36_spill] sm:$0xff]  ;;  %v4500_v19 = vld [vmem:[#allocation37_spill] sm:$0xff]  ;;  %v4504_v14 = vld [vmem:[#allocation42_spill] sm:$0xff] }
 0x232   : > { %v1693_v20 = vmul.f32 %v3571_v11, %v1309_v47  ;;  %v3985_v49 = vsel %vm3949_vm11, %v1353_v60, 0.0  ;;  %v1535_v2 = vadd.f32 %v1519_v62, %v1495_v58  ;;  %v1733_v31 = vmul.f32 %v3587_v0, %v1188_v46 }
 0x233   : > { %v1654_v33 = vmul.f32 %v3516_v50, %v3985_v49  ;;  %v1694_v32 = vmul.f32 %v3571_v11, %v1231_v24  ;;  %v1656_v47 = vadd.f32 %v4499_v44, %v1616_v39  ;;  %v1773_v5 = vmul.f32 %v3600_v30, %v1352_v15  ;;  %v4503_v39 = vld [vmem:[#allocation32_spill] sm:$0xff] }
 0x234   : > { %v1709_v22 = vadd.f32 %v1693_v20, %v4498_v43  ;;  %v1575_v59 = vadd.f32 %v1559_v4, %v1535_v2  ;;  %v1657_v8 = vadd.f32 %v4500_v19, %v1617_v35  ;;  %v1431_v60 = vsel %vm3992_vm2, %v1371_v13, 0.0  ;;  %v4510_v19 = vld [vmem:[#allocation39_spill] sm:$0xff] }
 0x235   : > { %v1670_v52 = vadd.f32 %v1654_v33, %v1630_v34  ;;  %v1734_v10 = vmul.f32 %v3587_v0, %v1189_v57  ;;  %v1507_v62 = vadd.f32 %v3845_v41, %v1451_v23  ;;  %v4501_v46 = vrot.slane %v3354_v55, 1  ;;  %v4505_v33 = vld [vmem:[#allocation33_spill] sm:$0xff] }
 0x236   : > { %v1749_v12 = vadd.f32 %v1733_v31, %v1709_v22  ;;  %v4502_v24 = vrot.slane %v3352_v54, 1  ;;  %v1615_v58 = vadd.f32 %v4503_v39, %v1575_v59  ;;  %v1569_v20 = vmul.f32 %v3469_v56, %v3908_v9 }
 0x237   : > { %v1710_v34 = vadd.f32 %v1694_v32, %v1670_v52  ;;  %v1452_v13 = vmul.f32 %v3382_v7, %v3887_v42  ;;  %v1696_v41 = vadd.f32 %v4504_v14, %v1656_v47  ;;  %v1492_v23 = vmul.f32 %v3402_v16, %v3352_v54  ;;  %v4507_v32 = vld [vmem:[#allocation38_spill] sm:$0xff] }
 0x238   : > { %v1357_v29 = vsel %vm1351_vm4, %v4502_v24, %v4501_v46  ;;  %v4018_v57 = vadd.f32 %v1773_v5, %v1749_v12  ;;  %v1774_v48 = vmul.f32 %v3600_v30, %v1431_v60  ;;  %v1655_v15 = vadd.f32 %v4505_v33, %v1615_v58  ;;  %v4508_v5 = vld [vmem:[#allocation26_spill] sm:$0xff]  ;;  %v4509_v12 = vld [vmem:[#allocation41_spill] sm:$0xff] }
 0x239   : > { %v1750_v35 = vadd.f32 %v1734_v10, %v1710_v34  ;;  %v1697_v4 = vadd.f32 %v4506_v18, %v1657_v8  ;;  %v4028_v2 = vsel %vm3959_vm12, %v1357_v29, 0.0  ;;  %v1570_v7 = vmul.f32 %v3469_v56, %v3887_v42  ;;  %v4511_v60 = vld [vmem:[#allocation46_spill] sm:$0xff] }
 0x23a   : > { %v1547_v43 = vadd.f32 %v3901_v1, %v1507_v62  ;;  %v1584_v22 = vadd.f32 %v3811_v3, %v3761_v63  ;;  %v1608_v16 = vmul.f32 %v3506_v26, %v3706_v36  ;;  %v1695_v44 = vadd.f32 %v4507_v32, %v1655_v15  ;;  %v4519_v32 = vld [vmem:[#allocation55_spill] sm:$0xff] }
 0x23b   : > { %v4037_v31 = vadd.f32 %v1774_v48, %v1750_v35  ;;  %v1585_v47 = vadd.f32 %v1569_v20, %v3808_v28  ;;  %v1609_v61 = vmul.f32 %v3506_v26, %v3446_v38  ;;  %v1571_v52 = vmul.f32 %v3469_v56, %v4508_v5 }
 0x23c   : > { %v1736_v1 = vadd.f32 %v4509_v12, %v1696_v41  ;;  %v1662_v63 = vadd.f32 %v3755_v21, %v3838_v45  ;;  %v1508_v3 = vadd.f32 %v1492_v23, %v1452_v13  ;;  %v1532_v59 = vmul.f32 %v3439_v37, %v4028_v2  ;;  %v4512_v37 = vld [vmem:[#allocation40_spill] sm:$0xff] }
 0x23d   : > { %v1735_v8 = vadd.f32 %v4510_v19, %v1695_v44  ;;  %v1737_v10 = vadd.f32 %v4511_v60, %v1697_v4  ;;  %v1663_v28 = vadd.f32 %v3797_v51, %v3903_v17  ;;  %v1687_v62 = vmul.f32 %v3571_v11, %v3908_v9  ;;  %v4513_v51 = vld [vmem:[#allocation44_spill] sm:$0xff] }
 0x23e   : > { %v1649_v46 = vmul.f32 %v3516_v50, %v3878_v25  ;;  %v1624_v24 = vadd.f32 %v1608_v16, %v1584_v22  ;;  %v1586_v21 = vadd.f32 %v1570_v7, %v3817_v27  ;;  %v1610_v45 = vmul.f32 %v3506_v26, %v3352_v54  ;;  %v4514_v27 = vld [vmem:[#allocation47_spill] sm:$0xff]  ;;  %v4520_v44 = vld [vmem:[#allocation52_spill] sm:$0xff] }
 0x23f   : > { %v1775_v29 = vadd.f32 %v4512_v37, %v1735_v8  ;;  %v1625_v34 = vadd.f32 %v1609_v61, %v1585_v47  ;;  %v1587_v39 = vadd.f32 %v1571_v52, %v1547_v43  ;;  %v1611_v58 = vmul.f32 %v3506_v26, %v3354_v55  ;;  %v4516_v7 = vld [vmem:[#allocation27_spill] sm:$0xff]  ;;  %v4517_v43 = vld [vmem:[#allocation53_spill] sm:$0xff] }
 0x240   : > { %v1776_v17 = vadd.f32 %v4513_v51, %v1736_v1  ;;  %v1726_v9 = vmul.f32 %v3587_v0, %v3706_v36  ;;  %v1548_v20 = vadd.f32 %v1532_v59, %v1508_v3  ;;  %v1572_v13 = vmul.f32 %v3469_v56, %v3794_v6  ;;  %v4515_v36 = vld [vmem:[#allocation56_spill] sm:$0xff]  ;;  %v4518_v22 = vld [vmem:[#allocation51_spill] sm:$0xff]  ;;  %v4521_v52 = vld [vmem:[#allocation25_spill] sm:$0xff] }
 0x241   : > { %2694 = vmatprep.mubr.msk.f32.mxu1 %vm1792_vm13, %v1775_v29  ;;  %v1777_v14 = vadd.f32 %v4514_v27, %v1737_v10  ;;  %v1702_v41 = vadd.f32 %v3824_v53, %v1662_v63  ;;  %v1703_v23 = vadd.f32 %v1687_v62, %v1663_v28  ;;  %v1727_v35 = vmul.f32 %v3587_v0, %v3446_v38  ;;  %v4522_v1 = vld [vmem:[#allocation50_spill] sm:$0xff]  ;;  %v4523_v59 = vld [vmem:[#allocation48_spill] sm:$0xff] }
 0x242   : > { %2695 = vmatmul.mubr.msk.f32.vlgmr.msra.gmra.mrb[10].mxu1 %vm1792_vm13, %v1776_v17  ;;  %v1650_v48 = vmul.f32 %v3516_v50, %v4028_v2  ;;  %v1664_v33 = vadd.f32 %v4515_v36, %v1624_v24  ;;  %v1688_v56 = vmul.f32 %v3571_v11, %v3887_v42  ;;  %v1626_v15 = vadd.f32 %v1610_v45, %v1586_v21  ;;  %v4526_v21 = vld [vmem:[#allocation54_spill] sm:$0xff]  ;;  %v4527_v17 = vld [vmem:[#allocation24_spill] sm:$0xff] }
 0x243   : > { %2697 = vmatprep.mubr.msk.f32.mxu1 %vm1792_vm13, %v1777_v14  ;;  %v1665_v18 = vadd.f32 %v1649_v46, %v1625_v34  ;;  %v1689_v53 = vmul.f32 %v3571_v11, %v4508_v5  ;;  %v1627_v4 = vadd.f32 %v1611_v58, %v1587_v39  ;;  %v1651_v38 = vmul.f32 %v3516_v50, %v4516_v7 }
 0x244   : > { %v1780_v16 = vadd.f32 %v4518_v22, %v4517_v43  ;;  %v1781_v47 = vadd.f32 %v4520_v44, %v4519_v32  ;;  %v1588_v61 = vadd.f32 %v1572_v13, %v1548_v20  ;;  %v1612_v42 = vmul.f32 %v3506_v26, %v4521_v52  ;;  %v4524_v26 = vld [vmem:[#allocation49_spill] sm:$0xff] }
 0x245   : > { %v1742_v12 = vadd.f32 %v1726_v9, %v1702_v41  ;;  %v1766_v63 = vmul.f32 %v3600_v30, %v4522_v1  ;;  %v1743_v3 = vadd.f32 %v1727_v35, %v1703_v23  ;;  %v1767_v5 = vmul.f32 %v3600_v30, %v3878_v25  ;;  %v4525_v25 = vld [vmem:[#allocation28_spill] sm:$0xff] }
 0x246   : > { %2698 = vmatmul.mubr.msk.f32.gmra.mrb[12].mxu1 %vm1792_vm13, %v4523_v59  ;;  %v1704_v19 = vadd.f32 %v1688_v56, %v1664_v33  ;;  %v1728_v8 = vmul.f32 %v3587_v0, %v3352_v54  ;;  %v1666_v60 = vadd.f32 %v1650_v48, %v1626_v15  ;;  %v1690_v10 = vmul.f32 %v3571_v11, %v3794_v6  ;;  %v4529_v48 = vld [vmem:[#allocation29_spill] sm:$0xff] }
 0x247   : > { %2700 = vmatprep.mubr.msk.f32.mxu1 %vm1792_vm13, %v4524_v26  ;;  %v1705_v28 = vadd.f32 %v1689_v53, %v1665_v18  ;;  %v1729_v62 = vmul.f32 %v3587_v0, %v3354_v55  ;;  %v1667_v46 = vadd.f32 %v1651_v38, %v1627_v4  ;;  %v1691_v24 = vmul.f32 %v3571_v11, %v4525_v25 }
 0x248   : > { %v1652_v45 = vmul.f32 %v3516_v50, %v4526_v21  ;;  %v1628_v37 = vadd.f32 %v1612_v42, %v1588_v61  ;;  %v1782_v54 = vadd.f32 %v1766_v63, %v1742_v12  ;;  %v1768_v29 = vmul.f32 %v3600_v30, %v4028_v2  ;;  %v4528_v2 = vld [vmem:[#allocation57_spill] sm:$0xff] }
 0x249   : > { %v1783_v6 = vadd.f32 %v1767_v5, %v1743_v3  ;;  %v1744_v34 = vadd.f32 %v1728_v8, %v1704_v19  ;;  %v1706_v39 = vadd.f32 %v1690_v10, %v1666_v60  ;;  %v1730_v55 = vmul.f32 %v3587_v0, %v4521_v52 }
 0x24a   : > { %2701 = vmatmul.mubr.msk.f32.gmra.mrb[14].mxu1 %vm1792_vm13, %v1780_v16  ;;  %v1745_v58 = vadd.f32 %v1729_v62, %v1705_v28  ;;  %v1769_v51 = vmul.f32 %v3600_v30, %v4516_v7  ;;  %v1707_v50 = vadd.f32 %v1691_v24, %v1667_v46  ;;  %v1731_v9 = vmul.f32 %v3587_v0, %v4527_v17 }
 0x24b   : > { %2703 = vmatprep.mubr.msk.f32.mxu1 %vm1792_vm13, %v1781_v47  ;;  %v1668_v20 = vadd.f32 %v1652_v45, %v1628_v37  ;;  %v1692_v13 = vmul.f32 %v3571_v11, %v4528_v2  ;;  %v1784_v27 = vadd.f32 %v1768_v29, %v1744_v34  ;;  %v1746_v14 = vadd.f32 %v1730_v55, %v1706_v39 }
 0x24c   : > { %v1770_v41 = vmul.f32 %v3600_v30, %v4526_v21  ;;  %v1785_v23 = vadd.f32 %v1769_v51, %v1745_v58  ;;  %v1747_v35 = vadd.f32 %v1731_v9, %v1707_v50  ;;  %v1771_v36 = vmul.f32 %v3600_v30, %v4529_v48 }
 0x24d   : > { %v1708_v33 = vadd.f32 %v1692_v13, %v1668_v20  ;;  %v1732_v56 = vmul.f32 %v3587_v0, %v3449_v40  ;;  %v1772_v53 = vmul.f32 %v3600_v30, %v3985_v49  ;;  %v2052_v40 = vld [vmem:[%s4530_s29] sm:$0xf]  ;;  %s2589_s29 = sshll.u32 %s2373_s24, 7 }
 0x24e   : > { %2704 = vmatmul.mubr.msk.f32.gmra.mrb[16].mxu1 %vm1792_vm13, %v1782_v54  ;;  %v1786_v11 = vadd.f32 %v1770_v41, %v1746_v14  ;;  %v1787_v15 = vadd.f32 %v1771_v36, %v1747_v35  ;;  %2718 = vmatprep.subr.msk.mxu0 %vm1841_vm1, %v2052_v40  ;;  %v4148_v0 = vld [vmem:[%s4531_s0] ss:$0 sm:$0xff]  ;;  %s4297_s0 = scalar_lea.hbm %s4535_s12, %s2589_s29 }
 0x24f   : > { %2706 = vmatprep.mubr.msk.f32.mxu1 %vm1792_vm13, %v1783_v6  ;;  %v1748_v18 = vadd.f32 %v1732_v56, %v1708_v33  ;;  %2719 = vmatpush3.msk.msra.mxu0 %vm1841_vm1, %v2052_v40  ;;  %v4153_v49 = vld [vmem:[%s4532_s5] ss:$0 sm:$0xff]  ;;  %s3025_s5 = smov [#allocation7]  }
 0x250   : > { %s2920_s14 = sshll.u32 %s3025_s5, 4  ;;  %s2921_s14 = int_to_ptr.vmem [resolvable:$false] %s2920_s14 }
 0x251   : > { %v1788_v4 = vadd.f32 %v1772_v53, %v1748_v18  ;;  %s2922_s9 = scalar_lea.vmem %s2921_s14, 4096  ;;  %p2923_p11 = scmp.lt.s32.totalorder %s4292_s25, %s2921_s14 }
 0x252   : > { %2707 = vmatmul.mubr.msk.f32.gmra.mrb[18].mxu1 %vm1792_vm13, %v1784_v27  ;;  %p2924_p13 = scmp.lt.s32.totalorder %s2922_s9, %s2916_s8 }
 0x253   : > { %2709 = vmatprep.mubr.msk.f32.mxu1 %vm1792_vm13, %v1785_v23 }
 0x254   : > { %p2925_p1 = por %p2924_p13, %p2923_p11 }
 0x256   : > { %2710 = vmatmul.mubr.msk.f32.gmra.mrb[20].mxu1 %vm1792_vm13, %v1786_v11  ;;  %p2926_p3 = pnand %p2925_p1, %p2919_p0 }
 0x257   : > { %2712 = vmatprep.mubr.msk.f32.mxu1 %vm1792_vm13, %v1787_v15 }
 0x25a   : > { %2713 = vmatmul.mubr.msk.f32.gmra.mrb[22].mxu1 %vm1792_vm13, %v1788_v4 }
 0x25b   : > { %2715 = vmatprep.mubr.msk.f32.mxu1 %vm1792_vm13, %v4018_v57 }
 0x25e   : > { %2716 = vmatmul.mubr.msk.f32.gmra.mrb[24].mxu1 %vm1792_vm13, %v4037_v31 }
 0x315   : > { %v2696_v30 = vpop.f32.mrb[10].mxu1 }
 0x316   : > { %v1998_v57 = vmul.f32 %v2696_v30, %v4148_v0  ;;  %v1911_v31 = vpop.f32.mrb[11].mxu1 }
 0x317   : > { %v1997_v7 = vmul.f32 %v4148_v0, %v1911_v31 }
 0x318   : > { %v2021_v38 = vadd.f32 %v4153_v49, %v1998_v57 }
 0x319   : > { %v2699_v43 = vpop.f32.mrb[12].mxu1  ;;  %v2020_v22 = vadd.f32 %v4153_v49, %v1997_v7 }
 0x31a   : > { %v2000_v16 = vmul.f32 %v2699_v43, %v4148_v0  ;;  %v1921_v32 = vpop.f32.mrb[13].mxu1  ;;  %v2037_v61 = vmax.f32 %v2021_v38, 0.0  ;;  %v2296_v43 = vld [vmem:[%s3225_s17 + $0x8] sm:$0xff] }
 0x31b   : > { %v1999_v44 = vmul.f32 %v4148_v0, %v1921_v32  ;;  %v2036_v47 = vmax.f32 %v2020_v22, 0.0  ;;  %v2295_v32 = vld [vmem:[%s3225_s17] sm:$0xff] }
 0x31c   : > { %v2023_v52 = vadd.f32 %v4153_v49, %v2000_v16 }
 0x31d   : > { %v2022_v42 = vadd.f32 %v4153_v49, %v1999_v44  ;;  %v2702_v12 = vpop.f32.mrb[14].mxu1  ;;  %2720 = vmatprep.mubr.msk.f32.mxu0 %vm1792_vm13, %v2036_v47 }
 0x31e   : > { %v2002_v1 = vmul.f32 %v2702_v12, %v4148_v0  ;;  %v1931_v63 = vpop.f32.mrb[15].mxu1  ;;  %2721 = vmatmul.mubr.msk.f32.vlgmr.msra.gmra.mrb[10].mxu0 %vm1792_vm13, %v2037_v61  ;;  %v2039_v59 = vmax.f32 %v2023_v52, 0.0 }
 0x31f   : > { %v2038_v3 = vmax.f32 %v2022_v42, 0.0  ;;  %v2001_v5 = vmul.f32 %v4148_v0, %v1931_v63 }
 0x320   : > { %v2025_v19 = vadd.f32 %v4153_v49, %v2002_v1  ;;  %v2298_v1 = vld [vmem:[%s3225_s17 + $0x18] sm:$0xff] }
 0x321   : > { %v2024_v8 = vadd.f32 %v4153_v49, %v2001_v5  ;;  %v2705_v60 = vpop.f32.mrb[16].mxu1  ;;  %2723 = vmatprep.mubr.msk.f32.mxu0 %vm1792_vm13, %v2038_v3 }
 0x322   : > { %v2004_v10 = vmul.f32 %v2705_v60, %v4148_v0  ;;  %v1941_v26 = vpop.f32.mrb[17].mxu1  ;;  %2724 = vmatmul.mubr.msk.f32.gmra.mrb[12].mxu0 %vm1792_vm13, %v2039_v59  ;;  %v2041_v46 = vmax.f32 %v2025_v19, 0.0  ;;  %v2297_v59 = vld [vmem:[%s3225_s17 + $0x10] sm:$0xff] }
 0x323   : > { %v2040_v28 = vmax.f32 %v2024_v8, 0.0  ;;  %v2003_v62 = vmul.f32 %v4148_v0, %v1941_v26 }
 0x324   : > { %v2027_v25 = vadd.f32 %v4153_v49, %v2004_v10 }
 0x325   : > { %v2026_v24 = vadd.f32 %v4153_v49, %v2003_v62  ;;  %v2708_v21 = vpop.f32.mrb[18].mxu1  ;;  %2726 = vmatprep.mubr.msk.f32.mxu0 %vm1792_vm13, %v2040_v28 }
 0x326   : > { %v2006_v45 = vmul.f32 %v2708_v21, %v4148_v0  ;;  %v1951_v37 = vpop.f32.mrb[19].mxu1  ;;  %2727 = vmatmul.mubr.msk.f32.gmra.mrb[14].mxu0 %vm1792_vm13, %v2041_v46  ;;  %v2043_v6 = vmax.f32 %v2027_v25, 0.0  ;;  %v2300_v46 = vld [vmem:[%s3225_s17 + $0x28] sm:$0xff] }
 0x327   : > { %v2042_v54 = vmax.f32 %v2026_v24, 0.0  ;;  %v2005_v29 = vmul.f32 %v4148_v0, %v1951_v37 }
 0x328   : > { %v2029_v34 = vadd.f32 %v4153_v49, %v2006_v45  ;;  %v2299_v45 = vld [vmem:[%s3225_s17 + $0x20] sm:$0xff] }
 0x329   : > { %v2028_v39 = vadd.f32 %v4153_v49, %v2005_v29  ;;  %v2711_v55 = vpop.f32.mrb[20].mxu1  ;;  %2729 = vmatprep.mubr.msk.f32.mxu0 %vm1792_vm13, %v2042_v54 }
 0x32a   : > { %v2008_v58 = vmul.f32 %v2711_v55, %v4148_v0  ;;  %v1961_v51 = vpop.f32.mrb[21].mxu1  ;;  %2730 = vmatmul.mubr.msk.f32.gmra.mrb[16].mxu0 %vm1792_vm13, %v2043_v6  ;;  %v2045_v9 = vmax.f32 %v2029_v34, 0.0 }
 0x32b   : > { %v2044_v50 = vmax.f32 %v2028_v39, 0.0  ;;  %v2007_v17 = vmul.f32 %v4148_v0, %v1961_v51 }
 0x32c   : > { %v2031_v20 = vadd.f32 %v4153_v49, %v2008_v58  ;;  %v2302_v58 = vld [vmem:[%s3225_s17 + $0x38] sm:$0xff] }
 0x32d   : > { %v2030_v2 = vadd.f32 %v4153_v49, %v2007_v17  ;;  %v2714_v13 = vpop.f32.mrb[22].mxu1  ;;  %2732 = vmatprep.mubr.msk.f32.mxu0 %vm1792_vm13, %v2044_v50 }
 0x32e   : > { %v2010_v27 = vmul.f32 %v2714_v13, %v4148_v0  ;;  %v1971_v14 = vpop.f32.mrb[23].mxu1  ;;  %2733 = vmatmul.mubr.msk.f32.gmra.mrb[18].mxu0 %vm1792_vm13, %v2045_v9  ;;  %v2047_v35 = vmax.f32 %v2031_v20, 0.0  ;;  %v2301_v9 = vld [vmem:[%s3225_s17 + $0x30] sm:$0xff] }
 0x32f   : > { %v2046_v41 = vmax.f32 %v2030_v2, 0.0  ;;  %v2009_v23 = vmul.f32 %v4148_v0, %v1971_v14 }
 0x330   : > { %v2033_v48 = vadd.f32 %v4153_v49, %v2010_v27 }
 0x331   : > { %v2032_v36 = vadd.f32 %v4153_v49, %v2009_v23  ;;  %v2717_v33 = vpop.f32.mrb[24].mxu1  ;;  %2735 = vmatprep.mubr.msk.f32.mxu0 %vm1792_vm13, %v2046_v41 }
 0x332   : > { %v2012_v56 = vmul.f32 %v2717_v33, %v4148_v0  ;;  %v1981_v11 = vpop.f32.mrb[25].mxu1  ;;  %2736 = vmatmul.mubr.msk.f32.gmra.mrb[20].mxu0 %vm1792_vm13, %v2047_v35  ;;  %v2049_v53 = vmax.f32 %v2033_v48, 0.0  ;;  %v2304_v35 = vld [vmem:[%s3225_s17 + $0x48] sm:$0xff] }
 0x333   : > { %v2048_v15 = vmax.f32 %v2032_v36, 0.0  ;;  %v2011_v18 = vmul.f32 %v4148_v0, %v1981_v11  ;;  %v4206_v0 = vld [vmem:[%s4533_s15] ss:$0 sm:$0xff] }
 0x334   : > { %v2035_v4 = vadd.f32 %v4153_v49, %v2012_v56  ;;  %v2303_v56 = vld [vmem:[%s3225_s17 + $0x40] sm:$0xff] }
 0x335   : > { %v2034_v40 = vadd.f32 %v4153_v49, %v2011_v18  ;;  %2738 = vmatprep.mubr.msk.f32.mxu0 %vm1792_vm13, %v2048_v15  ;;  %v4211_v49 = vld [vmem:[%s4534_s30] ss:$0 sm:$0xff] }
 0x336   : > { %2739 = vmatmul.mubr.msk.f32.gmra.mrb[22].mxu0 %vm1792_vm13, %v2049_v53  ;;  %v2051_v57 = vmax.f32 %v2035_v4, 0.0 }
 0x337   : > { %v2050_v30 = vmax.f32 %v2034_v40, 0.0 }
 0x339   : > { %2741 = vmatprep.mubr.msk.f32.mxu0 %vm1792_vm13, %v2050_v30 }
 0x33a   : > { %2742 = vmatmul.mubr.msk.f32.gmra.mrb[24].mxu0 %vm1792_vm13, %v2051_v57  ;;  %v2306_v57 = vld [vmem:[%s3225_s17 + $0x58] sm:$0xff] }
 0x3f1   : > { %v2722_v31 = vpop.f32.mrb[10].mxu0 }
 0x3f2   : > { %v2257_v7 = vmul.f32 %v2722_v31, %v4206_v0  ;;  %v2170_v38 = vpop.f32.mrb[11].mxu0 }
 0x3f3   : > { %v2256_v22 = vmul.f32 %v4206_v0, %v2170_v38 }
 0x3f4   : > { %v2280_v16 = vadd.f32 %v4211_v49, %v2257_v7 }
 0x3f5   : > { %v2279_v44 = vadd.f32 %v4211_v49, %v2256_v22  ;;  %v2725_v47 = vpop.f32.mrb[12].mxu0 }
 0x3f6   : > { %v2312_v61 = vadd.f32 %v2296_v43, %v2280_v16  ;;  %v2259_v52 = vmul.f32 %v2725_v47, %v4206_v0  ;;  %v2180_v42 = vpop.f32.mrb[13].mxu0  ;;  %v2305_v43 = vld [vmem:[%s3225_s17 + $0x50] sm:$0xff] }
 0x3f7   : > { %v2311_v12 = vadd.f32 %v2295_v32, %v2279_v44  ;;  %v2258_v63 = vmul.f32 %v4206_v0, %v2180_v42  ;;  %v2308_v42 = vld [vmem:[%s3225_s17 + $0x68] sm:$0xff] }
 0x3f8   : > { %v2328_v3 = vmax.f32 %v2312_v61, 0.0  ;;  %v2282_v5 = vadd.f32 %v4211_v49, %v2259_v52 }
 0x3f9   : > { %v2327_v19 = vmax.f32 %v2311_v12, 0.0  ;;  %v2281_v8 = vadd.f32 %v4211_v49, %v2258_v63  ;;  %v2728_v60 = vpop.f32.mrb[14].mxu0 }
 0x3fa   : > { %2344 = vst.msk [vmem:[%s3316_s16 + $0x8] sm:$0xff] %vm485_vm0, %v2328_v3  ;;  %v2314_v10 = vadd.f32 %v2298_v1, %v2282_v5  ;;  %v2261_v26 = vmul.f32 %v2728_v60, %v4206_v0  ;;  %v2190_v28 = vpop.f32.mrb[15].mxu0  ;;  %v2307_v3 = vld [vmem:[%s3225_s17 + $0x60] sm:$0xff] }
 0x3fb   : > { %2343 = vst.msk [vmem:[%s3316_s16] sm:$0xff] %vm485_vm0, %v2327_v19  ;;  %v2313_v62 = vadd.f32 %v2297_v59, %v2281_v8  ;;  %v2260_v25 = vmul.f32 %v4206_v0, %v2190_v28  ;;  %v2310_v28 = vld [vmem:[%s3225_s17 + $0x78] sm:$0xff] }
 0x3fc   : > { %v2330_v24 = vmax.f32 %v2314_v10, 0.0  ;;  %v2284_v21 = vadd.f32 %v4211_v49, %v2261_v26 }
 0x3fd   : > { %v2329_v37 = vmax.f32 %v2313_v62, 0.0  ;;  %v2283_v54 = vadd.f32 %v4211_v49, %v2260_v25  ;;  %v2731_v29 = vpop.f32.mrb[16].mxu0 }
 0x3fe   : > { %2346 = vst.msk [vmem:[%s3316_s16 + $0x18] sm:$0xff] %vm485_vm0, %v2330_v24  ;;  %v2316_v6 = vadd.f32 %v2300_v46, %v2284_v21  ;;  %v2263_v34 = vmul.f32 %v2731_v29, %v4206_v0  ;;  %v2200_v39 = vpop.f32.mrb[17].mxu0  ;;  %v2309_v24 = vld [vmem:[%s3225_s17 + $0x70] sm:$0xff] }
 0x3ff   : > { %2345 = vst.msk [vmem:[%s3316_s16 + $0x10] sm:$0xff] %vm485_vm0, %v2329_v37  ;;  %v2315_v55 = vadd.f32 %v2299_v45, %v2283_v54  ;;  %v2262_v51 = vmul.f32 %v4206_v0, %v2200_v39 }
 0x400   : > { %v2332_v50 = vmax.f32 %v2316_v6, 0.0  ;;  %v2286_v17 = vadd.f32 %v4211_v49, %v2263_v34 }
 0x401   : > { %v2331_v20 = vmax.f32 %v2315_v55, 0.0  ;;  %v2285_v2 = vadd.f32 %v4211_v49, %v2262_v51  ;;  %v2734_v13 = vpop.f32.mrb[18].mxu0 }
 0x402   : > { %2348 = vst.msk [vmem:[%s3316_s16 + $0x28] sm:$0xff] %vm485_vm0, %v2332_v50  ;;  %v2318_v27 = vadd.f32 %v2302_v58, %v2286_v17  ;;  %v2265_v14 = vmul.f32 %v2734_v13, %v4206_v0  ;;  %v2210_v41 = vpop.f32.mrb[19].mxu0 }
 0x403   : > { %2347 = vst.msk [vmem:[%s3316_s16 + $0x20] sm:$0xff] %vm485_vm0, %v2331_v20  ;;  %v2317_v23 = vadd.f32 %v2301_v9, %v2285_v2  ;;  %v2264_v48 = vmul.f32 %v4206_v0, %v2210_v41 }
 0x404   : > { %v2334_v36 = vmax.f32 %v2318_v27, 0.0  ;;  %v2288_v33 = vadd.f32 %v4211_v49, %v2265_v14 }
 0x405   : > { %v2333_v11 = vmax.f32 %v2317_v23, 0.0  ;;  %v2287_v15 = vadd.f32 %v4211_v49, %v2264_v48  ;;  %v2737_v18 = vpop.f32.mrb[20].mxu0 }
 0x406   : > { %2350 = vst.msk [vmem:[%s3316_s16 + $0x38] sm:$0xff] %vm485_vm0, %v2334_v36  ;;  %v2320_v53 = vadd.f32 %v2304_v35, %v2288_v33  ;;  %v2267_v4 = vmul.f32 %v2737_v18, %v4206_v0  ;;  %v2220_v40 = vpop.f32.mrb[21].mxu0 }
 0x407   : > { %2349 = vst.msk [vmem:[%s3316_s16 + $0x30] sm:$0xff] %vm485_vm0, %v2333_v11  ;;  %v2319_v30 = vadd.f32 %v2303_v56, %v2287_v15  ;;  %v2266_v31 = vmul.f32 %v4206_v0, %v2220_v40 }
 0x408   : > { %v2336_v7 = vmax.f32 %v2320_v53, 0.0  ;;  %v2290_v38 = vadd.f32 %v4211_v49, %v2267_v4 }
 0x409   : > { %v2335_v22 = vmax.f32 %v2319_v30, 0.0  ;;  %v2289_v16 = vadd.f32 %v4211_v49, %v2266_v31  ;;  %v2740_v32 = vpop.f32.mrb[22].mxu0 }
 0x40a   : > { %2352 = vst.msk [vmem:[%s3316_s16 + $0x48] sm:$0xff] %vm485_vm0, %v2336_v7  ;;  %v2322_v44 = vadd.f32 %v2306_v57, %v2290_v38  ;;  %v2269_v47 = vmul.f32 %v2740_v32, %v4206_v0  ;;  %v2230_v61 = vpop.f32.mrb[23].mxu0 }
 0x40b   : > { %2351 = vst.msk [vmem:[%s3316_s16 + $0x40] sm:$0xff] %vm485_vm0, %v2335_v22  ;;  %v2321_v52 = vadd.f32 %v2305_v43, %v2289_v16  ;;  %v2268_v12 = vmul.f32 %v4206_v0, %v2230_v61 }
 0x40c   : > { %v2338_v1 = vmax.f32 %v2322_v44, 0.0  ;;  %v2292_v63 = vadd.f32 %v4211_v49, %v2269_v47 }
 0x40d   : > { %v2337_v5 = vmax.f32 %v2321_v52, 0.0  ;;  %v2291_v59 = vadd.f32 %v4211_v49, %v2268_v12  ;;  %v2743_v19 = vpop.f32.mrb[24].mxu0 }
 0x40e   : > { %2354 = vst.msk [vmem:[%s3316_s16 + $0x58] sm:$0xff] %vm485_vm0, %v2338_v1  ;;  %v2324_v8 = vadd.f32 %v2308_v42, %v2292_v63  ;;  %v2271_v60 = vmul.f32 %v2743_v19, %v4206_v0  ;;  %v2240_v10 = vpop.f32.mrb[25].mxu0 }
 0x40f   : > { %2353 = vst.msk [vmem:[%s3316_s16 + $0x50] sm:$0xff] %vm485_vm0, %v2337_v5  ;;  %v2323_v26 = vadd.f32 %v2307_v3, %v2291_v59  ;;  %v2270_v62 = vmul.f32 %v4206_v0, %v2240_v10 }
 0x410   : > { %v2340_v46 = vmax.f32 %v2324_v8, 0.0  ;;  %v2294_v25 = vadd.f32 %v4211_v49, %v2271_v60 }
 0x411   : > { %v2339_v21 = vmax.f32 %v2323_v26, 0.0  ;;  %v2293_v45 = vadd.f32 %v4211_v49, %v2270_v62 }
 0x412   : > { %2356 = vst.msk [vmem:[%s3316_s16 + $0x68] sm:$0xff] %vm485_vm0, %v2340_v46  ;;  %v2326_v37 = vadd.f32 %v2310_v28, %v2294_v25 }
 0x413   : > { %2355 = vst.msk [vmem:[%s3316_s16 + $0x60] sm:$0xff] %vm485_vm0, %v2339_v21  ;;  %v2325_v0 = vadd.f32 %v2309_v24, %v2293_v45 }
 0x414   : > { %v2342_v54 = vmax.f32 %v2326_v37, 0.0 }
 0x415   : > { %v2341_v29 = vmax.f32 %v2325_v0, 0.0 }
 0x416   : > { %2358 = vst.msk [vmem:[%s3316_s16 + $0x78] sm:$0xff] %vm485_vm0, %v2342_v54 }
 0x417   : > { %2357 = vst.msk [vmem:[%s3316_s16 + $0x70] sm:$0xff] %vm485_vm0, %v2341_v29 }
 0x418   : > { %2929 = shalt.err (!%p2926_p3)
}
 0x419   : > { %s2930_s16 = scalar_lea.hbm %s4297_s0, 2048  ;;  %s2934_s26 = scalar_lea.hbm %s4535_s12, 8192 }
 0x41a   : > { %p2931_p5 = scmp.ne.s32.totalorder %s4297_s0, %s2930_s16  ;;  %p2935_p2 = scmp.lt.u32.totalorder %s4297_s0, %s4535_s12 }
 0x41b   : > { %p2936_p4 = scmp.lt.u32.totalorder %s2934_s26, %s2930_s16  ;;  %p2938_p8 = scmp.lt.u32.totalorder %s2930_s16, %s4297_s0 }
 0x41c   : > { %p2932_p6 = pnand %p2931_p5, %p4536_p9 }
 0x41d   : > { %p2937_p10 = por %p2936_p4, %p2935_p2 }
 0x41e   : > { %p2933_p7 = pneg %p2932_p6 }
 0x41f   : > { %p2939_p12 = por %p2938_p8, %p2937_p10 }
 0x421   : > { %p2940_p0 = pnand %p2939_p12, %p2933_p7 }
 0x423   : > { %2943 = shalt.err (!%p2940_p0)
}
 0x424   : > { %s3026_s7 = smov 128   ;;  %s3027_s24 = smov 8  }
 0x425   : > { %2756 = dma.vmem_to_hbm [thread:$0]  (%p4536_p9), %s4292_s25, 2048, %s4297_s0, %s2360_s27, %s3026_s7, %s3026_s7, %s3027_s24  }
 0x426 PF: > { %s4537_s29 = sld [smem:[#allocation18_spill]]  ;;  %p2767_p11 = scmp.ge.s32.totalorder %s3018_s28, 2 }
 0x427   : > { %p4538_p13 = scmp.ne.s32.totalorder %s4417_s21, 0 }
 0x429   : > { %p2763_p1 = pnand %p2767_p11, %p4538_p13 }
 0x42c   : > { %s2391_s17 = sand.u32 1, %s4537_s29  }
 0x42d   : > { %s2392_s13 = scalar_lea.sflag [#allocation6], %s2391_s17 }
 0x42e   : > { %2985 = dma.done.wait (!%p2763_p1), %s2392_s13, 2048  }
 0x42f   : > { %2987 = vsyncadd (!%p2763_p1), %s2392_s13, 4294965248  ;;  %s28_s28 = sadd.s32 1, %s3018_s28   ;;  %s4539_s8 = sld [smem:[#allocation23_spill]] }
 0x430   : > { %p25_p3 = scmp.ge.s32.totalorder %s28_s28, 6   ;;  %s4540_s24 = sld [smem:[#allocation19_spill]] }
 0x431   : > { %s4541_s25 = sld [smem:[#allocation20_spill]]  ;;  %s4542_s26 = sld [smem:[#allocation21_spill]] }
 0x432   : > { %s4543_s27 = sld [smem:[#allocation22_spill]]  ;;  %s4544_s21 = smov %s2994_s22 }
 0x433   : > { %s4545_s22 = smov %s2998_s23  ;;  %27 = sbr.rel (!%p25_p3) target bundleno = 16 (0x10), region = 130 }
 0x435   : > { %s4546_s23 = smov %s4539_s8 }
 0x43a   :  { %2397 = vsyncpa [#allocation5], 1 }
 0x43b   :  { %2399 = vsyncpa [#allocation5 + $0x1], 1 }
 0x43c   :  { %2400 = vsyncpa [#allocation6], 1 }
 0x43d   :  { %2402 = vsyncpa [#allocation6 + $0x1], 1 }
 0x43e   :  { %2403 = vsyncmov [#allocation3] }
 0x441   :  { %s2404_s19 = vpop.sfrf %2403 }
 0x442   :  { %p2592_p9 = scmp.ne.s32.totalorder %s2404_s19, 0 }
 0x444   :  { %2408 = shalt.err (%p2592_p9)  }
 0x445   :  { %2410 = vsyncmov [#allocation3 + $0x1] }
 0x448   :  { %s2411_s10 = vpop.sfrf %2410 }
 0x449   :  { %p2593_p5 = scmp.ne.s32.totalorder %s2411_s10, 0 }
 0x44b   :  { %2415 = shalt.err (%p2593_p5)  }

</bundles_post_ra>
